<compile_context>
chip_gen: v5e
topology: v5e:2x2
jax: 0.10.0
libtpu: 0.0.40
codegen_flags: <defaults>
</compile_context>

<pallas_src>
import jax
import jax.numpy as jnp
from jax.experimental import pallas as pl
from jax.experimental.pallas import tpu as pltpu

EPS = 1e-5  # PyTorch InstanceNorm2d default eps


def _make_fused_kernel(H, W, C):
    """One image: relu(IN(conv1(x))) -> IN(conv2(.)) -> + x, all in VMEM."""
    HW = H * W

    def kernel(x_ref, w1_ref, w2_ref, o_ref, xpad_ref):
        x = x_ref[0].astype(jnp.float32)            # (H, W, C)

        # Zero the padded scratch once per grid step; only the interior is
        # ever overwritten, so the 1-pixel halo stays zero for both stages.
        xpad_ref[...] = jnp.zeros_like(xpad_ref)

        def conv3x3_instnorm(x_hwc, w_ref):
            # In-VMEM zero padding (no wrapper-side jnp.pad / HBM pass).
            xpad_ref[pl.ds(1, H), pl.ds(1, W), :] = x_hwc
            xp = xpad_ref[...]                       # (H+2, W+2, C)

            # im2col: one (HW, 9C) x (9C, C) MXU matmul instead of 9 taps.
            patches = jnp.concatenate(
                [xp[dy:dy + H, dx:dx + W, :].reshape(HW, C)
                 for dy in range(3) for dx in range(3)],
                axis=-1)                             # (HW, 9C)
            y = jnp.dot(patches, w_ref[...],
                        preferred_element_type=jnp.float32)   # (HW, C)

            # InstanceNorm2d (affine=False): per-channel over H*W,
            # biased variance, eps inside the rsqrt (PyTorch defaults).
            mean = jnp.mean(y, axis=0, keepdims=True)
            var = jnp.mean((y - mean) ** 2, axis=0, keepdims=True)
            return (y - mean) * jax.lax.rsqrt(var + EPS)

        y1 = jnp.maximum(conv3x3_instnorm(x, w1_ref), 0.0)      # relu(IN(conv1))
        y2 = conv3x3_instnorm(y1.reshape(H, W, C), w2_ref)      # IN(conv2)
        out = y2 + x.reshape(HW, C)                             # residual

        o_ref[0] = out.reshape(H, W, C).astype(o_ref.dtype)

    return kernel


def _residual_block_nhwc(x_nhwc, w1f, w2f):
    N, H, W, C = x_nhwc.shape
    kernel = _make_fused_kernel(H, W, C)
    return pl.pallas_call(
        kernel,
        out_shape=jax.ShapeDtypeStruct((N, H, W, C), x_nhwc.dtype),
        grid=(N,),
        in_specs=[
            pl.BlockSpec((1, H, W, C), lambda n: (n, 0, 0, 0)),
            pl.BlockSpec((9 * C, C), lambda n: (0, 0)),   # constant -> DMA'd once
            pl.BlockSpec((9 * C, C), lambda n: (0, 0)),   # constant -> DMA'd once
        ],
        out_specs=pl.BlockSpec((1, H, W, C), lambda n: (n, 0, 0, 0)),
        scratch_shapes=[pltpu.VMEM((H + 2, W + 2, C), jnp.float32)],
        compiler_params=pltpu.CompilerParams(
            dimension_semantics=("parallel",)),   # v7x: batch split over 2 TCs
    )(x_nhwc, w1f, w2f)


@jax.jit
def residual_block(x_nchw, w1_oihw, w2_oihw):
    """ResidualBlock.forward: a + IN(conv2(relu(IN(conv1(a)))))."""
    N, C, H, W = x_nchw.shape
    x = jnp.transpose(x_nchw, (0, 2, 3, 1))                       # NHWC
    # (Cout, Cin, 3, 3) -> rows ordered (dy, dx, cin) -> (9*Cin, Cout)
    w1f = jnp.transpose(w1_oihw, (2, 3, 1, 0)).reshape(9 * C, C)
    w2f = jnp.transpose(w2_oihw, (2, 3, 1, 0)).reshape(9 * C, C)
    out = _residual_block_nhwc(x, w1f, w2f)
    return jnp.transpose(out, (0, 3, 1, 2))                       # back to NCHW


def _reference(x_nchw, w1, w2):
    """Pure-JAX reference with identical semantics (correctness check)."""
    def conv_in(x, w):
        y = jax.lax.conv_general_dilated(
            x, w, window_strides=(1, 1), padding=((1, 1), (1, 1)),
            dimension_numbers=("NCHW", "OIHW", "NCHW"))
        mean = y.mean(axis=(2, 3), keepdims=True)
        var = ((y - mean) ** 2).mean(axis=(2, 3), keepdims=True)
        return (y - mean) / jnp.sqrt(var + EPS)

    out1 = jax.nn.relu(conv_in(x_nchw, w1))
    return x_nchw + conv_in(out1, w2)


if __name__ == "__main__":
    N, C, H, W = 2, 4, 16, 16  # convolutional_dimention = 4

    key = jax.random.PRNGKey(0)
    kx, k1, k2 = jax.random.split(key, 3)
    x = jax.random.normal(kx, (N, C, H, W), dtype=jnp.float32)
    # Conv2d weights: (out_channels, in_channels, 3, 3), no bias.
    w1 = jax.random.normal(k1, (C, C, 3, 3), dtype=jnp.float32) * 0.1
    w2 = jax.random.normal(k2, (C, C, 3, 3), dtype=jnp.float32) * 0.1

    out = residual_block(x, w1, w2)
    out = jax.block_until_ready(out)

    ref = _reference(x, w1, w2)
    assert out.shape == (N, C, H, W)
    err = jnp.max(jnp.abs(out - ref))
    assert jnp.allclose(out, ref, atol=1e-4, rtol=1e-4), f"max abs err {err}"

    print("KERNEL_OK")
</pallas_src>

<mosaic_0001>
module attributes {stable_mosaic.version = 11 : i64} {
  func.func @kernel(%arg0: i32, %arg1: memref<1x16x16x4xf32, #tpu.memory_space<vmem>>, %arg2: memref<36x4xf32, #tpu.memory_space<vmem>>, %arg3: memref<36x4xf32, #tpu.memory_space<vmem>>, %arg4: memref<1x16x16x4xf32, #tpu.memory_space<vmem>>, %arg5: memref<18x18x4xf32, #tpu.memory_space<vmem>>) attributes {dimension_semantics = [#tpu.dimension_semantics<parallel>], iteration_bounds = array<i64: 2>, scalar_prefetch = 0 : i64, scratch_operands = 1 : i64, tpu.core_type = #tpu.core_type<tc>, window_params = [{transform_indices = @transform_0, window_bounds = array<i64: 1, 16, 16, 4>}, {pipeline_mode = #tpu.pipeline_mode<synchronous>, transform_indices = @transform_1, window_bounds = array<i64: 36, 4>}, {pipeline_mode = #tpu.pipeline_mode<synchronous>, transform_indices = @transform_2, window_bounds = array<i64: 36, 4>}, {transform_indices = @transform_3, window_bounds = array<i64: 1, 16, 16, 4>}]} {
    %c0 = arith.constant 0 : index
    %c0_0 = arith.constant 0 : index
    %c0_1 = arith.constant 0 : index
    %c0_2 = arith.constant 0 : index
    %0 = vector.load %arg1[%c0, %c0_0, %c0_1, %c0_2] : memref<1x16x16x4xf32, #tpu.memory_space<vmem>>, vector<1x16x16x4xf32>
    %1 = vector.shape_cast %0 : vector<1x16x16x4xf32> to vector<16x16x4xf32>
    %cst = arith.constant 0.000000e+00 : f32
    %2 = vector.broadcast %cst : f32 to vector<18x18x4xf32>
    %c0_3 = arith.constant 0 : index
    %c0_4 = arith.constant 0 : index
    %c0_5 = arith.constant 0 : index
    %3 = vector.load %arg5[%c0_3, %c0_4, %c0_5] : memref<18x18x4xf32, #tpu.memory_space<vmem>>, vector<18x18x4xf32>
    tpu.vector_store %arg5[%c0_3, %c0_4, %c0_5], %2 {strides = array<i32>} : memref<18x18x4xf32, #tpu.memory_space<vmem>>, vector<18x18x4xf32>,
    %c1 = arith.constant 1 : index
    %c1_6 = arith.constant 1 : index
    %c0_7 = arith.constant 0 : index
    %4 = vector.load %arg5[%c1, %c1_6, %c0_7] : memref<18x18x4xf32, #tpu.memory_space<vmem>>, vector<16x16x4xf32>
    tpu.vector_store %arg5[%c1, %c1_6, %c0_7], %1 {strides = array<i32>} : memref<18x18x4xf32, #tpu.memory_space<vmem>>, vector<16x16x4xf32>,
    %c0_8 = arith.constant 0 : index
    %c0_9 = arith.constant 0 : index
    %c0_10 = arith.constant 0 : index
    %5 = vector.load %arg5[%c0_8, %c0_9, %c0_10] : memref<18x18x4xf32, #tpu.memory_space<vmem>>, vector<18x18x4xf32>
    %6 = vector.extract_strided_slice %5 {offsets = [0, 0, 0], sizes = [16, 16, 4], strides = [1, 1, 1]} : vector<18x18x4xf32> to vector<16x16x4xf32>
    %7 = vector.shape_cast %6 : vector<16x16x4xf32> to vector<256x4xf32>
    %8 = vector.extract_strided_slice %5 {offsets = [0, 1, 0], sizes = [16, 16, 4], strides = [1, 1, 1]} : vector<18x18x4xf32> to vector<16x16x4xf32>
    %9 = vector.shape_cast %8 : vector<16x16x4xf32> to vector<256x4xf32>
    %10 = vector.extract_strided_slice %5 {offsets = [0, 2, 0], sizes = [16, 16, 4], strides = [1, 1, 1]} : vector<18x18x4xf32> to vector<16x16x4xf32>
    %11 = vector.shape_cast %10 : vector<16x16x4xf32> to vector<256x4xf32>
    %12 = vector.extract_strided_slice %5 {offsets = [1, 0, 0], sizes = [16, 16, 4], strides = [1, 1, 1]} : vector<18x18x4xf32> to vector<16x16x4xf32>
    %13 = vector.shape_cast %12 : vector<16x16x4xf32> to vector<256x4xf32>
    %14 = vector.extract_strided_slice %5 {offsets = [1, 1, 0], sizes = [16, 16, 4], strides = [1, 1, 1]} : vector<18x18x4xf32> to vector<16x16x4xf32>
    %15 = vector.shape_cast %14 : vector<16x16x4xf32> to vector<256x4xf32>
    %16 = vector.extract_strided_slice %5 {offsets = [1, 2, 0], sizes = [16, 16, 4], strides = [1, 1, 1]} : vector<18x18x4xf32> to vector<16x16x4xf32>
    %17 = vector.shape_cast %16 : vector<16x16x4xf32> to vector<256x4xf32>
    %18 = vector.extract_strided_slice %5 {offsets = [2, 0, 0], sizes = [16, 16, 4], strides = [1, 1, 1]} : vector<18x18x4xf32> to vector<16x16x4xf32>
    %19 = vector.shape_cast %18 : vector<16x16x4xf32> to vector<256x4xf32>
    %20 = vector.extract_strided_slice %5 {offsets = [2, 1, 0], sizes = [16, 16, 4], strides = [1, 1, 1]} : vector<18x18x4xf32> to vector<16x16x4xf32>
    %21 = vector.shape_cast %20 : vector<16x16x4xf32> to vector<256x4xf32>
    %22 = vector.extract_strided_slice %5 {offsets = [2, 2, 0], sizes = [16, 16, 4], strides = [1, 1, 1]} : vector<18x18x4xf32> to vector<16x16x4xf32>
    %23 = vector.shape_cast %22 : vector<16x16x4xf32> to vector<256x4xf32>
    %24 = tpu.concatenate %7, %9, %11, %13, %15, %17, %19, %21, %23 in 1 : vector<256x4xf32>, vector<256x4xf32>, vector<256x4xf32>, vector<256x4xf32>, vector<256x4xf32>, vector<256x4xf32>, vector<256x4xf32>, vector<256x4xf32>, vector<256x4xf32> -> vector<256x36xf32>
    %c0_11 = arith.constant 0 : index
    %c0_12 = arith.constant 0 : index
    %25 = vector.load %arg2[%c0_11, %c0_12] : memref<36x4xf32, #tpu.memory_space<vmem>>, vector<36x4xf32>
    %cst_13 = arith.constant dense<0.000000e+00> : vector<256x4xf32>
    %26 = tpu.matmul %24, %25, %cst_13 {dimension_numbers = #tpu.dot_dimension_numbers<[1], [0], [0], [1], [0, 0, 1, 1], [], []>} : vector<256x36xf32>, vector<36x4xf32>, vector<256x4xf32> -> vector<256x4xf32>
    %cst_14 = arith.constant dense<0.000000e+00> : vector<4xf32>
    %27 = vector.multi_reduction <add>, %26, %cst_14 [0] : vector<256x4xf32> to vector<4xf32>
    %28 = vector.shape_cast %27 : vector<4xf32> to vector<1x4xf32>
    %cst_15 = arith.constant 2.560000e+02 : f32
    %29 = vector.broadcast %cst_15 : f32 to vector<1x4xf32>
    %30 = arith.divf %28, %29 : vector<1x4xf32>
    %31 = vector.broadcast %30 : vector<1x4xf32> to vector<256x4xf32>
    %32 = arith.subf %26, %31 : vector<256x4xf32>
    %33 = arith.mulf %32, %32 : vector<256x4xf32>
    %cst_16 = arith.constant dense<0.000000e+00> : vector<4xf32>
    %34 = vector.multi_reduction <add>, %33, %cst_16 [0] : vector<256x4xf32> to vector<4xf32>
    %35 = vector.shape_cast %34 : vector<4xf32> to vector<1x4xf32>
    %cst_17 = arith.constant 2.560000e+02 : f32
    %36 = vector.broadcast %cst_17 : f32 to vector<1x4xf32>
    %37 = arith.divf %35, %36 : vector<1x4xf32>
    %38 = vector.broadcast %30 : vector<1x4xf32> to vector<256x4xf32>
    %39 = arith.subf %26, %38 : vector<256x4xf32>
    %cst_18 = arith.constant 9.99999974E-6 : f32
    %40 = vector.broadcast %cst_18 : f32 to vector<1x4xf32>
    %41 = arith.addf %37, %40 : vector<1x4xf32>
    %42 = math.rsqrt %41 : vector<1x4xf32>
    %43 = vector.broadcast %42 : vector<1x4xf32> to vector<256x4xf32>
    %44 = arith.mulf %39, %43 : vector<256x4xf32>
    %cst_19 = arith.constant 0.000000e+00 : f32
    %45 = vector.broadcast %cst_19 : f32 to vector<256x4xf32>
    %46 = arith.maximumf %44, %45 : vector<256x4xf32>
    %47 = vector.shape_cast %46 : vector<256x4xf32> to vector<16x16x4xf32>
    %c1_20 = arith.constant 1 : index
    %c1_21 = arith.constant 1 : index
    %c0_22 = arith.constant 0 : index
    %48 = vector.load %arg5[%c1_20, %c1_21, %c0_22] : memref<18x18x4xf32, #tpu.memory_space<vmem>>, vector<16x16x4xf32>
    tpu.vector_store %arg5[%c1_20, %c1_21, %c0_22], %47 {strides = array<i32>} : memref<18x18x4xf32, #tpu.memory_space<vmem>>, vector<16x16x4xf32>,
    %c0_23 = arith.constant 0 : index
    %c0_24 = arith.constant 0 : index
    %c0_25 = arith.constant 0 : index
    %49 = vector.load %arg5[%c0_23, %c0_24, %c0_25] : memref<18x18x4xf32, #tpu.memory_space<vmem>>, vector<18x18x4xf32>
    %50 = vector.extract_strided_slice %49 {offsets = [0, 0, 0], sizes = [16, 16, 4], strides = [1, 1, 1]} : vector<18x18x4xf32> to vector<16x16x4xf32>
    %51 = vector.shape_cast %50 : vector<16x16x4xf32> to vector<256x4xf32>
    %52 = vector.extract_strided_slice %49 {offsets = [0, 1, 0], sizes = [16, 16, 4], strides = [1, 1, 1]} : vector<18x18x4xf32> to vector<16x16x4xf32>
    %53 = vector.shape_cast %52 : vector<16x16x4xf32> to vector<256x4xf32>
    %54 = vector.extract_strided_slice %49 {offsets = [0, 2, 0], sizes = [16, 16, 4], strides = [1, 1, 1]} : vector<18x18x4xf32> to vector<16x16x4xf32>
    %55 = vector.shape_cast %54 : vector<16x16x4xf32> to vector<256x4xf32>
    %56 = vector.extract_strided_slice %49 {offsets = [1, 0, 0], sizes = [16, 16, 4], strides = [1, 1, 1]} : vector<18x18x4xf32> to vector<16x16x4xf32>
    %57 = vector.shape_cast %56 : vector<16x16x4xf32> to vector<256x4xf32>
    %58 = vector.extract_strided_slice %49 {offsets = [1, 1, 0], sizes = [16, 16, 4], strides = [1, 1, 1]} : vector<18x18x4xf32> to vector<16x16x4xf32>
    %59 = vector.shape_cast %58 : vector<16x16x4xf32> to vector<256x4xf32>
    %60 = vector.extract_strided_slice %49 {offsets = [1, 2, 0], sizes = [16, 16, 4], strides = [1, 1, 1]} : vector<18x18x4xf32> to vector<16x16x4xf32>
    %61 = vector.shape_cast %60 : vector<16x16x4xf32> to vector<256x4xf32>
    %62 = vector.extract_strided_slice %49 {offsets = [2, 0, 0], sizes = [16, 16, 4], strides = [1, 1, 1]} : vector<18x18x4xf32> to vector<16x16x4xf32>
    %63 = vector.shape_cast %62 : vector<16x16x4xf32> to vector<256x4xf32>
    %64 = vector.extract_strided_slice %49 {offsets = [2, 1, 0], sizes = [16, 16, 4], strides = [1, 1, 1]} : vector<18x18x4xf32> to vector<16x16x4xf32>
    %65 = vector.shape_cast %64 : vector<16x16x4xf32> to vector<256x4xf32>
    %66 = vector.extract_strided_slice %49 {offsets = [2, 2, 0], sizes = [16, 16, 4], strides = [1, 1, 1]} : vector<18x18x4xf32> to vector<16x16x4xf32>
    %67 = vector.shape_cast %66 : vector<16x16x4xf32> to vector<256x4xf32>
    %68 = tpu.concatenate %51, %53, %55, %57, %59, %61, %63, %65, %67 in 1 : vector<256x4xf32>, vector<256x4xf32>, vector<256x4xf32>, vector<256x4xf32>, vector<256x4xf32>, vector<256x4xf32>, vector<256x4xf32>, vector<256x4xf32>, vector<256x4xf32> -> vector<256x36xf32>
    %c0_26 = arith.constant 0 : index
    %c0_27 = arith.constant 0 : index
    %69 = vector.load %arg3[%c0_26, %c0_27] : memref<36x4xf32, #tpu.memory_space<vmem>>, vector<36x4xf32>
    %cst_28 = arith.constant dense<0.000000e+00> : vector<256x4xf32>
    %70 = tpu.matmul %68, %69, %cst_28 {dimension_numbers = #tpu.dot_dimension_numbers<[1], [0], [0], [1], [0, 0, 1, 1], [], []>} : vector<256x36xf32>, vector<36x4xf32>, vector<256x4xf32> -> vector<256x4xf32>
    %cst_29 = arith.constant dense<0.000000e+00> : vector<4xf32>
    %71 = vector.multi_reduction <add>, %70, %cst_29 [0] : vector<256x4xf32> to vector<4xf32>
    %72 = vector.shape_cast %71 : vector<4xf32> to vector<1x4xf32>
    %cst_30 = arith.constant 2.560000e+02 : f32
    %73 = vector.broadcast %cst_30 : f32 to vector<1x4xf32>
    %74 = arith.divf %72, %73 : vector<1x4xf32>
    %75 = vector.broadcast %74 : vector<1x4xf32> to vector<256x4xf32>
    %76 = arith.subf %70, %75 : vector<256x4xf32>
    %77 = arith.mulf %76, %76 : vector<256x4xf32>
    %cst_31 = arith.constant dense<0.000000e+00> : vector<4xf32>
    %78 = vector.multi_reduction <add>, %77, %cst_31 [0] : vector<256x4xf32> to vector<4xf32>
    %79 = vector.shape_cast %78 : vector<4xf32> to vector<1x4xf32>
    %cst_32 = arith.constant 2.560000e+02 : f32
    %80 = vector.broadcast %cst_32 : f32 to vector<1x4xf32>
    %81 = arith.divf %79, %80 : vector<1x4xf32>
    %82 = vector.broadcast %74 : vector<1x4xf32> to vector<256x4xf32>
    %83 = arith.subf %70, %82 : vector<256x4xf32>
    %cst_33 = arith.constant 9.99999974E-6 : f32
    %84 = vector.broadcast %cst_33 : f32 to vector<1x4xf32>
    %85 = arith.addf %81, %84 : vector<1x4xf32>
    %86 = math.rsqrt %85 : vector<1x4xf32>
    %87 = vector.broadcast %86 : vector<1x4xf32> to vector<256x4xf32>
    %88 = arith.mulf %83, %87 : vector<256x4xf32>
    %89 = vector.shape_cast %1 : vector<16x16x4xf32> to vector<256x4xf32>
    %90 = arith.addf %88, %89 : vector<256x4xf32>
    %91 = vector.shape_cast %90 : vector<256x4xf32> to vector<16x16x4xf32>
    %c0_34 = arith.constant 0 : index
    %c0_35 = arith.constant 0 : index
    %c0_36 = arith.constant 0 : index
    %c0_37 = arith.constant 0 : index
    %92 = vector.load %arg4[%c0_34, %c0_35, %c0_36, %c0_37] : memref<1x16x16x4xf32, #tpu.memory_space<vmem>>, vector<1x16x16x4xf32>
    %93 = vector.shape_cast %92 : vector<1x16x16x4xf32> to vector<16x16x4xf32>
    %94 = vector.shape_cast %91 : vector<16x16x4xf32> to vector<1x16x16x4xf32>
    tpu.vector_store %arg4[%c0_34, %c0_35, %c0_36, %c0_37], %94 {strides = array<i32>} : memref<1x16x16x4xf32, #tpu.memory_space<vmem>>, vector<1x16x16x4xf32>,
    return
  }
  func.func @transform_0(%arg0: i32) -> (i32, i32, i32, i32) {
    %c0_i32 = arith.constant 0 : i32
    %c0_i32_0 = arith.constant 0 : i32
    %c0_i32_1 = arith.constant 0 : i32
    %c0_i32_2 = arith.constant 0 : i32
    return %arg0, %c0_i32, %c0_i32_0, %c0_i32_1 : i32, i32, i32, i32
  }
  func.func @transform_1(%arg0: i32) -> (i32, i32) {
    %c0_i32 = arith.constant 0 : i32
    %c0_i32_0 = arith.constant 0 : i32
    %c0_i32_1 = arith.constant 0 : i32
    return %c0_i32, %c0_i32_0 : i32, i32
  }
  func.func @transform_2(%arg0: i32) -> (i32, i32) {
    %c0_i32 = arith.constant 0 : i32
    %c0_i32_0 = arith.constant 0 : i32
    %c0_i32_1 = arith.constant 0 : i32
    return %c0_i32, %c0_i32_0 : i32, i32
  }
  func.func @transform_3(%arg0: i32) -> (i32, i32, i32, i32) {
    %c0_i32 = arith.constant 0 : i32
    %c0_i32_0 = arith.constant 0 : i32
    %c0_i32_1 = arith.constant 0 : i32
    %c0_i32_2 = arith.constant 0 : i32
    return %arg0, %c0_i32, %c0_i32_0, %c0_i32_1 : i32, i32, i32, i32
  }
}

</mosaic_0001>

<bundles_post_ra>
// kernel: residual_block.1
= control target key start
LH: loop header
LB: loop body
LE: loop exit
PB: predicated region body
PF: predicated region fallthrough
CT: control target
= control target key end

     0   :  { %s4260_s12 = smov 0   ;;  %s9018_s0 = inlined_call_operand.vmem [shape: f32[2,16,16,4], index: 0, kind: input, shape index: {}]   ;;  %s9019_s1 = inlined_call_operand.vmem [shape: f32[36,4], index: 1, kind: input, shape index: {}]   ;;  %s9020_s2 = inlined_call_operand.vmem [shape: f32[36,4], index: 2, kind: input, shape index: {}]   ;;  %s9021_s3 = inlined_call_operand.vmem [shape: f32[2,16,16,4], index: 3, kind: output, shape index: {}]  }
   0x1 LB: > { %s4045_s13 = sadd.s32 4294967295, %s4228_s12   ;;  %p4049_p0 = scmp.ge.s32.totalorder %s4228_s12, 1  ;;  %s4228_s12 = sphi %s4260_s12, %s13_s12  }
   0x2   : > { %p137_p1 = scmp.lt.s32.totalorder %s4228_s12, 3 }
   0x4   : > { %p138_p2 = pnand %p4049_p0, %p137_p1 }
   0x6   : > { %141 = sbr.rel (%p138_p2) target bundleno = 2263 (0x8d7), region = 32 }
   0xb   : > { %vm203_vm0 = vcmask 31744   ;;  %v4230_v0 = vmov 0.0   ;;  %vm394_vm1 = vcmask 1046528   ;;  %s4231_s14 = smov 4   ;;  %p161_p3 = scmp.lt.s32.totalorder %s4045_s13, 1  ;;  %vm206_vm2 = vcmask 25600  }
   0xc   : > { %204 = vst.msk [vmem:[#allocation2] sm:$0xff] %vm203_vm0, %v4230_v0  ;;  %vm475_vm3 = vcmask 1045504   ;;  %s4232_s19 = smov 8   ;;  %s4233_s20 = smov 12   ;;  %vm1715_vm4 = vcmask 1043456   ;;  %vm1382_vm5 = vcmask 64512  }
   0xd   : > { %205 = vst.msk [vmem:[#allocation2 + $0x8] sm:$0xff] %vm203_vm0, %v4230_v0  ;;  %s9988_s13 = smov (!%p161_p3, %s4045_s13), 1  ;;  %s4234_s21 = smov 16   ;;  %vm1415_vm6 = vcmask 97280   ;;  %vm1481_vm7 = vcmask 162816   ;;  %vm1448_vm8 = vcmask 130048  }
   0xe   : > { %208 = vst.msk [vmem:[#allocation2 + $0x18] sm:$0xff] %vm203_vm0, %v4230_v0  ;;  %s4122_s15 = sshll.u32 %s9988_s13, 8  ;;  %s4235_s22 = smov 20   ;;  %vm1514_vm9 = vcmask 195584   ;;  %vm1580_vm10 = vcmask 261120   ;;  %vm1547_vm11 = vcmask 228352  }
   0xf   : > { %209 = vst.msk [vmem:[#allocation2 + $0x20] sm:$0xff] %vm203_vm0, %v4230_v0  ;;  %s4352_s18 = scalar_lea.vmem %s9018_s0, %s4122_s15  ;;  %s4236_s23 = smov 24   ;;  %vm1618_vm12 = vcmask 293888  }
  0x10   : > { %211 = vst.msk [vmem:[#allocation2 + $0x30] sm:$0xff] %vm203_vm0, %v4230_v0  ;;  %v4361_v6 = vld [vmem:[%s4352_s18 + $0x10] sm:$0xff]  ;;  %v4366_v7 = vld [vmem:[%s4352_s18 + $0x18] sm:$0xff]  ;;  %v4424_v18 = vld [vmem:[%s4352_s18] sm:$0xff]  ;;  %s4237_s24 = smov 28   ;;  %s4238_s25 = smov 32  }
  0x11   : > { %212 = vst.msk [vmem:[#allocation2 + $0x38] sm:$0xff] %vm203_vm0, %v4230_v0  ;;  %v4429_v19 = vld [vmem:[%s4352_s18 + $0x8] sm:$0xff]  ;;  %v4437_v21 = vld [vmem:[%s4352_s18 + $0x20] sm:$0xff]  ;;  %v4449_v23 = vld [vmem:[%s4352_s18 + $0x30] sm:$0xff] }
  0x12   : > { %214 = vst.msk [vmem:[#allocation2 + $0x48] sm:$0xff] %vm203_vm0, %v4230_v0  ;;  %v4442_v22 = vld [vmem:[%s4352_s18 + $0x28] sm:$0xff]  ;;  %v4454_v24 = vld [vmem:[%s4352_s18 + $0x38] sm:$0xff]  ;;  %v4459_v25 = vld [vmem:[%s4352_s18 + $0x40] sm:$0xff] }
  0x13   : > { %v4282_v1 = vld [vmem:[#allocation2] sm:$0xff]  ;;  %215 = vst.msk [vmem:[#allocation2 + $0x50] sm:$0xff] %vm203_vm0, %v4230_v0  ;;  %v4464_v26 = vld [vmem:[%s4352_s18 + $0x48] sm:$0xff]  ;;  %v4469_v27 = vld [vmem:[%s4352_s18 + $0x50] sm:$0xff] }
  0x14   : > { %v4286_v2 = vld [vmem:[#allocation2 + $0x8] sm:$0xff]  ;;  %v395_v3 = vrot.slane %v4282_v1, 1  ;;  %217 = vst.msk [vmem:[#allocation2 + $0x60] sm:$0xff] %vm203_vm0, %v4230_v0  ;;  %v4474_v28 = vld [vmem:[%s4352_s18 + $0x58] sm:$0xff]  ;;  %v4481_v30 = vld [vmem:[%s4352_s18 + $0x60] sm:$0xff] }
  0x15   : > { %v396_v4 = vrot.slane %v4286_v2, 1  ;;  %218 = vst.msk [vmem:[#allocation2 + $0x68] sm:$0xff] %vm203_vm0, %v4230_v0  ;;  %v4489_v33 = vld [vmem:[%s4352_s18 + $0x68] sm:$0xff]  ;;  %v4497_v36 = vld [vmem:[%s4352_s18 + $0x70] sm:$0xff]  ;;  %v4507_v40 = vld [vmem:[%s4352_s18 + $0x78] sm:$0xff] }
  0x16   : > { %220 = vst.msk [vmem:[#allocation2 + $0x78] sm:$0xff] %vm203_vm0, %v4230_v0  ;;  %v4518_v44 = vld [vmem:[%s4352_s18 + $0x80] sm:$0xff]  ;;  %v4530_v48 = vld [vmem:[%s4352_s18 + $0x88] sm:$0xff]  ;;  %v4556_v56 = vld [vmem:[%s4352_s18 + $0x90] sm:$0xff] }
  0x17   : > { %v397_v5 = vsel %vm394_vm1, %v395_v3, %v396_v4  ;;  %221 = vst.msk [vmem:[#allocation2 + $0x80] sm:$0xff] %vm203_vm0, %v4230_v0  ;;  %v4564_v60 = vld [vmem:[%s4352_s18 + $0x98] sm:$0xff] }
  0x18   : > { %582 = vrot.lane.b32.xlu0 %v397_v5, %s4231_s14  ;;  %223 = vst.msk [vmem:[#allocation2 + $0x90] sm:$0xff] %vm203_vm0, %v4230_v0 }
  0x19   : > { %224 = vst.msk [vmem:[#allocation2 + $0x98] sm:$0xff] %vm203_vm0, %v4230_v0 }
  0x1a   : > { %226 = vst.msk [vmem:[#allocation2 + $0xa8] sm:$0xff] %vm203_vm0, %v4230_v0 }
  0x1b   : > { %227 = vst.msk [vmem:[#allocation2 + $0xb0] sm:$0xff] %vm203_vm0, %v4230_v0 }
  0x1c   : > { %229 = vst.msk [vmem:[#allocation2 + $0xc0] sm:$0xff] %vm203_vm0, %v4230_v0 }
  0x1d   : > { %230 = vst.msk [vmem:[#allocation2 + $0xc8] sm:$0xff] %vm203_vm0, %v4230_v0 }
  0x1e   : > { %232 = vst.msk [vmem:[#allocation2 + $0xd8] sm:$0xff] %vm203_vm0, %v4230_v0 }
  0x1f   : > { %233 = vst.msk [vmem:[#allocation2 + $0xe0] sm:$0xff] %vm203_vm0, %v4230_v0 }
  0x20   : > { %235 = vst.msk [vmem:[#allocation2 + $0xf0] sm:$0xff] %vm203_vm0, %v4230_v0 }
  0x21   : > { %236 = vst.msk [vmem:[#allocation2 + $0xf8] sm:$0xff] %vm203_vm0, %v4230_v0 }
  0x22   : > { %238 = vst.msk [vmem:[#allocation2 + $0x108] sm:$0xff] %vm203_vm0, %v4230_v0 }
  0x23   : > { %239 = vst.msk [vmem:[#allocation2 + $0x110] sm:$0xff] %vm203_vm0, %v4230_v0 }
  0x24   : > { %241 = vst.msk [vmem:[#allocation2 + $0x120] sm:$0xff] %vm203_vm0, %v4230_v0 }
  0x25   : > { %242 = vst.msk [vmem:[#allocation2 + $0x128] sm:$0xff] %vm203_vm0, %v4230_v0 }
  0x26   : > { %244 = vst.msk [vmem:[#allocation2 + $0x138] sm:$0xff] %vm203_vm0, %v4230_v0 }
  0x27   : > { %245 = vst.msk [vmem:[#allocation2 + $0x140] sm:$0xff] %vm203_vm0, %v4230_v0 }
  0x28   : > { %247 = vst.msk [vmem:[#allocation2 + $0x150] sm:$0xff] %vm203_vm0, %v4230_v0 }
  0x29   : > { %248 = vst.msk [vmem:[#allocation2 + $0x158] sm:$0xff] %vm203_vm0, %v4230_v0 }
  0x2a   : > { %250 = vst.msk [vmem:[#allocation2 + $0x168] sm:$0xff] %vm203_vm0, %v4230_v0 }
  0x2b   : > { %251 = vst.msk [vmem:[#allocation2 + $0x170] sm:$0xff] %vm203_vm0, %v4230_v0 }
  0x2c   : > { %253 = vst.msk [vmem:[#allocation2 + $0x180] sm:$0xff] %vm203_vm0, %v4230_v0 }
  0x2d   : > { %254 = vst.msk [vmem:[#allocation2 + $0x188] sm:$0xff] %vm203_vm0, %v4230_v0 }
  0x2e   : > { %256 = vst.msk [vmem:[#allocation2 + $0x198] sm:$0xff] %vm203_vm0, %v4230_v0 }
  0x2f   : > { %9229 = vst [vmem:[#allocation3_spill] sm:$0xff] %v4361_v6 }
  0x30   : > { %257 = vst.msk [vmem:[#allocation2 + $0x1a0] sm:$0xff] %vm203_vm0, %v4230_v0 }
  0x31   : > { %9230 = vst [vmem:[#allocation4_spill] sm:$0xff] %v4366_v7 }
  0x32   : > { %213 = vst.msk [vmem:[#allocation2 + $0x40] sm:$0x3] %vm206_vm2, %v4230_v0 }
  0x33   : > { %262 = vst.msk [vmem:[#allocation2 + $0x31] sm:$0xff] %vm203_vm0, %v4361_v6 }
  0x34   : > { %263 = vst.msk [vmem:[#allocation2 + $0x39] sm:$0xff] %vm203_vm0, %v4366_v7 }
  0x35   : > { %207 = vst.msk [vmem:[#allocation2 + $0x10] sm:$0x3] %vm206_vm2, %v4230_v0 }
  0x36   : > { %210 = vst.msk [vmem:[#allocation2 + $0x28] sm:$0x3] %vm206_vm2, %v4230_v0 }
  0x37   : > { %216 = vst.msk [vmem:[#allocation2 + $0x58] sm:$0x3] %vm206_vm2, %v4230_v0 }
  0x38   : > { %219 = vst.msk [vmem:[#allocation2 + $0x70] sm:$0x3] %vm206_vm2, %v4230_v0 }
  0x39   : > { %222 = vst.msk [vmem:[#allocation2 + $0x88] sm:$0x3] %vm206_vm2, %v4230_v0 }
  0x3a   : > { %v4384_v8 = vld [vmem:[#allocation2 + $0x30] sm:$0xff]  ;;  %225 = vst.msk [vmem:[#allocation2 + $0xa0] sm:$0x3] %vm206_vm2, %v4230_v0 }
  0x3b   : > { %v4388_v9 = vld [vmem:[#allocation2 + $0x38] sm:$0xff]  ;;  %v405_v10 = vrot.slane %v4384_v8, 1  ;;  %228 = vst.msk [vmem:[#allocation2 + $0xb8] sm:$0x3] %vm206_vm2, %v4230_v0  ;;  %v4401_v14 = vld [vmem:[#allocation2 + $0x40] sm:$0x3] }
  0x3c   : > { %v406_v11 = vrot.slane %v4388_v9, 1  ;;  %231 = vst.msk [vmem:[#allocation2 + $0xd0] sm:$0x3] %vm206_vm2, %v4230_v0  ;;  %v4396_v12 = vld [vmem:[#allocation2 + $0x10] sm:$0x3]  ;;  %v408_v17 = vrot.slane %v4401_v14, 1 }
  0x3d   : > { %234 = vst.msk [vmem:[#allocation2 + $0xe8] sm:$0x3] %vm206_vm2, %v4230_v0  ;;  %v398_v13 = vrot.slane %v4396_v12, 1 }
  0x3e   : > { %v4404_v15 = vsel %vm394_vm1, %v405_v10, %v406_v11  ;;  %237 = vst.msk [vmem:[#allocation2 + $0x100] sm:$0x3] %vm206_vm2, %v4230_v0  ;;  %v4432_v20 = vsel %vm394_vm1, %v406_v11, %v408_v17  ;;  %v4599_v17 = vld [vmem:[%s4352_s18 + $0xa8] sm:$0xff] }
  0x3f   : > { %590 = vrot.lane.b32.xlu2 %v4404_v15, %s4231_s14  ;;  %240 = vst.msk [vmem:[#allocation2 + $0x118] sm:$0x3] %vm206_vm2, %v4230_v0  ;;  %v399_v16 = vsel %vm394_vm1, %v396_v4, %v398_v13 }
  0x40   : > { %243 = vst.msk [vmem:[#allocation2 + $0x130] sm:$0x3] %vm206_vm2, %v4230_v0  ;;  %584 = vrot.lane.b32.xlu0 %v399_v16, %s4231_s14  ;;  %v4596_v16 = vld [vmem:[%s4352_s18 + $0xa0] sm:$0xff] }
  0x41   : > { %246 = vst.msk [vmem:[#allocation2 + $0x148] sm:$0x3] %vm206_vm2, %v4230_v0 }
  0x42   : > { %249 = vst.msk [vmem:[#allocation2 + $0x160] sm:$0x3] %vm206_vm2, %v4230_v0 }
  0x43   : > { %252 = vst.msk [vmem:[#allocation2 + $0x178] sm:$0x3] %vm206_vm2, %v4230_v0 }
  0x44   : > { %9231 = vst [vmem:[#allocation5_spill] sm:$0xff] %v4424_v18 }
  0x45   : > { %255 = vst.msk [vmem:[#allocation2 + $0x190] sm:$0x3] %vm206_vm2, %v4230_v0 }
  0x46   : > { %9232 = vst [vmem:[#allocation6_spill] sm:$0xff] %v4429_v19 }
  0x47   : > { %258 = vst.msk [vmem:[#allocation2 + $0x1a8] sm:$0x3] %vm206_vm2, %v4230_v0  ;;  %592 = vrot.lane.b32.xlu2 %v4432_v20, %s4231_s14 }
  0x48   : > { %9233 = vst [vmem:[#allocation7_spill] sm:$0xff] %v4437_v21 }
  0x49   : > { %260 = vst.msk [vmem:[#allocation2 + $0x19] sm:$0xff] %vm203_vm0, %v4424_v18 }
  0x4a   : > { %9234 = vst [vmem:[#allocation8_spill] sm:$0xff] %v4442_v22 }
  0x4b   : > { %261 = vst.msk [vmem:[#allocation2 + $0x21] sm:$0xff] %vm203_vm0, %v4429_v19 }
  0x4c   : > { %9235 = vst [vmem:[#allocation9_spill] sm:$0xff] %v4449_v23 }
  0x4d   : > { %264 = vst.msk [vmem:[#allocation2 + $0x49] sm:$0xff] %vm203_vm0, %v4437_v21 }
  0x4e   : > { %9236 = vst [vmem:[#allocation10_spill] sm:$0xff] %v4454_v24 }
  0x4f   : > { %265 = vst.msk [vmem:[#allocation2 + $0x51] sm:$0xff] %vm203_vm0, %v4442_v22 }
  0x50   : > { %9237 = vst [vmem:[#allocation11_spill] sm:$0xff] %v4459_v25  ;;  %v4476_v29 = vld [vmem:[#allocation2 + $0x18] sm:$0xff] }
  0x51   : > { %266 = vst.msk [vmem:[#allocation2 + $0x61] sm:$0xff] %vm203_vm0, %v4449_v23  ;;  %v400_v32 = vrot.slane %v4476_v29, 1 }
  0x52   : > { %9238 = vst [vmem:[#allocation12_spill] sm:$0xff] %v4464_v26  ;;  %v4483_v31 = vld [vmem:[#allocation2 + $0x20] sm:$0xff]  ;;  %v4499_v37 = vld [vmem:[#allocation2 + $0x28] sm:$0x3] }
  0x53   : > { %267 = vst.msk [vmem:[#allocation2 + $0x69] sm:$0xff] %vm203_vm0, %v4454_v24  ;;  %v401_v34 = vrot.slane %v4483_v31, 1  ;;  %v403_v49 = vrot.slane %v4499_v37, 1  ;;  %v4703_v24 = vld [vmem:[%s4352_s18 + $0xe8] sm:$0xff] }
  0x54   : > { %9239 = vst [vmem:[#allocation13_spill] sm:$0xff] %v4469_v27  ;;  %v4492_v35 = vld [vmem:[#allocation2 + $0x48] sm:$0xff] }
  0x55   : > { %268 = vst.msk [vmem:[#allocation2 + $0x79] sm:$0xff] %vm203_vm0, %v4459_v25  ;;  %v410_v39 = vrot.slane %v4492_v35, 1  ;;  %v4510_v41 = vsel %vm394_vm1, %v400_v32, %v401_v34  ;;  %v4559_v57 = vsel %vm394_vm1, %v401_v34, %v403_v49  ;;  %v4613_v49 = vld [vmem:[%s4352_s18 + $0xb0] sm:$0xff]  ;;  %v4700_v25 = vld [vmem:[%s4352_s18 + $0xe0] sm:$0xff] }
  0x56   : > { %9240 = vst [vmem:[#allocation14_spill] sm:$0xff] %v4474_v28  ;;  %v4501_v38 = vld [vmem:[#allocation2 + $0x50] sm:$0xff]  ;;  %586 = vrot.lane.b32.xlu1 %v4510_v41, %s4231_s14  ;;  %v4568_v61 = vld [vmem:[#allocation2 + $0x58] sm:$0x3] }
  0x57   : > { %269 = vst.msk [vmem:[#allocation2 + $0x81] sm:$0xff] %vm203_vm0, %v4464_v26  ;;  %v411_v42 = vrot.slane %v4501_v38, 1  ;;  %v413_v3 = vrot.slane %v4568_v61, 1 }
  0x58   : > { %9241 = vst [vmem:[#allocation15_spill] sm:$0xff] %v4481_v30  ;;  %v4513_v43 = vld [vmem:[#allocation2 + $0x60] sm:$0xff] }
  0x59   : > { %270 = vst.msk [vmem:[#allocation2 + $0x91] sm:$0xff] %vm203_vm0, %v4469_v27  ;;  %v415_v46 = vrot.slane %v4513_v43, 1  ;;  %v4534_v50 = vsel %vm394_vm1, %v410_v39, %v411_v42  ;;  %v4602_v32 = vsel %vm394_vm1, %v411_v42, %v413_v3 }
  0x5a   : > { %9242 = vst [vmem:[#allocation16_spill] sm:$0xff] %v4489_v33  ;;  %v4522_v45 = vld [vmem:[#allocation2 + $0x68] sm:$0xff]  ;;  %v4525_v47 = vld [vmem:[#allocation2 + $0x70] sm:$0x3]  ;;  %594 = vrot.lane.b32.xlu0 %v4534_v50, %s4231_s14 }
  0x5b   : > { %271 = vst.msk [vmem:[#allocation2 + $0x99] sm:$0xff] %vm203_vm0, %v4474_v28  ;;  %v416_v51 = vrot.slane %v4522_v45, 1  ;;  %v418_v55 = vrot.slane %v4525_v47, 1 }
  0x5c   : > { %9243 = vst [vmem:[#allocation17_spill] sm:$0xff] %v4497_v36 }
  0x5d   : > { %272 = vst.msk [vmem:[#allocation2 + $0xa9] sm:$0xff] %vm203_vm0, %v4481_v30  ;;  %v4548_v54 = vsel %vm394_vm1, %v415_v46, %v416_v51  ;;  %v4573_v62 = vsel %vm394_vm1, %v416_v51, %v418_v55  ;;  %v4608_v46 = vld [vmem:[#allocation2 + $0x78] sm:$0xff] }
  0x5e   : > { %9244 = vst [vmem:[#allocation18_spill] sm:$0xff] %v4507_v40  ;;  %v4541_v52 = vld [vmem:[#allocation2 + $0x80] sm:$0xff]  ;;  %v4543_v53 = vld [vmem:[#allocation2 + $0x88] sm:$0x3]  ;;  %598 = vrot.lane.b32.xlu2 %v4548_v54, %s4231_s14  ;;  %588 = vrot.lane.b32.xlu1 %v4559_v57, %s4231_s14  ;;  %v4616_v51 = vld [vmem:[%s4352_s18 + $0xb8] sm:$0xff] }
  0x5f   : > { %273 = vst.msk [vmem:[#allocation2 + $0xb1] sm:$0xff] %vm203_vm0, %v4489_v33  ;;  %v421_v58 = vrot.slane %v4541_v52, 1  ;;  %v423_v59 = vrot.slane %v4543_v53, 1  ;;  %v4683_v33 = vld [vmem:[%s4352_s18 + $0xd0] sm:$0xff]  ;;  %v4686_v30 = vld [vmem:[%s4352_s18 + $0xd8] sm:$0xff] }
  0x60   : > { %9245 = vst [vmem:[#allocation19_spill] sm:$0xff] %v4518_v44  ;;  %v4577_v63 = vld [vmem:[#allocation2 + $0x90] sm:$0xff] }
  0x61   : > { %274 = vst.msk [vmem:[#allocation2 + $0xc1] sm:$0xff] %vm203_vm0, %v4497_v36  ;;  %v4583_v4 = vsel %vm394_vm1, %v421_v58, %v423_v59  ;;  %v425_v11 = vrot.slane %v4577_v63, 1  ;;  %v420_v59 = vrot.slane %v4608_v46, 1 }
  0x62   : > { %9246 = vst [vmem:[#allocation20_spill] sm:$0xff] %v4530_v48  ;;  %v4579_v0 = vld [vmem:[#allocation2 + $0x98] sm:$0xff]  ;;  %600 = vrot.lane.b32.xlu0 %v4573_v62, %s4231_s14 }
  0x63   : > { %9247 = vst [vmem:[#allocation21_spill] sm:$0xff] %v4534_v50  ;;  %v426_v13 = vrot.slane %v4579_v0, 1  ;;  %v477_v50 = vrot.slane %v4286_v2, 2 }
  0x64   : > { %275 = vst.msk [vmem:[#allocation2 + $0xc9] sm:$0xff] %vm203_vm0, %v4507_v40  ;;  %v4587_v5 = vld [vmem:[#allocation2 + $0xa8] sm:$0xff] }
  0x65   : > { %276 = vst.msk [vmem:[#allocation2 + $0xd9] sm:$0xff] %vm203_vm0, %v4518_v44  ;;  %v430_v34 = vrot.slane %v4587_v5, 1  ;;  %v4619_v42 = vsel %vm394_vm1, %v425_v11, %v426_v13 }
  0x66   : > { %277 = vst.msk [vmem:[#allocation2 + $0xe1] sm:$0xff] %vm203_vm0, %v4530_v48  ;;  %v4589_v10 = vld [vmem:[#allocation2 + $0xb0] sm:$0xff]  ;;  %604 = vrot.lane.b32.xlu2 %v4583_v4, %s4231_s14  ;;  %596 = vrot.lane.b32.xlu1 %v4602_v32, %s4231_s14  ;;  %v4625_v55 = vld [vmem:[#allocation2 + $0xb8] sm:$0x3]  ;;  %v4655_v48 = vld [vmem:[#allocation2 + $0xa0] sm:$0x3] }
  0x67   : > { %9248 = vst [vmem:[#allocation22_spill] sm:$0xff] %v4556_v56  ;;  %v431_v39 = vrot.slane %v4589_v10, 1  ;;  %v428_v40 = vrot.slane %v4655_v48, 1 }
  0x68   : > { %9249 = vst [vmem:[#allocation23_spill] sm:$0xff] %v4564_v60  ;;  %v4695_v26 = vld [vmem:[#allocation2 + $0xc0] sm:$0xff] }
  0x69   : > { %278 = vst.msk [vmem:[#allocation2 + $0xf1] sm:$0xff] %vm203_vm0, %v4556_v56  ;;  %v4631_v3 = vsel %vm394_vm1, %v430_v34, %v431_v39 }
  0x6a   : > { %279 = vst.msk [vmem:[#allocation2 + $0xf9] sm:$0xff] %vm203_vm0, %v4564_v60  ;;  %606 = vrot.lane.b32.xlu0 %v4619_v42, %s4231_s14  ;;  %v4649_v60 = vsel %vm394_vm1, %v420_v59, %v421_v58 }
  0x6b   : > { %9250 = vst [vmem:[#allocation24_spill] sm:$0xff] %v4573_v62  ;;  %v4635_v11 = vld [vmem:[#allocation2 + $0xc8] sm:$0xff] }
  0x6c   : > { %9251 = vst [vmem:[#allocation25_spill] sm:$0xff] %v4583_v4  ;;  %v436_v34 = vrot.slane %v4635_v11, 1  ;;  %v4664_v58 = vld [vmem:[#allocation2 + $0xd8] sm:$0xff] }
  0x6d   : > { %9252 = vst [vmem:[#allocation26_spill] sm:$0xff] %v4596_v16  ;;  %v4666_v59 = vld [vmem:[#allocation2 + $0xe0] sm:$0xff]  ;;  %v4734_v21 = vld [vmem:[#allocation2 + $0xe8] sm:$0x3] }
  0x6e   : > { %9253 = vst [vmem:[#allocation27_spill] sm:$0xff] %v4599_v17  ;;  %610 = vrot.lane.b32.xlu2 %v4631_v3, %s4231_s14  ;;  %602 = vrot.lane.b32.xlu1 %v4649_v60, %s4231_s14  ;;  %v441_v36 = vrot.slane %v4666_v59, 1  ;;  %v443_v18 = vrot.slane %v4734_v21, 1 }
  0x6f   : > { %280 = vst.msk [vmem:[#allocation2 + $0x109] sm:$0xff] %vm203_vm0, %v4596_v16  ;;  %v4643_v16 = vld [vmem:[%s4352_s18 + $0xc0] sm:$0xff] }
  0x70   : > { %281 = vst.msk [vmem:[#allocation2 + $0x111] sm:$0xff] %vm203_vm0, %v4599_v17  ;;  %v4637_v17 = vld [vmem:[#allocation2 + $0xd0] sm:$0x3] }
  0x71   : > { %9254 = vst [vmem:[#allocation28_spill] sm:$0xff] %v4613_v49  ;;  %v438_v56 = vrot.slane %v4637_v17, 1 }
  0x72   : > { %9255 = vst [vmem:[#allocation29_spill] sm:$0xff] %v4616_v51 }
  0x73   : > { %9256 = vst [vmem:[#allocation30_spill] sm:$0xff] %v4619_v42 }
  0x74   : > { %282 = vst.msk [vmem:[#allocation2 + $0x121] sm:$0xff] %vm203_vm0, %v4613_v49  ;;  %v433_v49 = vrot.slane %v4625_v55, 1 }
  0x75   : > { %283 = vst.msk [vmem:[#allocation2 + $0x129] sm:$0xff] %vm203_vm0, %v4616_v51  ;;  %v4646_v51 = vld [vmem:[%s4352_s18 + $0xc8] sm:$0xff] }
  0x76   : > { %9257 = vst [vmem:[#allocation31_spill] sm:$0xff] %v4631_v3  ;;  %v4660_v44 = vsel %vm394_vm1, %v431_v39, %v433_v49  ;;  %v4676_v39 = vld [vmem:[#allocation2 + $0xf8] sm:$0xff]  ;;  %v440_v49 = vrot.slane %v4664_v58, 1 }
  0x77   : > { %9258 = vst [vmem:[#allocation32_spill] sm:$0xff] %v4643_v16  ;;  %612 = vrot.lane.b32.xlu0 %v4660_v44, %s4231_s14  ;;  %v446_v27 = vrot.slane %v4676_v39, 1 }
  0x78   : > { %9259 = vst [vmem:[#allocation33_spill] sm:$0xff] %v4646_v51  ;;  %v4706_v23 = vsel %vm394_vm1, %v440_v49, %v441_v36  ;;  %v4722_v49 = vld [vmem:[#allocation2 + $0x110] sm:$0xff] }
  0x79   : > { %9260 = vst [vmem:[#allocation34_spill] sm:$0xff] %v4649_v60 }
  0x7a   : > { %284 = vst.msk [vmem:[#allocation2 + $0x139] sm:$0xff] %vm203_vm0, %v4643_v16  ;;  %v4670_v16 = vsel %vm394_vm1, %v436_v34, %v438_v56  ;;  %v4689_v56 = vsel %vm394_vm1, %v426_v13, %v428_v40  ;;  %v4712_v40 = vld [vmem:[#allocation2 + $0x100] sm:$0x3]  ;;  %v435_v13 = vrot.slane %v4695_v26, 1 }
  0x7b   : > { %285 = vst.msk [vmem:[#allocation2 + $0x141] sm:$0xff] %vm203_vm0, %v4646_v51  ;;  %v4674_v51 = vld [vmem:[#allocation2 + $0xf0] sm:$0xff]  ;;  %616 = vrot.lane.b32.xlu2 %v4670_v16, %s4231_s14  ;;  %608 = vrot.lane.b32.xlu1 %v4689_v56, %s4231_s14  ;;  %v4741_v6 = vld [vmem:[#allocation2 + $0x120] sm:$0xff] }
  0x7c   : > { %9261 = vst [vmem:[#allocation35_spill] sm:$0xff] %v4660_v44  ;;  %v445_v28 = vrot.slane %v4674_v51, 1  ;;  %v4730_v22 = vsel %vm394_vm1, %v435_v13, %v436_v34  ;;  %v4743_v19 = vld [vmem:[#allocation2 + $0x128] sm:$0xff]  ;;  %v4791_v62 = vld [vmem:[#allocation2 + $0x130] sm:$0x3] }
  0x7d   : > { %9262 = vst [vmem:[#allocation36_spill] sm:$0xff] %v4670_v16  ;;  %v4764_v16 = vld [vmem:[#allocation2 + $0x108] sm:$0xff] }
  0x7e   : > { %9263 = vst [vmem:[#allocation37_spill] sm:$0xff] %v4683_v33 }
  0x7f   : > { %9264 = vst [vmem:[#allocation38_spill] sm:$0xff] %v4686_v30  ;;  %618 = vrot.lane.b32.xlu0 %v4706_v23, %s4231_s14 }
  0x80   : > { %9265 = vst [vmem:[#allocation39_spill] sm:$0xff] %v4689_v56 }
  0x81   : > { %286 = vst.msk [vmem:[#allocation2 + $0x151] sm:$0xff] %vm203_vm0, %v4683_v33  ;;  %v4724_v33 = vld [vmem:[#allocation2 + $0x118] sm:$0x3] }
  0x82   : > { %287 = vst.msk [vmem:[#allocation2 + $0x159] sm:$0xff] %vm203_vm0, %v4686_v30  ;;  %v4718_v30 = vsel %vm394_vm1, %v445_v28, %v446_v27  ;;  %v453_v28 = vrot.slane %v4724_v33, 1  ;;  %v4751_v13 = vld [vmem:[#allocation2 + $0x138] sm:$0xff]  ;;  %v4771_v42 = vld [vmem:[#allocation2 + $0x148] sm:$0x3] }
  0x83   : > { %9266 = vst [vmem:[#allocation40_spill] sm:$0xff] %v4700_v25  ;;  %622 = vrot.lane.b32.xlu2 %v4718_v30, %s4231_s14  ;;  %614 = vrot.lane.b32.xlu1 %v4730_v22, %s4231_s14 }
  0x84   : > { %9267 = vst [vmem:[#allocation41_spill] sm:$0xff] %v4703_v24 }
  0x85   : > { %9268 = vst [vmem:[#allocation42_spill] sm:$0xff] %v4706_v23  ;;  %v4753_v23 = vld [vmem:[#allocation2 + $0x140] sm:$0xff] }
  0x86   : > { %288 = vst.msk [vmem:[#allocation2 + $0x169] sm:$0xff] %vm203_vm0, %v4700_v25  ;;  %v448_v25 = vrot.slane %v4712_v40, 1  ;;  %v461_v44 = vrot.slane %v4753_v23, 1 }
  0x87   : > { %289 = vst.msk [vmem:[#allocation2 + $0x171] sm:$0xff] %vm203_vm0, %v4703_v24  ;;  %v451_v24 = vrot.slane %v4722_v49, 1 }
  0x88   : > { %9269 = vst [vmem:[#allocation43_spill] sm:$0xff] %v4718_v30  ;;  %v4737_v7 = vsel %vm394_vm1, %v446_v27, %v448_v25  ;;  %v455_v25 = vrot.slane %v4741_v6, 1  ;;  %v456_v27 = vrot.slane %v4743_v19, 1  ;;  %v4760_v30 = vsel %vm394_vm1, %v441_v36, %v443_v18  ;;  %v4817_v60 = vld [vmem:[#allocation2 + $0x150] sm:$0xff] }
  0x89   : > { %9270 = vst [vmem:[#allocation44_spill] sm:$0xff] %v4730_v22  ;;  %v4747_v34 = vsel %vm394_vm1, %v451_v24, %v453_v28  ;;  %624 = vrot.lane.b32.xlu0 %v4737_v7, %s4231_s14  ;;  %v460_v28 = vrot.slane %v4751_v13, 1  ;;  %v450_v22 = vrot.slane %v4764_v16, 1  ;;  %v4779_v18 = vld [vmem:[#allocation2 + $0x158] sm:$0xff]  ;;  %v4781_v36 = vld [vmem:[#allocation2 + $0x160] sm:$0x3] }
  0x8a   : > { %9271 = vst [vmem:[#allocation45_spill] sm:$0xff] %v4737_v7  ;;  %v4767_v7 = vsel %vm394_vm1, %v455_v25, %v456_v27  ;;  %v463_v25 = vrot.slane %v4771_v42, 1  ;;  %v466_v3 = vrot.slane %v4779_v18, 1 }
  0x8b   : > { %9272 = vst [vmem:[#allocation46_spill] sm:$0xff] %v4747_v34  ;;  %628 = vrot.lane.b32.xlu2 %v4747_v34, %s4231_s14  ;;  %620 = vrot.lane.b32.xlu1 %v4760_v30, %s4231_s14  ;;  %v4775_v34 = vsel %vm394_vm1, %v460_v28, %v461_v44  ;;  %v468_v28 = vrot.slane %v4781_v36, 1 }
  0x8c   : > { %9273 = vst [vmem:[#allocation47_spill] sm:$0xff] %v4760_v30  ;;  %v4787_v30 = vsel %vm394_vm1, %v450_v22, %v451_v24 }
  0x8d   : > { %9274 = vst [vmem:[#allocation48_spill] sm:$0xff] %v4767_v7  ;;  %v4798_v56 = vld [vmem:[#allocation2 + $0x168] sm:$0xff]  ;;  %v4804_v22 = vsel %vm394_vm1, %v466_v3, %v468_v28 }
  0x8e   : > { %9275 = vst [vmem:[#allocation49_spill] sm:$0xff] %v4775_v34  ;;  %v4800_v4 = vld [vmem:[#allocation2 + $0x170] sm:$0xff]  ;;  %v470_v24 = vrot.slane %v4798_v56, 1 }
  0x8f   : > { %9276 = vst [vmem:[#allocation50_spill] sm:$0xff] %v4787_v30 }
  0x90   : > { %9278 = vst [vmem:[#allocation52_spill] sm:$0xff] %v4804_v22 }
  0x91   : > { %630 = vrot.lane.b32.xlu0 %v4767_v7, %s4231_s14  ;;  %v4794_v7 = vsel %vm394_vm1, %v461_v44, %v463_v25  ;;  %v471_v44 = vrot.slane %v4800_v4, 1 }
  0x92   : > { %9277 = vst [vmem:[#allocation51_spill] sm:$0xff] %v4794_v7 }
  0x93   : > { %634 = vrot.lane.b32.xlu2 %v4775_v34, %s4231_s14  ;;  %626 = vrot.lane.b32.xlu1 %v4787_v30, %s4231_s14  ;;  %v458_v34 = vrot.slane %v4791_v62, 1  ;;  %v476_v30 = vrot.slane %v4282_v1, 2  ;;  %v4820_v28 = vsel %vm394_vm1, %v470_v24, %v471_v44  ;;  %v479_v1 = vrot.slane %v4396_v12, 2  ;;  %v4835_v24 = vld [vmem:[#allocation2 + $0x178] sm:$0x3] }
  0x94   : > { %9280 = vst [vmem:[#allocation54_spill] sm:$0xff] %v4820_v28 }
  0x95   : > { %v4813_v25 = vsel %vm394_vm1, %v456_v27, %v458_v34  ;;  %v482_v34 = vrot.slane %v4483_v31, 2  ;;  %v484_v27 = vrot.slane %v4499_v37, 2  ;;  %v487_v37 = vrot.slane %v4388_v9, 2 }
  0x96   : > { %9279 = vst [vmem:[#allocation53_spill] sm:$0xff] %v4813_v25 }
  0x97   : > { %v4842_v12 = vsel %vm475_vm3, %v482_v34, %v484_v27 }
  0x98   : > { %9282 = vst [vmem:[#allocation56_spill] sm:$0xff] %v4842_v12 }
  0x99   : > { %636 = vrot.lane.b32.xlu0 %v4794_v7, %s4231_s14  ;;  %v465_v7 = vrot.slane %v4817_v60, 1 }
  0x9b   : > { %640 = vrot.lane.b32.xlu2 %v4804_v22, %s4231_s14  ;;  %632 = vrot.lane.b32.xlu1 %v4813_v25, %s4231_s14  ;;  %v478_v22 = vsel %vm475_vm3, %v476_v30, %v477_v50  ;;  %v4831_v2 = vsel %vm394_vm1, %v465_v7, %v466_v3  ;;  %v480_v25 = vsel %vm475_vm3, %v477_v50, %v479_v1  ;;  %v473_v30 = vrot.slane %v4835_v24, 1  ;;  %v4845_v7 = vpop.permute.xlu2 %590 }
  0x9c   : > { %9281 = vst [vmem:[#allocation55_spill] sm:$0xff] %v4831_v2  ;;  %v486_v3 = vrot.slane %v4384_v8, 2  ;;  %v492_v1 = vrot.slane %v4501_v38, 2 }
  0x9d   : > { %9283 = vst [vmem:[#allocation57_spill] sm:$0xff] %v4845_v7  ;;  %v4852_v50 = vsel %vm394_vm1, %v471_v44, %v473_v30  ;;  %v494_v44 = vrot.slane %v4568_v61, 2  ;;  %v489_v61 = vrot.slane %v4401_v14, 2  ;;  %v507_v14 = vrot.slane %v4579_v0, 2 }
  0x9e   : > { %9284 = vst [vmem:[#allocation58_spill] sm:$0xff] %v4852_v50  ;;  %v4857_v27 = vsel %vm475_vm3, %v486_v3, %v487_v37 }
  0x9f   : > { %9285 = vst [vmem:[#allocation59_spill] sm:$0xff] %v4857_v27 }
  0xa1   : > { %642 = vrot.lane.b32.xlu0 %v4820_v28, %s4231_s14  ;;  %v499_v28 = vrot.slane %v4525_v47, 2  ;;  %v4893_v47 = vsel %vm475_vm3, %v487_v37, %v489_v61  ;;  %v509_v37 = vrot.slane %v4655_v48, 2  ;;  %v504_v48 = vrot.slane %v4543_v53, 2 }
  0xa2   : > { %v521_v53 = vrot.slane %v4664_v58, 2 }
  0xa3   : > { %678 = vrot.lane.b32.xlu2 %v478_v22, %s4232_s19  ;;  %638 = vrot.lane.b32.xlu1 %v4831_v2, %s4231_s14  ;;  %v491_v22 = vrot.slane %v4492_v35, 2  ;;  %v4870_v30 = vpop.permute.xlu2 %592 }
  0xa4   : > { %9286 = vst [vmem:[#allocation60_spill] sm:$0xff] %v4870_v30  ;;  %v4904_v30 = vpop.permute.xlu0 %582 }
  0xa5   : > { %v4863_v7 = vsel %vm475_vm3, %v491_v22, %v492_v1  ;;  %v4878_v22 = vsel %vm475_vm3, %v492_v1, %v494_v44  ;;  %v506_v1 = vrot.slane %v4577_v63, 2  ;;  %9291 = vst [vmem:[#allocation65_spill] sm:$0xff] %v4904_v30 }
  0xa6   : > { %9287 = vst [vmem:[#allocation61_spill] sm:$0xff] %v4878_v22 }
  0xa9   : > { %680 = vrot.lane.b32.xlu0 %v480_v25, %s4232_s19  ;;  %v481_v25 = vrot.slane %v4476_v29, 2 }
  0xab   : > { %684 = vrot.lane.b32.xlu2 %v4842_v12, %s4232_s19  ;;  %644 = vrot.lane.b32.xlu1 %v4852_v50, %s4231_s14  ;;  %v4873_v3 = vsel %vm475_vm3, %v481_v25, %v482_v34  ;;  %v497_v12 = vrot.slane %v4522_v45, 2  ;;  %v501_v34 = vrot.slane %v4608_v46, 2  ;;  %v502_v25 = vrot.slane %v4541_v52, 2 }
  0xb1   : > { %686 = vrot.lane.b32.xlu0 %v4857_v27, %s4232_s19  ;;  %v4884_v27 = vsel %vm475_vm3, %v497_v12, %v499_v28  ;;  %v4900_v28 = vsel %vm475_vm3, %v501_v34, %v502_v25  ;;  %v512_v34 = vrot.slane %v4589_v10, 2 }
  0xb2   : > { %9288 = vst [vmem:[#allocation62_spill] sm:$0xff] %v4884_v27 }
  0xb3   : > { %690 = vrot.lane.b32.xlu2 %v4863_v7, %s4232_s19  ;;  %682 = vrot.lane.b32.xlu1 %v4873_v3, %s4232_s19  ;;  %9290 = vst [vmem:[#allocation64_spill] sm:$0xff] %v4900_v28 }
  0xb8   : > { %v4897_v44 = vpop.permute.xlu2 %598 }
  0xb9   : > { %692 = vrot.lane.b32.xlu0 %v4878_v22, %s4232_s19  ;;  %9289 = vst [vmem:[#allocation63_spill] sm:$0xff] %v4897_v44  ;;  %v496_v22 = vrot.slane %v4513_v43, 2  ;;  %v514_v44 = vrot.slane %v4625_v55, 2  ;;  %v516_v55 = vrot.slane %v4695_v26, 2 }
  0xbb   : > { %696 = vrot.lane.b32.xlu2 %v4884_v27, %s4232_s19  ;;  %688 = vrot.lane.b32.xlu1 %v4893_v47, %s4232_s19  ;;  %v4908_v27 = vsel %vm475_vm3, %v506_v1, %v507_v14  ;;  %v4916_v61 = vsel %vm475_vm3, %v496_v22, %v497_v12  ;;  %v4923_v1 = vsel %vm475_vm3, %v507_v14, %v509_v37  ;;  %v4933_v12 = vpop.permute.xlu0 %584  ;;  %v517_v22 = vrot.slane %v4635_v11, 2 }
  0xbc   : > { %9292 = vst [vmem:[#allocation66_spill] sm:$0xff] %v4908_v27  ;;  %v4940_v14 = vsel %vm475_vm3, %v502_v25, %v504_v48  ;;  %v524_v25 = vrot.slane %v4734_v21, 2  ;;  %v519_v21 = vrot.slane %v4637_v17, 2  ;;  %v536_v17 = vrot.slane %v4741_v6, 2 }
  0xbd   : > { %9293 = vst [vmem:[#allocation67_spill] sm:$0xff] %v4916_v61 }
  0xbe   : > { %9295 = vst [vmem:[#allocation69_spill] sm:$0xff] %v4923_v1 }
  0xbf   : > { %9297 = vst [vmem:[#allocation71_spill] sm:$0xff] %v4933_v12  ;;  %v511_v12 = vrot.slane %v4587_v5, 2 }
  0xc0   : > { %v4920_v30 = vpop.permute.xlu2 %604  ;;  %9298 = vst [vmem:[#allocation72_spill] sm:$0xff] %v4940_v14 }
  0xc1   : > { %698 = vrot.lane.b32.xlu0 %v4900_v28, %s4232_s19  ;;  %9294 = vst [vmem:[#allocation68_spill] sm:$0xff] %v4920_v30  ;;  %v4929_v28 = vsel %vm475_vm3, %v512_v34, %v514_v44  ;;  %v522_v44 = vrot.slane %v4666_v59, 2  ;;  %v4947_v30 = vsel %vm475_vm3, %v516_v55, %v517_v22  ;;  %v4965_v55 = vsel %vm475_vm3, %v511_v12, %v512_v34 }
  0xc2   : > { %9296 = vst [vmem:[#allocation70_spill] sm:$0xff] %v4929_v28  ;;  %v532_v34 = vrot.slane %v4722_v49, 2 }
  0xc3   : > { %702 = vrot.lane.b32.xlu2 %v4908_v27, %s4232_s19  ;;  %694 = vrot.lane.b32.xlu1 %v4916_v61, %s4232_s19  ;;  %9300 = vst [vmem:[#allocation74_spill] sm:$0xff] %v4947_v30 }
  0xc4   : > { %9304 = vst [vmem:[#allocation78_spill] sm:$0xff] %v4965_v55 }
  0xc8   : > { %v4944_v37 = vpop.permute.xlu2 %610 }
  0xc9   : > { %704 = vrot.lane.b32.xlu0 %v4923_v1, %s4232_s19  ;;  %9299 = vst [vmem:[#allocation73_spill] sm:$0xff] %v4944_v37  ;;  %v4953_v1 = vsel %vm475_vm3, %v521_v53, %v522_v44  ;;  %v527_v37 = vrot.slane %v4676_v39, 2  ;;  %v529_v53 = vrot.slane %v4712_v40, 2  ;;  %v531_v40 = vrot.slane %v4764_v16, 2 }
  0xca   : > { %9301 = vst [vmem:[#allocation75_spill] sm:$0xff] %v4953_v1 }
  0xcb   : > { %708 = vrot.lane.b32.xlu2 %v4929_v28, %s4232_s19  ;;  %700 = vrot.lane.b32.xlu1 %v4940_v14, %s4232_s19  ;;  %v4955_v28 = vpop.permute.xlu1 %586 }
  0xcc   : > { %9302 = vst [vmem:[#allocation76_spill] sm:$0xff] %v4955_v28  ;;  %v4960_v48 = vpop.permute.xlu0 %594  ;;  %v4972_v28 = vsel %vm475_vm3, %v522_v44, %v524_v25  ;;  %v4991_v44 = vsel %vm475_vm3, %v517_v22, %v519_v21  ;;  %v537_v25 = vrot.slane %v4743_v19, 2  ;;  %v539_v22 = vrot.slane %v4791_v62, 2 }
  0xcd   : > { %9303 = vst [vmem:[#allocation77_spill] sm:$0xff] %v4960_v48  ;;  %v4978_v48 = vsel %vm475_vm3, %v527_v37, %v529_v53  ;;  %v534_v62 = vrot.slane %v4724_v33, 2  ;;  %v551_v33 = vrot.slane %v4798_v56, 2 }
  0xce   : > { %9306 = vst [vmem:[#allocation80_spill] sm:$0xff] %v4972_v28 }
  0xcf   : > { %9307 = vst [vmem:[#allocation81_spill] sm:$0xff] %v4978_v48 }
  0xd0   : > { %9310 = vst [vmem:[#allocation84_spill] sm:$0xff] %v4991_v44 }
  0xd1   : > { %710 = vrot.lane.b32.xlu0 %v4947_v30, %s4232_s19 }
  0xd3   : > { %714 = vrot.lane.b32.xlu2 %v4953_v1, %s4232_s19  ;;  %706 = vrot.lane.b32.xlu1 %v4965_v55, %s4232_s19  ;;  %v4980_v30 = vpop.permute.xlu1 %588 }
  0xd4   : > { %9308 = vst [vmem:[#allocation82_spill] sm:$0xff] %v4980_v30  ;;  %v4986_v12 = vpop.permute.xlu0 %600  ;;  %v5004_v30 = vsel %vm475_vm3, %v536_v17, %v537_v25  ;;  %v544_v17 = vrot.slane %v4771_v42, 2  ;;  %v546_v42 = vrot.slane %v4817_v60, 2 }
  0xd5   : > { %v4969_v27 = vpop.permute.xlu2 %616  ;;  %9309 = vst [vmem:[#allocation83_spill] sm:$0xff] %v4986_v12  ;;  %v526_v12 = vrot.slane %v4674_v51, 2 }
  0xd6   : > { %9305 = vst [vmem:[#allocation79_spill] sm:$0xff] %v4969_v27  ;;  %v4998_v27 = vsel %vm475_vm3, %v531_v40, %v532_v34 }
  0xd7   : > { %9312 = vst [vmem:[#allocation86_spill] sm:$0xff] %v4998_v27  ;;  %v5016_v40 = vsel %vm475_vm3, %v526_v12, %v527_v37  ;;  %v547_v37 = vrot.slane %v4779_v18, 2 }
  0xd9   : > { %716 = vrot.lane.b32.xlu0 %v4972_v28, %s4232_s19 }
  0xdb   : > { %720 = vrot.lane.b32.xlu2 %v4978_v48, %s4232_s19  ;;  %712 = vrot.lane.b32.xlu1 %v4991_v44, %s4232_s19  ;;  %v5006_v28 = vpop.permute.xlu1 %596 }
  0xdc   : > { %9313 = vst [vmem:[#allocation87_spill] sm:$0xff] %v5006_v28  ;;  %v5011_v21 = vpop.permute.xlu0 %606  ;;  %v5023_v28 = vsel %vm475_vm3, %v537_v25, %v539_v22  ;;  %v5042_v25 = vsel %vm475_vm3, %v532_v34, %v534_v62  ;;  %v552_v22 = vrot.slane %v4800_v4, 2  ;;  %v554_v34 = vrot.slane %v4835_v24, 2 }
  0xdd   : > { %v4995_v53 = vpop.permute.xlu2 %622  ;;  %9314 = vst [vmem:[#allocation88_spill] sm:$0xff] %v5011_v21 }
  0xde   : > { %9311 = vst [vmem:[#allocation85_spill] sm:$0xff] %v4995_v53  ;;  %v542_v53 = vrot.slane %v4753_v23, 2 }
  0xdf   : > { %9316 = vst [vmem:[#allocation90_spill] sm:$0xff] %v5023_v28 }
  0xe0   : > { %v5029_v21 = vsel %vm475_vm3, %v542_v53, %v544_v17 }
  0xe1   : > { %722 = vrot.lane.b32.xlu0 %v4998_v27, %s4232_s19  ;;  %9317 = vst [vmem:[#allocation91_spill] sm:$0xff] %v5029_v21 }
  0xe3   : > { %726 = vrot.lane.b32.xlu2 %v5004_v30, %s4232_s19  ;;  %718 = vrot.lane.b32.xlu1 %v5016_v40, %s4232_s19  ;;  %v5031_v27 = vpop.permute.xlu1 %602 }
  0xe4   : > { %9318 = vst [vmem:[#allocation92_spill] sm:$0xff] %v5031_v27  ;;  %v5055_v27 = vsel %vm475_vm3, %v551_v33, %v552_v22  ;;  %v5072_v33 = vsel %vm475_vm3, %v552_v22, %v554_v34 }
  0xe5   : > { %v5020_v48 = vpop.permute.xlu2 %628 }
  0xe6   : > { %9315 = vst [vmem:[#allocation89_spill] sm:$0xff] %v5020_v48  ;;  %v5049_v48 = vsel %vm475_vm3, %v546_v42, %v547_v37 }
  0xe7   : > { %9321 = vst [vmem:[#allocation95_spill] sm:$0xff] %v5049_v48 }
  0xe9   : > { %728 = vrot.lane.b32.xlu0 %v5023_v28, %s4232_s19  ;;  %v5037_v12 = vpop.permute.xlu0 %612 }
  0xea   : > { %9319 = vst [vmem:[#allocation93_spill] sm:$0xff] %v5037_v12  ;;  %v541_v12 = vrot.slane %v4751_v13, 2 }
  0xeb   : > { %732 = vrot.lane.b32.xlu2 %v5029_v21, %s4232_s19  ;;  %724 = vrot.lane.b32.xlu1 %v5042_v25, %s4232_s19 }
  0xec   : > { %v5067_v42 = vsel %vm475_vm3, %v541_v12, %v542_v53 }
  0xed   : > { %v5046_v17 = vpop.permute.xlu2 %634  ;;  %v5057_v28 = vpop.permute.xlu1 %608 }
  0xee   : > { %9320 = vst [vmem:[#allocation94_spill] sm:$0xff] %v5046_v17 }
  0xef   : > { %9322 = vst [vmem:[#allocation96_spill] sm:$0xff] %v5057_v28  ;;  %v549_v28 = vrot.slane %v4781_v36, 2 }
  0xf1   : > { %734 = vrot.lane.b32.xlu0 %v5049_v48, %s4232_s19  ;;  %v5062_v62 = vpop.permute.xlu0 %618  ;;  %v5086_v53 = vsel %vm475_vm3, %v547_v37, %v549_v28 }
  0xf2   : > { %9323 = vst [vmem:[#allocation97_spill] sm:$0xff] %v5062_v62  ;;  %v9373_v62 = vld [vmem:[#allocation25_spill] sm:$0xff] }
  0xf3   : > { %738 = vrot.lane.b32.xlu2 %v5055_v27, %s4232_s19  ;;  %730 = vrot.lane.b32.xlu1 %v5067_v42, %s4232_s19  ;;  %9327 = vst [vmem:[#allocation101_spill] sm:$0xff] %v5086_v53 }
  0xf5   : > { %v5069_v17 = vpop.permute.xlu2 %640  ;;  %v5077_v48 = vpop.permute.xlu1 %614 }
  0xf6   : > { %9324 = vst [vmem:[#allocation98_spill] sm:$0xff] %v5069_v17 }
  0xf7   : > { %9325 = vst [vmem:[#allocation99_spill] sm:$0xff] %v5077_v48 }
  0xf9   : > { %740 = vrot.lane.b32.xlu0 %v5072_v33, %s4232_s19 }
  0xfb   : > { %v5081_v24 = vpop.permute.xlu0 %624  ;;  %776 = vrot.lane.b32.xlu2 %v4483_v31, %s4233_s20  ;;  %736 = vrot.lane.b32.xlu1 %v5086_v53, %s4232_s19 }
  0xfc   : > { %9326 = vst [vmem:[#allocation100_spill] sm:$0xff] %v5081_v24 }
  0xfd   : > { %v5088_v12 = vpop.permute.xlu2 %678  ;;  %v5092_v36 = vpop.permute.xlu1 %620 }
  0xfe   : > { %9328 = vst [vmem:[#allocation102_spill] sm:$0xff] %v5088_v12 }
  0xff   : > { %9329 = vst [vmem:[#allocation103_spill] sm:$0xff] %v5092_v36 }
 0x101   : > { %778 = vrot.lane.b32.xlu0 %v4384_v8, %s4233_s20 }
 0x103   : > { %v5096_v22 = vpop.permute.xlu0 %630  ;;  %782 = vrot.lane.b32.xlu2 %v4492_v35, %s4233_s20  ;;  %774 = vrot.lane.b32.xlu1 %v4476_v29, %s4233_s20 }
 0x104   : > { %9330 = vst [vmem:[#allocation104_spill] sm:$0xff] %v5096_v22 }
 0x105   : > { %v5100_v34 = vpop.permute.xlu2 %684  ;;  %v5104_v31 = vpop.permute.xlu1 %626 }
 0x106   : > { %9331 = vst [vmem:[#allocation105_spill] sm:$0xff] %v5100_v34 }
 0x107   : > { %9332 = vst [vmem:[#allocation106_spill] sm:$0xff] %v5104_v31 }
 0x109   : > { %784 = vrot.lane.b32.xlu0 %v4501_v38, %s4233_s20 }
 0x10b   : > { %v5108_v28 = vpop.permute.xlu0 %636  ;;  %788 = vrot.lane.b32.xlu2 %v4522_v45, %s4233_s20  ;;  %780 = vrot.lane.b32.xlu1 %v4388_v9, %s4233_s20 }
 0x10c   : > { %9333 = vst [vmem:[#allocation107_spill] sm:$0xff] %v5108_v28 }
 0x10d   : > { %v5112_v8 = vpop.permute.xlu2 %690  ;;  %v5116_v35 = vpop.permute.xlu1 %632 }
 0x10e   : > { %9334 = vst [vmem:[#allocation108_spill] sm:$0xff] %v5112_v8 }
 0x10f   : > { %9335 = vst [vmem:[#allocation109_spill] sm:$0xff] %v5116_v35  ;;  %v5166_v35 = vld [vmem:[%s4352_s18 + $0xf8] sm:$0xff] }
 0x110   : > { %9348 = vst [vmem:[#allocation122_spill] sm:$0xff] %v5166_v35 }
 0x111   : > { %790 = vrot.lane.b32.xlu0 %v4608_v46, %s4233_s20  ;;  %291 = vst.msk [vmem:[#allocation2 + $0x189] sm:$0xff] %vm203_vm0, %v5166_v35 }
 0x113   : > { %v5120_v29 = vpop.permute.xlu0 %642  ;;  %794 = vrot.lane.b32.xlu2 %v4577_v63, %s4233_s20  ;;  %786 = vrot.lane.b32.xlu1 %v4513_v43, %s4233_s20 }
 0x114   : > { %9336 = vst [vmem:[#allocation110_spill] sm:$0xff] %v5120_v29 }
 0x115   : > { %v5124_v38 = vpop.permute.xlu2 %696  ;;  %v5128_v45 = vpop.permute.xlu1 %638 }
 0x116   : > { %9337 = vst [vmem:[#allocation111_spill] sm:$0xff] %v5124_v38 }
 0x117   : > { %9338 = vst [vmem:[#allocation112_spill] sm:$0xff] %v5128_v45 }
 0x119   : > { %796 = vrot.lane.b32.xlu0 %v4579_v0, %s4233_s20 }
 0x11b   : > { %v5132_v9 = vpop.permute.xlu0 %680  ;;  %800 = vrot.lane.b32.xlu2 %v4589_v10, %s4233_s20  ;;  %792 = vrot.lane.b32.xlu1 %v4541_v52, %s4233_s20 }
 0x11c   : > { %9339 = vst [vmem:[#allocation113_spill] sm:$0xff] %v5132_v9 }
 0x11d   : > { %v5136_v37 = vpop.permute.xlu2 %702  ;;  %v5140_v29 = vpop.permute.xlu1 %644 }
 0x11e   : > { %9340 = vst [vmem:[#allocation114_spill] sm:$0xff] %v5136_v37  ;;  %v5163_v37 = vld [vmem:[%s4352_s18 + $0xf0] sm:$0xff] }
 0x11f   : > { %9341 = vst [vmem:[#allocation115_spill] sm:$0xff] %v5140_v29 }
 0x120   : > { %9347 = vst [vmem:[#allocation121_spill] sm:$0xff] %v5163_v37 }
 0x121   : > { %802 = vrot.lane.b32.xlu0 %v4695_v26, %s4233_s20  ;;  %290 = vst.msk [vmem:[#allocation2 + $0x181] sm:$0xff] %vm203_vm0, %v5163_v37 }
 0x123   : > { %v5144_v43 = vpop.permute.xlu0 %686  ;;  %806 = vrot.lane.b32.xlu2 %v4664_v58, %s4233_s20  ;;  %798 = vrot.lane.b32.xlu1 %v4587_v5, %s4233_s20 }
 0x124   : > { %9342 = vst [vmem:[#allocation116_spill] sm:$0xff] %v5144_v43 }
 0x125   : > { %v5148_v17 = vpop.permute.xlu2 %708  ;;  %v5152_v45 = vpop.permute.xlu1 %682 }
 0x126   : > { %9343 = vst [vmem:[#allocation117_spill] sm:$0xff] %v5148_v17 }
 0x127   : > { %9344 = vst [vmem:[#allocation118_spill] sm:$0xff] %v5152_v45 }
 0x129   : > { %808 = vrot.lane.b32.xlu0 %v4666_v59, %s4233_s20 }
 0x12b   : > { %v5156_v28 = vpop.permute.xlu0 %692  ;;  %812 = vrot.lane.b32.xlu2 %v4676_v39, %s4233_s20  ;;  %804 = vrot.lane.b32.xlu1 %v4635_v11, %s4233_s20 }
 0x12c   : > { %9345 = vst [vmem:[#allocation119_spill] sm:$0xff] %v5156_v28  ;;  %v5232_v28 = vld [vmem:[#allocation2 + $0x180] sm:$0xff] }
 0x12d   : > { %v5160_v29 = vpop.permute.xlu2 %714  ;;  %v5174_v17 = vpop.permute.xlu1 %688 }
 0x12e   : > { %9346 = vst [vmem:[#allocation120_spill] sm:$0xff] %v5160_v29 }
 0x12f   : > { %9349 = vst [vmem:[#allocation123_spill] sm:$0xff] %v5174_v17 }
 0x131   : > { %814 = vrot.lane.b32.xlu0 %v4764_v16, %s4233_s20 }
 0x133   : > { %v5178_v22 = vpop.permute.xlu0 %698  ;;  %818 = vrot.lane.b32.xlu2 %v4741_v6, %s4233_s20  ;;  %810 = vrot.lane.b32.xlu1 %v4674_v51, %s4233_s20 }
 0x134   : > { %9350 = vst [vmem:[#allocation124_spill] sm:$0xff] %v5178_v22 }
 0x135   : > { %v5182_v38 = vpop.permute.xlu2 %720  ;;  %v5186_v31 = vpop.permute.xlu1 %694 }
 0x136   : > { %9351 = vst [vmem:[#allocation125_spill] sm:$0xff] %v5182_v38 }
 0x137   : > { %9352 = vst [vmem:[#allocation126_spill] sm:$0xff] %v5186_v31 }
 0x139   : > { %820 = vrot.lane.b32.xlu0 %v4743_v19, %s4233_s20 }
 0x13b   : > { %v5190_v35 = vpop.permute.xlu0 %704  ;;  %824 = vrot.lane.b32.xlu2 %v4753_v23, %s4233_s20  ;;  %816 = vrot.lane.b32.xlu1 %v4722_v49, %s4233_s20 }
 0x13c   : > { %9353 = vst [vmem:[#allocation127_spill] sm:$0xff] %v5190_v35  ;;  %v5210_v35 = vld [vmem:[#allocation2 + $0x188] sm:$0xff] }
 0x13d   : > { %v5194_v37 = vpop.permute.xlu2 %726  ;;  %v5198_v22 = vpop.permute.xlu1 %700 }
 0x13e   : > { %9354 = vst [vmem:[#allocation128_spill] sm:$0xff] %v5194_v37 }
 0x13f   : > { %9355 = vst [vmem:[#allocation129_spill] sm:$0xff] %v5198_v22 }
 0x141   : > { %826 = vrot.lane.b32.xlu0 %v4817_v60, %s4233_s20 }
 0x143   : > { %v5202_v38 = vpop.permute.xlu0 %710  ;;  %830 = vrot.lane.b32.xlu2 %v4798_v56, %s4233_s20  ;;  %822 = vrot.lane.b32.xlu1 %v4751_v13, %s4233_s20 }
 0x144   : > { %9356 = vst [vmem:[#allocation130_spill] sm:$0xff] %v5202_v38 }
 0x145   : > { %v5206_v31 = vpop.permute.xlu2 %732  ;;  %v5212_v37 = vpop.permute.xlu1 %706 }
 0x146   : > { %9357 = vst [vmem:[#allocation131_spill] sm:$0xff] %v5206_v31 }
 0x147   : > { %9358 = vst [vmem:[#allocation132_spill] sm:$0xff] %v5212_v37 }
 0x149   : > { %832 = vrot.lane.b32.xlu0 %v4800_v4, %s4233_s20 }
 0x14b   : > { %v5216_v22 = vpop.permute.xlu0 %716  ;;  %836 = vrot.lane.b32.xlu2 %v5210_v35, %s4233_s20  ;;  %828 = vrot.lane.b32.xlu1 %v4779_v18, %s4233_s20 }
 0x14c   : > { %9359 = vst [vmem:[#allocation133_spill] sm:$0xff] %v5216_v22 }
 0x14d   : > { %v5220_v24 = vpop.permute.xlu2 %738  ;;  %v5224_v31 = vpop.permute.xlu1 %712 }
 0x14e   : > { %9360 = vst [vmem:[#allocation134_spill] sm:$0xff] %v5220_v24 }
 0x14f   : > { %9361 = vst [vmem:[#allocation135_spill] sm:$0xff] %v5224_v31 }
 0x151   : > { %870 = vrot.lane.b32.xlu0 %v4510_v41, %s4234_s21 }
 0x153   : > { %v5228_v37 = vpop.permute.xlu0 %722  ;;  %874 = vrot.lane.b32.xlu2 %v4404_v15, %s4234_s21  ;;  %834 = vrot.lane.b32.xlu1 %v5232_v28, %s4233_s20 }
 0x154   : > { %9362 = vst [vmem:[#allocation136_spill] sm:$0xff] %v5228_v37 }
 0x155   : > { %v5234_v22 = vpop.permute.xlu2 %776  ;;  %v5238_v24 = vpop.permute.xlu1 %718 }
 0x156   : > { %9363 = vst [vmem:[#allocation137_spill] sm:$0xff] %v5234_v22 }
 0x157   : > { %9364 = vst [vmem:[#allocation138_spill] sm:$0xff] %v5238_v24  ;;  %v9369_v24 = vld [vmem:[#allocation34_spill] sm:$0xff] }
 0x159   : > { %876 = vrot.lane.b32.xlu0 %v4432_v20, %s4234_s21 }
 0x15b   : > { %v5242_v8 = vpop.permute.xlu0 %728  ;;  %880 = vrot.lane.b32.xlu2 %v4602_v32, %s4234_s21  ;;  %872 = vrot.lane.b32.xlu1 %v4559_v57, %s4234_s21 }
 0x15c   : > { %9365 = vst [vmem:[#allocation139_spill] sm:$0xff] %v5242_v8  ;;  %v9371_v8 = vld [vmem:[#allocation21_spill] sm:$0xff] }
 0x15d   : > { %v5246_v41 = vpop.permute.xlu2 %782  ;;  %v5250_v37 = vpop.permute.xlu1 %724 }
 0x15e   : > { %9366 = vst [vmem:[#allocation140_spill] sm:$0xff] %v5246_v41 }
 0x15f   : > { %9367 = vst [vmem:[#allocation141_spill] sm:$0xff] %v5250_v37  ;;  %v9375_v37 = vld [vmem:[#allocation39_spill] sm:$0xff] }
 0x161   : > { %882 = vrot.lane.b32.xlu0 %v4548_v54, %s4234_s21 }
 0x163   : > { %v5254_v36 = vpop.permute.xlu0 %734  ;;  %886 = vrot.lane.b32.xlu2 %v9369_v24, %s4234_s21  ;;  %878 = vrot.lane.b32.xlu1 %v9371_v8, %s4234_s21 }
 0x164   : > { %9368 = vst [vmem:[#allocation142_spill] sm:$0xff] %v5254_v36  ;;  %v9377_v36 = vld [vmem:[#allocation24_spill] sm:$0xff] }
 0x165   : > { %v5258_v29 = vpop.permute.xlu2 %788  ;;  %v5262_v17 = vpop.permute.xlu1 %730 }
 0x166   : > { %9370 = vst [vmem:[#allocation34_spill] sm:$0xff] %v5258_v29  ;;  %v9379_v29 = vld [vmem:[#allocation31_spill] sm:$0xff] }
 0x167   : > { %9372 = vst [vmem:[#allocation21_spill] sm:$0xff] %v5262_v17  ;;  %v9381_v17 = vld [vmem:[#allocation44_spill] sm:$0xff] }
 0x169   : > { %888 = vrot.lane.b32.xlu0 %v9373_v62, %s4234_s21 }
 0x16b   : > { %v5266_v57 = vpop.permute.xlu0 %740  ;;  %892 = vrot.lane.b32.xlu2 %v9375_v37, %s4234_s21  ;;  %884 = vrot.lane.b32.xlu1 %v9377_v36, %s4234_s21 }
 0x16c   : > { %9374 = vst [vmem:[#allocation25_spill] sm:$0xff] %v5266_v57  ;;  %v9383_v57 = vld [vmem:[#allocation30_spill] sm:$0xff] }
 0x16d   : > { %v5270_v41 = vpop.permute.xlu2 %794  ;;  %v5274_v31 = vpop.permute.xlu1 %736 }
 0x16e   : > { %9376 = vst [vmem:[#allocation39_spill] sm:$0xff] %v5270_v41  ;;  %v9385_v41 = vld [vmem:[#allocation36_spill] sm:$0xff] }
 0x16f   : > { %9378 = vst [vmem:[#allocation24_spill] sm:$0xff] %v5274_v31  ;;  %v9387_v31 = vld [vmem:[#allocation47_spill] sm:$0xff] }
 0x171   : > { %894 = vrot.lane.b32.xlu0 %v9379_v29, %s4234_s21 }
 0x173   : > { %v5278_v43 = vpop.permute.xlu0 %778  ;;  %898 = vrot.lane.b32.xlu2 %v9381_v17, %s4234_s21  ;;  %890 = vrot.lane.b32.xlu1 %v9383_v57, %s4234_s21 }
 0x174   : > { %9380 = vst [vmem:[#allocation143_spill] sm:$0xff] %v5278_v43  ;;  %v9389_v43 = vld [vmem:[#allocation35_spill] sm:$0xff] }
 0x175   : > { %v5282_v38 = vpop.permute.xlu2 %800  ;;  %v5286_v34 = vpop.permute.xlu1 %774 }
 0x176   : > { %9382 = vst [vmem:[#allocation44_spill] sm:$0xff] %v5282_v38  ;;  %v9391_v38 = vld [vmem:[#allocation43_spill] sm:$0xff] }
 0x177   : > { %9384 = vst [vmem:[#allocation30_spill] sm:$0xff] %v5286_v34  ;;  %v9393_v34 = vld [vmem:[#allocation50_spill] sm:$0xff] }
 0x179   : > { %900 = vrot.lane.b32.xlu0 %v9385_v41, %s4234_s21 }
 0x17b   : > { %v5290_v48 = vpop.permute.xlu0 %784  ;;  %904 = vrot.lane.b32.xlu2 %v9387_v31, %s4234_s21  ;;  %896 = vrot.lane.b32.xlu1 %v9389_v43, %s4234_s21 }
 0x17c   : > { %9386 = vst [vmem:[#allocation144_spill] sm:$0xff] %v5290_v48  ;;  %v9395_v48 = vld [vmem:[#allocation42_spill] sm:$0xff] }
 0x17d   : > { %v5294_v45 = vpop.permute.xlu2 %806  ;;  %v5298_v22 = vpop.permute.xlu1 %780 }
 0x17e   : > { %9388 = vst [vmem:[#allocation145_spill] sm:$0xff] %v5294_v45  ;;  %v9397_v45 = vld [vmem:[#allocation46_spill] sm:$0xff] }
 0x17f   : > { %9390 = vst [vmem:[#allocation35_spill] sm:$0xff] %v5298_v22  ;;  %v9399_v22 = vld [vmem:[#allocation53_spill] sm:$0xff] }
 0x181   : > { %906 = vrot.lane.b32.xlu0 %v9391_v38, %s4234_s21 }
 0x183   : > { %v5302_v9 = vpop.permute.xlu0 %790  ;;  %910 = vrot.lane.b32.xlu2 %v9393_v34, %s4234_s21  ;;  %902 = vrot.lane.b32.xlu1 %v9395_v48, %s4234_s21 }
 0x184   : > { %9392 = vst [vmem:[#allocation146_spill] sm:$0xff] %v5302_v9  ;;  %v9401_v9 = vld [vmem:[#allocation45_spill] sm:$0xff] }
 0x185   : > { %v5306_v12 = vpop.permute.xlu2 %812  ;;  %v5310_v41 = vpop.permute.xlu1 %786 }
 0x186   : > { %9394 = vst [vmem:[#allocation147_spill] sm:$0xff] %v5306_v12  ;;  %v9403_v12 = vld [vmem:[#allocation49_spill] sm:$0xff] }
 0x187   : > { %9396 = vst [vmem:[#allocation42_spill] sm:$0xff] %v5310_v41 }
 0x189   : > { %912 = vrot.lane.b32.xlu0 %v9397_v45, %s4234_s21 }
 0x18b   : > { %v5314_v31 = vpop.permute.xlu0 %796  ;;  %916 = vrot.lane.b32.xlu2 %v9399_v22, %s4234_s21  ;;  %908 = vrot.lane.b32.xlu1 %v9401_v9, %s4234_s21  ;;  %v560_v22 = vrot.slane %v5210_v35, 1 }
 0x18c   : > { %9398 = vst [vmem:[#allocation148_spill] sm:$0xff] %v5314_v31  ;;  %v9406_v31 = vld [vmem:[#allocation48_spill] sm:$0xff] }
 0x18d   : > { %v5318_v38 = vpop.permute.xlu2 %818  ;;  %v5322_v34 = vpop.permute.xlu1 %792 }
 0x18e   : > { %9400 = vst [vmem:[#allocation149_spill] sm:$0xff] %v5318_v38  ;;  %v9408_v38 = vld [vmem:[#allocation52_spill] sm:$0xff] }
 0x18f   : > { %9402 = vst [vmem:[#allocation45_spill] sm:$0xff] %v5322_v34  ;;  %v559_v34 = vrot.slane %v5232_v28, 1 }
 0x191   : > { %918 = vrot.lane.b32.xlu0 %v9403_v12, %s4234_s21 }
 0x193   : > { %v5326_v29 = vpop.permute.xlu0 %802  ;;  %922 = vrot.lane.b32.xlu2 %v4831_v2, %s4234_s21  ;;  %914 = vrot.lane.b32.xlu1 %v9406_v31, %s4234_s21  ;;  %v9412_v2 = vld [vmem:[#allocation51_spill] sm:$0xff] }
 0x194   : > { %9404 = vst [vmem:[#allocation150_spill] sm:$0xff] %v5326_v29 }
 0x195   : > { %v5330_v41 = vpop.permute.xlu2 %824  ;;  %v5334_v45 = vpop.permute.xlu1 %798 }
 0x196   : > { %9405 = vst [vmem:[#allocation151_spill] sm:$0xff] %v5330_v41  ;;  %v5347_v41 = vsel %vm394_vm1, %v559_v34, %v560_v22  ;;  %v9416_v34 = vld [vmem:[#allocation54_spill] sm:$0xff] }
 0x197   : > { %9407 = vst [vmem:[#allocation48_spill] sm:$0xff] %v5334_v45 }
 0x198   : > { %9411 = vst [vmem:[#allocation154_spill] sm:$0xff] %v5347_v41 }
 0x199   : > { %924 = vrot.lane.b32.xlu0 %v9408_v38, %s4234_s21 }
 0x19b   : > { %v5340_v12 = vpop.permute.xlu0 %808  ;;  %928 = vrot.lane.b32.xlu2 %v4852_v50, %s4234_s21  ;;  %920 = vrot.lane.b32.xlu1 %v9412_v2, %s4234_s21 }
 0x19c   : > { %9409 = vst [vmem:[#allocation152_spill] sm:$0xff] %v5340_v12  ;;  %v5359_v12 = vld [vmem:[#allocation2 + $0x190] sm:$0x3] }
 0x19d   : > { %v5344_v29 = vpop.permute.xlu2 %830  ;;  %v5351_v45 = vpop.permute.xlu1 %804  ;;  %v562_v50 = vrot.slane %v5359_v12, 1 }
 0x19e   : > { %9410 = vst [vmem:[#allocation153_spill] sm:$0xff] %v5344_v29 }
 0x19f   : > { %9413 = vst [vmem:[#allocation155_spill] sm:$0xff] %v5351_v45  ;;  %v9418_v45 = vld [vmem:[#allocation56_spill] sm:$0xff] }
 0x1a1   : > { %930 = vrot.lane.b32.xlu0 %v5347_v41, %s4234_s21 }
 0x1a3   : > { %v5355_v38 = vpop.permute.xlu0 %814  ;;  %966 = vrot.lane.b32.xlu2 %v4873_v3, %s4235_s22  ;;  %926 = vrot.lane.b32.xlu1 %v9416_v34, %s4234_s21  ;;  %v5375_v3 = vsel %vm394_vm1, %v560_v22, %v562_v50  ;;  %v9425_v50 = vld [vmem:[#allocation59_spill] sm:$0xff] }
 0x1a4   : > { %9414 = vst [vmem:[#allocation156_spill] sm:$0xff] %v5355_v38 }
 0x1a5   : > { %v5361_v29 = vpop.permute.xlu2 %836  ;;  %v5366_v2 = vpop.permute.xlu1 %810  ;;  %9420 = vst [vmem:[#allocation158_spill] sm:$0xff] %v5375_v3 }
 0x1a6   : > { %9415 = vst [vmem:[#allocation157_spill] sm:$0xff] %v5361_v29 }
 0x1a7   : > { %9417 = vst [vmem:[#allocation54_spill] sm:$0xff] %v5366_v2 }
 0x1a9   : > { %968 = vrot.lane.b32.xlu0 %v9418_v45, %s4235_s22 }
 0x1ab   : > { %v5370_v41 = vpop.permute.xlu0 %820  ;;  %972 = vrot.lane.b32.xlu2 %v4893_v47, %s4235_s22  ;;  %932 = vrot.lane.b32.xlu1 %v5375_v3, %s4234_s21 }
 0x1ac   : > { %9419 = vst [vmem:[#allocation56_spill] sm:$0xff] %v5370_v41  ;;  %v9427_v41 = vld [vmem:[#allocation62_spill] sm:$0xff] }
 0x1ad   : > { %v5377_v38 = vpop.permute.xlu2 %874  ;;  %v5381_v29 = vpop.permute.xlu1 %816 }
 0x1ae   : > { %9421 = vst [vmem:[#allocation159_spill] sm:$0xff] %v5377_v38 }
 0x1af   : > { %9422 = vst [vmem:[#allocation160_spill] sm:$0xff] %v5381_v29 }
 0x1b1   : > { %974 = vrot.lane.b32.xlu0 %v4863_v7, %s4235_s22 }
 0x1b3   : > { %v5385_v2 = vpop.permute.xlu0 %826  ;;  %978 = vrot.lane.b32.xlu2 %v4916_v61, %s4235_s22  ;;  %970 = vrot.lane.b32.xlu1 %v9425_v50, %s4235_s22 }
 0x1b4   : > { %9423 = vst [vmem:[#allocation161_spill] sm:$0xff] %v5385_v2  ;;  %v9430_v2 = vld [vmem:[#allocation61_spill] sm:$0xff] }
 0x1b5   : > { %v5389_v45 = vpop.permute.xlu2 %880  ;;  %v5393_v22 = vpop.permute.xlu1 %822 }
 0x1b6   : > { %9424 = vst [vmem:[#allocation162_spill] sm:$0xff] %v5389_v45  ;;  %v9432_v45 = vld [vmem:[#allocation66_spill] sm:$0xff] }
 0x1b7   : > { %9426 = vst [vmem:[#allocation59_spill] sm:$0xff] %v5393_v22 }
 0x1b9   : > { %980 = vrot.lane.b32.xlu0 %v9427_v41, %s4235_s22 }
 0x1bb   : > { %v5397_v38 = vpop.permute.xlu0 %832  ;;  %984 = vrot.lane.b32.xlu2 %v4940_v14, %s4235_s22  ;;  %976 = vrot.lane.b32.xlu1 %v9430_v2, %s4235_s22 }
 0x1bc   : > { %9428 = vst [vmem:[#allocation163_spill] sm:$0xff] %v5397_v38  ;;  %v9435_v38 = vld [vmem:[#allocation64_spill] sm:$0xff] }
 0x1bd   : > { %v5401_v29 = vpop.permute.xlu2 %886  ;;  %v5405_v3 = vpop.permute.xlu1 %828 }
 0x1be   : > { %9429 = vst [vmem:[#allocation164_spill] sm:$0xff] %v5401_v29  ;;  %v9437_v29 = vld [vmem:[#allocation70_spill] sm:$0xff] }
 0x1bf   : > { %9431 = vst [vmem:[#allocation61_spill] sm:$0xff] %v5405_v3 }
 0x1c1   : > { %986 = vrot.lane.b32.xlu0 %v9432_v45, %s4235_s22 }
 0x1c3   : > { %v5409_v61 = vpop.permute.xlu0 %870  ;;  %990 = vrot.lane.b32.xlu2 %v4965_v55, %s4235_s22  ;;  %982 = vrot.lane.b32.xlu1 %v9435_v38, %s4235_s22 }
 0x1c4   : > { %9433 = vst [vmem:[#allocation165_spill] sm:$0xff] %v5409_v61  ;;  %v9440_v61 = vld [vmem:[#allocation69_spill] sm:$0xff] }
 0x1c5   : > { %v5413_v22 = vpop.permute.xlu2 %892  ;;  %v5417_v14 = vpop.permute.xlu1 %834 }
 0x1c6   : > { %9434 = vst [vmem:[#allocation166_spill] sm:$0xff] %v5413_v22 }
 0x1c7   : > { %9436 = vst [vmem:[#allocation64_spill] sm:$0xff] %v5417_v14 }
 0x1c9   : > { %992 = vrot.lane.b32.xlu0 %v9437_v29, %s4235_s22 }
 0x1cb   : > { %v5421_v41 = vpop.permute.xlu0 %876  ;;  %996 = vrot.lane.b32.xlu2 %v4991_v44, %s4235_s22  ;;  %988 = vrot.lane.b32.xlu1 %v9440_v61, %s4235_s22 }
 0x1cc   : > { %9438 = vst [vmem:[#allocation167_spill] sm:$0xff] %v5421_v41  ;;  %v9444_v41 = vld [vmem:[#allocation74_spill] sm:$0xff] }
 0x1cd   : > { %v5425_v3 = vpop.permute.xlu2 %898  ;;  %v5429_v55 = vpop.permute.xlu1 %872 }
 0x1ce   : > { %9439 = vst [vmem:[#allocation168_spill] sm:$0xff] %v5425_v3  ;;  %v9446_v3 = vld [vmem:[#allocation81_spill] sm:$0xff] }
 0x1cf   : > { %9441 = vst [vmem:[#allocation169_spill] sm:$0xff] %v5429_v55 }
 0x1d1   : > { %998 = vrot.lane.b32.xlu0 %v4953_v1, %s4235_s22 }
 0x1d3   : > { %v5433_v22 = vpop.permute.xlu0 %882  ;;  %1002 = vrot.lane.b32.xlu2 %v5016_v40, %s4235_s22  ;;  %994 = vrot.lane.b32.xlu1 %v9444_v41, %s4235_s22 }
 0x1d4   : > { %9442 = vst [vmem:[#allocation170_spill] sm:$0xff] %v5433_v22  ;;  %v9449_v22 = vld [vmem:[#allocation80_spill] sm:$0xff] }
 0x1d5   : > { %v5437_v14 = vpop.permute.xlu2 %904  ;;  %v5441_v44 = vpop.permute.xlu1 %878 }
 0x1d6   : > { %9443 = vst [vmem:[#allocation171_spill] sm:$0xff] %v5437_v14 }
 0x1d7   : > { %9445 = vst [vmem:[#allocation172_spill] sm:$0xff] %v5441_v44 }
 0x1d9   : > { %1004 = vrot.lane.b32.xlu0 %v9446_v3, %s4235_s22 }
 0x1db   : > { %v5445_v29 = vpop.permute.xlu0 %888  ;;  %1008 = vrot.lane.b32.xlu2 %v5042_v25, %s4235_s22  ;;  %1000 = vrot.lane.b32.xlu1 %v9449_v22, %s4235_s22 }
 0x1dc   : > { %9447 = vst [vmem:[#allocation81_spill] sm:$0xff] %v5445_v29  ;;  %v9453_v29 = vld [vmem:[#allocation86_spill] sm:$0xff] }
 0x1dd   : > { %v5449_v55 = vpop.permute.xlu2 %910  ;;  %v5453_v1 = vpop.permute.xlu1 %884 }
 0x1de   : > { %9448 = vst [vmem:[#allocation173_spill] sm:$0xff] %v5449_v55 }
 0x1df   : > { %9450 = vst [vmem:[#allocation174_spill] sm:$0xff] %v5453_v1  ;;  %v565_v1 = vrot.slane %v5210_v35, 2 }
 0x1e1   : > { %1010 = vrot.lane.b32.xlu0 %v5004_v30, %s4235_s22 }
 0x1e3   : > { %v5457_v14 = vpop.permute.xlu0 %894  ;;  %1014 = vrot.lane.b32.xlu2 %v5067_v42, %s4235_s22  ;;  %1006 = vrot.lane.b32.xlu1 %v9453_v29, %s4235_s22 }
 0x1e4   : > { %9451 = vst [vmem:[#allocation175_spill] sm:$0xff] %v5457_v14  ;;  %v564_v14 = vrot.slane %v5232_v28, 2 }
 0x1e5   : > { %v5461_v44 = vpop.permute.xlu2 %916  ;;  %v5465_v41 = vpop.permute.xlu1 %890 }
 0x1e6   : > { %9452 = vst [vmem:[#allocation176_spill] sm:$0xff] %v5461_v44  ;;  %v9457_v44 = vld [vmem:[#allocation90_spill] sm:$0xff]  ;;  %v5480_v61 = vsel %vm475_vm3, %v564_v14, %v565_v1  ;;  %v9461_v14 = vld [vmem:[#allocation95_spill] sm:$0xff] }
 0x1e7   : > { %9454 = vst [vmem:[#allocation86_spill] sm:$0xff] %v5465_v41 }
 0x1e9   : > { %1016 = vrot.lane.b32.xlu0 %v5029_v21, %s4235_s22 }
 0x1eb   : > { %v5469_v55 = vpop.permute.xlu0 %900  ;;  %1020 = vrot.lane.b32.xlu2 %v5086_v53, %s4235_s22  ;;  %1012 = vrot.lane.b32.xlu1 %v9457_v44, %s4235_s22 }
 0x1ec   : > { %9455 = vst [vmem:[#allocation177_spill] sm:$0xff] %v5469_v55  ;;  %v567_v55 = vrot.slane %v5359_v12, 2  ;;  %v5504_v12 = vld [vmem:[#allocation2 + $0x38] sm:$0xff] }
 0x1ed   : > { %v5475_v22 = vpop.permute.xlu2 %922  ;;  %v5482_v41 = vpop.permute.xlu1 %896  ;;  %9464 = vst [vmem:[#allocation182_spill] sm:$0xff] %v5504_v12 }
 0x1ee   : > { %9456 = vst [vmem:[#allocation178_spill] sm:$0xff] %v5475_v22  ;;  %v5494_v22 = vsel %vm475_vm3, %v565_v1, %v567_v55  ;;  %v5514_v55 = vld [vmem:[#allocation2 + $0x48] sm:$0xff] }
 0x1ef   : > { %9458 = vst [vmem:[#allocation90_spill] sm:$0xff] %v5482_v41 }
 0x1f0   : > { %9467 = vst [vmem:[#allocation185_spill] sm:$0xff] %v5514_v55 }
 0x1f1   : > { %1022 = vrot.lane.b32.xlu0 %v5055_v27, %s4235_s22 }
 0x1f3   : > { %v5487_v53 = vpop.permute.xlu0 %906  ;;  %1026 = vrot.lane.b32.xlu2 %v5480_v61, %s4235_s22  ;;  %1018 = vrot.lane.b32.xlu1 %v9461_v14, %s4235_s22 }
 0x1f4   : > { %9459 = vst [vmem:[#allocation179_spill] sm:$0xff] %v5487_v53 }
 0x1f5   : > { %v5491_v21 = vpop.permute.xlu2 %928  ;;  %v5498_v45 = vpop.permute.xlu1 %902 }
 0x1f6   : > { %9460 = vst [vmem:[#allocation180_spill] sm:$0xff] %v5491_v21 }
 0x1f7   : > { %9462 = vst [vmem:[#allocation95_spill] sm:$0xff] %v5498_v45  ;;  %v5526_v45 = vld [vmem:[#allocation2 + $0x30] sm:$0xff] }
 0x1f8   : > { %9470 = vst [vmem:[#allocation188_spill] sm:$0xff] %v5526_v45 }
 0x1f9   : > { %1028 = vrot.lane.b32.xlu0 %v5494_v22, %s4235_s22 }
 0x1fb   : > { %v5502_v41 = vpop.permute.xlu0 %912  ;;  %1064 = vrot.lane.b32.xlu2 %v5504_v12, %s4236_s23  ;;  %1024 = vrot.lane.b32.xlu1 %v5072_v33, %s4235_s22 }
 0x1fc   : > { %9463 = vst [vmem:[#allocation181_spill] sm:$0xff] %v5502_v41  ;;  %v5520_v41 = vld [vmem:[#allocation2 + $0x60] sm:$0xff] }
 0x1fd   : > { %v5508_v21 = vpop.permute.xlu2 %966  ;;  %v5512_v1 = vpop.permute.xlu1 %908  ;;  %9469 = vst [vmem:[#allocation187_spill] sm:$0xff] %v5520_v41 }
 0x1fe   : > { %9465 = vst [vmem:[#allocation183_spill] sm:$0xff] %v5508_v21  ;;  %v5532_v21 = vld [vmem:[#allocation2 + $0x68] sm:$0xff] }
 0x1ff   : > { %9466 = vst [vmem:[#allocation184_spill] sm:$0xff] %v5512_v1 }
 0x200   : > { %9472 = vst [vmem:[#allocation190_spill] sm:$0xff] %v5532_v21 }
 0x201   : > { %1066 = vrot.lane.b32.xlu0 %v5514_v55, %s4236_s23  ;;  %v5542_v55 = vld [vmem:[#allocation2 + $0x50] sm:$0xff] }
 0x203   : > { %v5518_v53 = vpop.permute.xlu0 %918  ;;  %1070 = vrot.lane.b32.xlu2 %v5520_v41, %s4236_s23  ;;  %1062 = vrot.lane.b32.xlu1 %v5526_v45, %s4236_s23 }
 0x204   : > { %9468 = vst [vmem:[#allocation186_spill] sm:$0xff] %v5518_v53 }
 0x205   : > { %v5524_v12 = vpop.permute.xlu2 %972  ;;  %v5530_v1 = vpop.permute.xlu1 %914 }
 0x206   : > { %9471 = vst [vmem:[#allocation189_spill] sm:$0xff] %v5530_v1 }
 0x209   : > { %1072 = vrot.lane.b32.xlu0 %v5532_v21, %s4236_s23 }
 0x20b   : > { %v5536_v53 = vpop.permute.xlu0 %924  ;;  %1076 = vrot.lane.b32.xlu2 %v4541_v52, %s4236_s23  ;;  %1068 = vrot.lane.b32.xlu1 %v5542_v55, %s4236_s23 }
 0x20c   : > { %9473 = vst [vmem:[#allocation191_spill] sm:$0xff] %v5536_v53 }
 0x20d   : > { %v5540_v41 = vpop.permute.xlu2 %978  ;;  %v5546_v45 = vpop.permute.xlu1 %920 }
 0x20e   : > { %9474 = vst [vmem:[#allocation192_spill] sm:$0xff] %v5546_v45 }
 0x211   : > { %1078 = vrot.lane.b32.xlu0 %v4577_v63, %s4236_s23 }
 0x213   : > { %v5550_v1 = vpop.permute.xlu0 %930  ;;  %1082 = vrot.lane.b32.xlu2 %v4587_v5, %s4236_s23  ;;  %1074 = vrot.lane.b32.xlu1 %v4608_v46, %s4236_s23 }
 0x214   : > { %9475 = vst [vmem:[#allocation193_spill] sm:$0xff] %v5550_v1 }
 0x215   : > { %v5554_v53 = vpop.permute.xlu2 %984  ;;  %v5558_v52 = vpop.permute.xlu1 %926 }
 0x216   : > { %9476 = vst [vmem:[#allocation194_spill] sm:$0xff] %v5558_v52  ;;  %v9498_v52 = vld [vmem:[#allocation50_spill] sm:$0xff] }
 0x219   : > { %1084 = vrot.lane.b32.xlu0 %v4589_v10, %s4236_s23 }
 0x21b   : > { %v5562_v21 = vpop.permute.xlu0 %968  ;;  %1088 = vrot.lane.b32.xlu2 %v4635_v11, %s4236_s23  ;;  %1080 = vrot.lane.b32.xlu1 %v4579_v0, %s4236_s23 }
 0x21d   : > { %v5566_v63 = vpop.permute.xlu2 %990  ;;  %v5570_v5 = vpop.permute.xlu1 %932 }
 0x21e   : > { %9477 = vst [vmem:[#allocation195_spill] sm:$0xff] %v5566_v63 }
 0x21f   : > { %9478 = vst [vmem:[#allocation196_spill] sm:$0xff] %v5570_v5 }
 0x221   : > { %1090 = vrot.lane.b32.xlu0 %v4664_v58, %s4236_s23 }
 0x223   : > { %v5574_v46 = vpop.permute.xlu0 %974  ;;  %1094 = vrot.lane.b32.xlu2 %v4674_v51, %s4236_s23  ;;  %1086 = vrot.lane.b32.xlu1 %v4695_v26, %s4236_s23 }
 0x225   : > { %v5578_v10 = vpop.permute.xlu2 %996  ;;  %v5582_v11 = vpop.permute.xlu1 %970 }
 0x226   : > { %9479 = vst [vmem:[#allocation197_spill] sm:$0xff] %v5578_v10 }
 0x229   : > { %1096 = vrot.lane.b32.xlu0 %v4676_v39, %s4236_s23 }
 0x22b   : > { %v5586_v0 = vpop.permute.xlu0 %980  ;;  %1100 = vrot.lane.b32.xlu2 %v4722_v49, %s4236_s23  ;;  %1092 = vrot.lane.b32.xlu1 %v4666_v59, %s4236_s23 }
 0x22d   : > { %v5590_v58 = vpop.permute.xlu2 %1002  ;;  %v5594_v51 = vpop.permute.xlu1 %976 }
 0x231   : > { %1102 = vrot.lane.b32.xlu0 %v4741_v6, %s4236_s23 }
 0x233   : > { %v5598_v26 = vpop.permute.xlu0 %986  ;;  %1106 = vrot.lane.b32.xlu2 %v4751_v13, %s4236_s23  ;;  %1098 = vrot.lane.b32.xlu1 %v4764_v16, %s4236_s23 }
 0x234   : > { %9480 = vst [vmem:[#allocation198_spill] sm:$0xff] %v5598_v26 }
 0x235   : > { %v5602_v39 = vpop.permute.xlu2 %1008  ;;  %v5606_v49 = vpop.permute.xlu1 %982 }
 0x239   : > { %1108 = vrot.lane.b32.xlu0 %v4753_v23, %s4236_s23 }
 0x23b   : > { %v5610_v59 = vpop.permute.xlu0 %992  ;;  %1112 = vrot.lane.b32.xlu2 %v4779_v18, %s4236_s23  ;;  %1104 = vrot.lane.b32.xlu1 %v4743_v19, %s4236_s23  ;;  %v5630_v18 = vld [vmem:[#allocation2 + $0x1a0] sm:$0xff] }
 0x23c   : > { %9481 = vst [vmem:[#allocation199_spill] sm:$0xff] %v5610_v59  ;;  %v9504_v59 = vld [vmem:[#allocation51_spill] sm:$0xff] }
 0x23d   : > { %v5614_v6 = vpop.permute.xlu2 %1014  ;;  %v5618_v13 = vpop.permute.xlu1 %988 }
 0x23e   : > { %9482 = vst [vmem:[#allocation200_spill] sm:$0xff] %v5614_v6 }
 0x23f   : > { %9483 = vst [vmem:[#allocation201_spill] sm:$0xff] %v5618_v13 }
 0x241   : > { %1114 = vrot.lane.b32.xlu0 %v4798_v56, %s4236_s23 }
 0x243   : > { %v5622_v16 = vpop.permute.xlu0 %998  ;;  %1118 = vrot.lane.b32.xlu2 %v5232_v28, %s4236_s23  ;;  %1110 = vrot.lane.b32.xlu1 %v4817_v60, %s4236_s23 }
 0x245   : > { %v5626_v23 = vpop.permute.xlu2 %1020  ;;  %v5632_v5 = vpop.permute.xlu1 %994 }
 0x246   : > { %9484 = vst [vmem:[#allocation202_spill] sm:$0xff] %v5626_v23  ;;  %v9499_v23 = vld [vmem:[#allocation43_spill] sm:$0xff] }
 0x247   : > { %9485 = vst [vmem:[#allocation203_spill] sm:$0xff] %v5632_v5  ;;  %v9500_v5 = vld [vmem:[#allocation53_spill] sm:$0xff] }
 0x249   : > { %1120 = vrot.lane.b32.xlu0 %v5210_v35, %s4236_s23  ;;  %v5652_v35 = vld [vmem:[#allocation2 + $0x198] sm:$0xff] }
 0x24b   : > { %v5636_v19 = vpop.permute.xlu0 %1004  ;;  %1124 = vrot.lane.b32.xlu2 %v5630_v18, %s4236_s23  ;;  %1116 = vrot.lane.b32.xlu1 %v4800_v4, %s4236_s23 }
 0x24d   : > { %v5640_v56 = vpop.permute.xlu2 %1026  ;;  %v5644_v28 = vpop.permute.xlu1 %1000 }
 0x24e   : > { %9486 = vst [vmem:[#allocation204_spill] sm:$0xff] %v5640_v56 }
 0x251   : > { %1158 = vrot.lane.b32.xlu0 %v4404_v15, %s4237_s24 }
 0x253   : > { %v5648_v60 = vpop.permute.xlu0 %1010  ;;  %1162 = vrot.lane.b32.xlu2 %v9371_v8, %s4237_s24  ;;  %1122 = vrot.lane.b32.xlu1 %v5652_v35, %s4236_s23 }
 0x255   : > { %v5654_v1 = vpop.permute.xlu2 %1064  ;;  %v5658_v56 = vpop.permute.xlu1 %1006 }
 0x259   : > { %1164 = vrot.lane.b32.xlu0 %v4602_v32, %s4237_s24 }
 0x25b   : > { %v5662_v4 = vpop.permute.xlu0 %1016  ;;  %1168 = vrot.lane.b32.xlu2 %v9377_v36, %s4237_s24  ;;  %1160 = vrot.lane.b32.xlu1 %v4432_v20, %s4237_s24 }
 0x25c   : > { %9487 = vst [vmem:[#allocation205_spill] sm:$0xff] %v5662_v4  ;;  %v9506_v4 = vld [vmem:[#allocation55_spill] sm:$0xff] }
 0x25d   : > { %v5666_v15 = vpop.permute.xlu2 %1070  ;;  %v5670_v8 = vpop.permute.xlu1 %1012 }
 0x25e   : > { %9488 = vst [vmem:[#allocation206_spill] sm:$0xff] %v5670_v8 }
 0x261   : > { %1170 = vrot.lane.b32.xlu0 %v9369_v24, %s4237_s24 }
 0x263   : > { %v5674_v10 = vpop.permute.xlu0 %1022  ;;  %1174 = vrot.lane.b32.xlu2 %v9383_v57, %s4237_s24  ;;  %1166 = vrot.lane.b32.xlu1 %v4548_v54, %s4237_s24 }
 0x264   : > { %9489 = vst [vmem:[#allocation207_spill] sm:$0xff] %v5674_v10  ;;  %v9496_v10 = vld [vmem:[#allocation47_spill] sm:$0xff] }
 0x265   : > { %v5678_v32 = vpop.permute.xlu2 %1076  ;;  %v5682_v36 = vpop.permute.xlu1 %1018 }
 0x266   : > { %9490 = vst [vmem:[#allocation208_spill] sm:$0xff] %v5682_v36 }
 0x269   : > { %1176 = vrot.lane.b32.xlu0 %v9375_v37, %s4237_s24 }
 0x26b   : > { %v5686_v20 = vpop.permute.xlu0 %1028  ;;  %1180 = vrot.lane.b32.xlu2 %v9389_v43, %s4237_s24  ;;  %1172 = vrot.lane.b32.xlu1 %v9373_v62, %s4237_s24 }
 0x26c   : > { %9491 = vst [vmem:[#allocation209_spill] sm:$0xff] %v5686_v20  ;;  %v9495_v20 = vld [vmem:[#allocation31_spill] sm:$0xff] }
 0x26d   : > { %v5690_v24 = vpop.permute.xlu2 %1082  ;;  %v5694_v57 = vpop.permute.xlu1 %1024 }
 0x26e   : > { %9492 = vst [vmem:[#allocation210_spill] sm:$0xff] %v5690_v24  ;;  %v9546_v24 = vld [vmem:[#allocation183_spill] sm:$0xff] }
 0x26f   : > { %9493 = vst [vmem:[#allocation211_spill] sm:$0xff] %v5694_v57  ;;  %v9497_v57 = vld [vmem:[#allocation36_spill] sm:$0xff] }
 0x271   : > { %1182 = vrot.lane.b32.xlu0 %v9381_v17, %s4237_s24 }
 0x273   : > { %v5698_v54 = vpop.permute.xlu0 %1066  ;;  %1186 = vrot.lane.b32.xlu2 %v9395_v48, %s4237_s24  ;;  %1178 = vrot.lane.b32.xlu1 %v9495_v20, %s4237_s24 }
 0x275   : > { %v5702_v37 = vpop.permute.xlu2 %1088  ;;  %v5706_v43 = vpop.permute.xlu1 %1062 }
 0x276   : > { %9494 = vst [vmem:[#allocation212_spill] sm:$0xff] %v5702_v37  ;;  %v9502_v37 = vld [vmem:[#allocation49_spill] sm:$0xff] }
 0x279   : > { %1188 = vrot.lane.b32.xlu0 %v9496_v10, %s4237_s24 }
 0x27b   : > { %v5710_v62 = vpop.permute.xlu0 %1072  ;;  %1192 = vrot.lane.b32.xlu2 %v9401_v9, %s4237_s24  ;;  %1184 = vrot.lane.b32.xlu1 %v9497_v57, %s4237_s24 }
 0x27d   : > { %v5714_v17 = vpop.permute.xlu2 %1094  ;;  %v5718_v48 = vpop.permute.xlu1 %1068 }
 0x281   : > { %1194 = vrot.lane.b32.xlu0 %v9498_v52, %s4237_s24  ;;  %v9503_v52 = vld [vmem:[#allocation46_spill] sm:$0xff] }
 0x283   : > { %v5722_v20 = vpop.permute.xlu0 %1078  ;;  %1198 = vrot.lane.b32.xlu2 %v9406_v31, %s4237_s24  ;;  %1190 = vrot.lane.b32.xlu1 %v9499_v23, %s4237_s24 }
 0x285   : > { %v5726_v10 = vpop.permute.xlu2 %1100  ;;  %v5730_v9 = vpop.permute.xlu1 %1074 }
 0x289   : > { %1200 = vrot.lane.b32.xlu0 %v9500_v5, %s4237_s24 }
 0x28b   : > { %v5734_v57 = vpop.permute.xlu0 %1084  ;;  %1202 = vrot.lane.b32.xlu2 %v9502_v37, %s4237_s24  ;;  %1196 = vrot.lane.b32.xlu1 %v9503_v52, %s4237_s24 }
 0x28c   : > { %9501 = vst [vmem:[#allocation31_spill] sm:$0xff] %v5734_v57 }
 0x28d   : > { %v5740_v36 = vpop.permute.xlu2 %1106  ;;  %v5742_v31 = vpop.permute.xlu1 %1080 }
 0x291   : > { %1204 = vrot.lane.b32.xlu0 %v9504_v59, %s4237_s24 }
 0x293   : > { %v5746_v23 = vpop.permute.xlu0 %1090  ;;  %1206 = vrot.lane.b32.xlu2 %v9506_v4, %s4237_s24  ;;  %1254 = vrot.lane.b32.xlu1 %v9425_v50, %s4238_s25 }
 0x294   : > { %9505 = vst [vmem:[#allocation47_spill] sm:$0xff] %v5746_v23  ;;  %v9511_v23 = vld [vmem:[#allocation58_spill] sm:$0xff] }
 0x295   : > { %v5752_v5 = vpop.permute.xlu1 %1086  ;;  %v5754_v37 = vpop.permute.xlu2 %1112 }
 0x296   : > { %9507 = vst [vmem:[#allocation36_spill] sm:$0xff] %v5752_v5 }
 0x297   : > { %9508 = vst [vmem:[#allocation50_spill] sm:$0xff] %v5754_v37 }
 0x299   : > { %1258 = vrot.lane.b32.xlu0 %v4863_v7, %s4238_s25  ;;  %v9512_v7 = vld [vmem:[#allocation52_spill] sm:$0xff] }
 0x29b   : > { %v5758_v52 = vpop.permute.xlu0 %1096  ;;  %1210 = vrot.lane.b32.xlu2 %v9416_v34, %s4237_s24  ;;  %1256 = vrot.lane.b32.xlu1 %v4893_v47, %s4238_s25  ;;  %v9513_v34 = vld [vmem:[#allocation67_spill] sm:$0xff]  ;;  %v573_v47 = vrot.slane %v5630_v18, 1 }
 0x29d   : > { %v5764_v59 = vpop.permute.xlu1 %1092  ;;  %v5768_v50 = vpop.permute.xlu2 %1118 }
 0x29e   : > { %9509 = vst [vmem:[#allocation43_spill] sm:$0xff] %v5764_v59  ;;  %v572_v59 = vrot.slane %v5652_v35, 1 }
 0x29f   : > { %9510 = vst [vmem:[#allocation53_spill] sm:$0xff] %v5768_v50  ;;  %v9515_v50 = vld [vmem:[#allocation62_spill] sm:$0xff] }
 0x2a1   : > { %1260 = vrot.lane.b32.xlu0 %v9430_v2, %s4238_s25 }
 0x2a3   : > { %v5770_v4 = vpop.permute.xlu0 %1102  ;;  %1212 = vrot.lane.b32.xlu2 %v9511_v23, %s4237_s24  ;;  %1208 = vrot.lane.b32.xlu1 %v9512_v7, %s4237_s24  ;;  %v574_v23 = vsel %vm394_vm1, %v572_v59, %v573_v47  ;;  %v9520_v59 = vld [vmem:[#allocation72_spill] sm:$0xff] }
 0x2a5   : > { %v5776_v37 = vpop.permute.xlu1 %1098  ;;  %v5786_v5 = vpop.permute.xlu2 %1124 }
 0x2a6   : > { %9516 = vst [vmem:[#allocation46_spill] sm:$0xff] %v5786_v5 }
 0x2a9   : > { %1262 = vrot.lane.b32.xlu0 %v9513_v34, %s4238_s25 }
 0x2ab   : > { %v5782_v2 = vpop.permute.xlu0 %1108  ;;  %1264 = vrot.lane.b32.xlu2 %v9515_v50, %s4238_s25  ;;  %1286 = vrot.lane.b32.xlu1 %v5016_v40, %s4238_s25 }
 0x2ac   : > { %9514 = vst [vmem:[#allocation49_spill] sm:$0xff] %v5782_v2  ;;  %v9545_v2 = vld [vmem:[#allocation165_spill] sm:$0xff] }
 0x2ad   : > { %v5791_v7 = vpop.permute.xlu1 %1104  ;;  %v5801_v50 = vpop.permute.xlu2 %1162 }
 0x2b1   : > { %1290 = vrot.lane.b32.xlu0 %v9453_v29, %s4238_s25  ;;  %v9521_v29 = vld [vmem:[#allocation154_spill] sm:$0xff] }
 0x2b3   : > { %v5795_v34 = vpop.permute.xlu0 %1114  ;;  %1266 = vrot.lane.b32.xlu2 %v9435_v38, %s4238_s25  ;;  %1288 = vrot.lane.b32.xlu1 %v9446_v3, %s4238_s25 }
 0x2b4   : > { %9517 = vst [vmem:[#allocation51_spill] sm:$0xff] %v5795_v34 }
 0x2b5   : > { %v5803_v5 = vpop.permute.xlu1 %1110  ;;  %v5813_v34 = vpop.permute.xlu2 %1168 }
 0x2b6   : > { %9518 = vst [vmem:[#allocation55_spill] sm:$0xff] %v5803_v5  ;;  %v578_v5 = vrot.slane %v5630_v18, 2  ;;  %v9532_v18 = vld [vmem:[#allocation78_spill] sm:$0xff] }
 0x2b9   : > { %1292 = vrot.lane.b32.xlu0 %v5042_v25, %s4238_s25  ;;  %v9523_v25 = vld [vmem:[#allocation158_spill] sm:$0xff] }
 0x2bb   : > { %v5807_v40 = vpop.permute.xlu0 %1120  ;;  %1268 = vrot.lane.b32.xlu2 %v9520_v59, %s4238_s25  ;;  %1214 = vrot.lane.b32.xlu1 %v9521_v29, %s4237_s24 }
 0x2bc   : > { %9519 = vst [vmem:[#allocation58_spill] sm:$0xff] %v5807_v40  ;;  %v345_v40 = vld [vmem:[#allocation2 + $0x1a8] sm:$0x3] }
 0x2bd   : > { %v5815_v38 = vpop.permute.xlu1 %1116  ;;  %v575_v29 = vrot.slane %v345_v40, 1  ;;  %v5828_v63 = vpop.permute.xlu2 %1174 }
 0x2be   : > { %9522 = vst [vmem:[#allocation52_spill] sm:$0xff] %v5815_v38 }
 0x2c1   : > { %1294 = vrot.lane.b32.xlu0 %v5004_v30, %s4238_s25  ;;  %v576_v30 = vsel %vm394_vm1, %v573_v47, %v575_v29  ;;  %v9528_v47 = vld [vmem:[#allocation69_spill] sm:$0xff] }
 0x2c3   : > { %v5819_v3 = vpop.permute.xlu0 %1158  ;;  %1296 = vrot.lane.b32.xlu2 %v9457_v44, %s4238_s25  ;;  %1216 = vrot.lane.b32.xlu1 %v9523_v25, %s4237_s24  ;;  %v9525_v44 = vld [vmem:[#allocation66_spill] sm:$0xff] }
 0x2c5   : > { %v5825_v59 = vpop.permute.xlu1 %1122 }
 0x2c6   : > { %9524 = vst [vmem:[#allocation67_spill] sm:$0xff] %v5825_v59  ;;  %v5844_v59 = vpop.permute.xlu2 %1180 }
 0x2c7   : > { %9527 = vst [vmem:[#allocation62_spill] sm:$0xff] %v5844_v59 }
 0x2c9   : > { %1218 = vrot.lane.b32.xlu0 %v574_v23, %s4237_s24  ;;  %v9526_v23 = vld [vmem:[#allocation91_spill] sm:$0xff] }
 0x2cb   : > { %v5830_v38 = vpop.permute.xlu0 %1164  ;;  %1298 = vrot.lane.b32.xlu2 %v5067_v42, %s4238_s25  ;;  %1270 = vrot.lane.b32.xlu1 %v9525_v44, %s4238_s25  ;;  %v577_v42 = vrot.slane %v5652_v35, 2  ;;  %v9529_v44 = vld [vmem:[#allocation70_spill] sm:$0xff] }
 0x2cd   : > { %v5837_v45 = vpop.permute.xlu1 %1160 }
 0x2ce   : > { %v5859_v59 = vpop.permute.xlu2 %1186 }
 0x2cf   : > { %9531 = vst [vmem:[#allocation72_spill] sm:$0xff] %v5859_v59  ;;  %v1614_v59 = vld [vmem:[%s9019_s1 + $0x8] sm:$0xff] }
 0x2d1   : > { %1220 = vrot.lane.b32.xlu0 %v576_v30, %s4237_s24  ;;  %v579_v30 = vsel %vm475_vm3, %v577_v42, %v578_v5  ;;  %v1616_v42 = vld [vmem:[%s9019_s1 + $0x18] sm:$0xff] }
 0x2d3   : > { %v5840_v25 = vpop.permute.xlu0 %1170  ;;  %1300 = vrot.lane.b32.xlu2 %v9526_v23, %s4238_s25  ;;  %1272 = vrot.lane.b32.xlu1 %v9528_v47, %s4238_s25  ;;  %v9530_v23 = vld [vmem:[#allocation74_spill] sm:$0xff]  ;;  %v9533_v47 = vld [vmem:[#allocation84_spill] sm:$0xff] }
 0x2d5   : > { %v5850_v29 = vpop.permute.xlu1 %1166 }
 0x2d9   : > { %1276 = vrot.lane.b32.xlu0 %v9529_v44, %s4238_s25  ;;  %v1617_v44 = vld [vmem:[%s9019_s1 + $0x20] sm:$0xf] }
 0x2da   : > { %4054 = vmatpush.msk.msra.mxu0 %vm1715_vm4, %v1617_v44  ;;  %4124 = vmatpush.msk.msra.mxu2 %vm1715_vm4, %v1617_v44  ;;  %v5887_v44 = vpop.permute.xlu2 %1192 }
 0x2db   : > { %v5855_v57 = vpop.permute.xlu0 %1176  ;;  %1278 = vrot.lane.b32.xlu2 %v9530_v23, %s4238_s25  ;;  %1274 = vrot.lane.b32.xlu1 %v9532_v18, %s4238_s25  ;;  %v9535_v18 = vld [vmem:[#allocation75_spill] sm:$0xff] }
 0x2dc   : > { %1731 = vmatpush.msra.mxu0 %v1616_v42  ;;  %4125 = vmatpush.msra.mxu2 %v1616_v42  ;;  %v1613_v42 = vld [vmem:[%s9019_s1] sm:$0xff] }
 0x2dd   : > { %v5863_v35 = vpop.permute.xlu1 %1172 }
 0x2e1   : > { %1280 = vrot.lane.b32.xlu0 %v9533_v47, %s4238_s25  ;;  %v1615_v47 = vld [vmem:[%s9019_s1 + $0x10] sm:$0xff] }
 0x2e2   : > { %1732 = vmatpush.msra.mxu0 %v1615_v47  ;;  %4126 = vmatpush.msra.mxu2 %v1615_v47  ;;  %v5906_v47 = vpop.permute.xlu2 %1198 }
 0x2e3   : > { %v5875_v23 = vpop.permute.xlu0 %1182  ;;  %1282 = vrot.lane.b32.xlu2 %v9535_v18, %s4238_s25  ;;  %1302 = vrot.lane.b32.xlu1 %v9461_v14, %s4238_s25  ;;  %v9538_v14 = vld [vmem:[#allocation101_spill] sm:$0xff] }
 0x2e4   : > { %9534 = vst [vmem:[#allocation154_spill] sm:$0xff] %v5875_v23  ;;  %1733 = vmatpush.msra.mxu0 %v1614_v59  ;;  %4127 = vmatpush.msra.mxu2 %v1614_v59 }
 0x2e5   : > { %v5889_v18 = vpop.permute.xlu1 %1178 }
 0x2e6   : > { %9536 = vst [vmem:[#allocation158_spill] sm:$0xff] %v5889_v18  ;;  %1734 = vmatpush.msra.mxu0 %v1613_v42  ;;  %4128 = vmatpush.msra.mxu2 %v1613_v42 }
 0x2e9   : > { %1306 = vrot.lane.b32.xlu0 %v5055_v27, %s4238_s25  ;;  %v580_v27 = vrot.slane %v345_v40, 2  ;;  %v4164_v40 = vld [vmem:[#allocation2] sm:$0xff] }
 0x2eb   : > { %v5896_v23 = vpop.permute.xlu0 %1188  ;;  %1308 = vrot.lane.b32.xlu2 %v5072_v33, %s4238_s25  ;;  %1304 = vrot.lane.b32.xlu1 %v9538_v14, %s4238_s25  ;;  %v581_v42 = vsel %vm475_vm3, %v578_v5, %v580_v27 }
 0x2ec   : > { %9537 = vst [vmem:[#allocation66_spill] sm:$0xff] %v5896_v23  ;;  %v9540_v23 = vld [vmem:[#allocation80_spill] sm:$0xff] }
 0x2ed   : > { %v5902_v59 = vpop.permute.xlu1 %1184 }
 0x2ee   : > { %9539 = vst [vmem:[#allocation91_spill] sm:$0xff] %v5902_v59  ;;  %v5919_v59 = vpop.permute.xlu2 %1202 }
 0x2f1   : > { %1310 = vrot.lane.b32.xlu0 %v5480_v61, %s4238_s25 }
 0x2f3   : > { %v5908_v6 = vpop.permute.xlu0 %1194  ;;  %1314 = vrot.lane.b32.xlu2 %v579_v30, %s4238_s25  ;;  %1284 = vrot.lane.b32.xlu1 %v9540_v23, %s4238_s25  ;;  %v9541_v30 = vld [vmem:[#allocation65_spill] sm:$0xff]  ;;  %v9543_v23 = vld [vmem:[#allocation102_spill] sm:$0xff] }
 0x2f4   : > { %v1350_v5 = vsel %vm203_vm0, %v4164_v40, %v9541_v30 }
 0x2f5   : > { %v5914_v33 = vpop.permute.xlu1 %1190  ;;  %v1383_v13 = vsel %vm1382_vm5, %v1350_v5, %v9543_v23  ;;  %v4165_v23 = vld [vmem:[#allocation2 + $0x8] sm:$0xff] }
 0x2f6   : > { %v5937_v26 = vpop.permute.xlu2 %1206 }
 0x2f7   : > { %9547 = vst [vmem:[#allocation70_spill] sm:$0xff] %v5937_v26  ;;  %v9550_v26 = vld [vmem:[#allocation137_spill] sm:$0xff] }
 0x2f9   : > { %1316 = vrot.lane.b32.xlu0 %v581_v42, %s4238_s25  ;;  %v9544_v42 = vld [vmem:[#allocation30_spill] sm:$0xff] }
 0x2fa   : > { %v1416_v18 = vsel %vm1415_vm6, %v1383_v13, %v9544_v42  ;;  %v9549_v42 = vld [vmem:[#allocation113_spill] sm:$0xff] }
 0x2fb   : > { %v5917_v14 = vpop.permute.xlu0 %1200  ;;  %1312 = vrot.lane.b32.xlu1 %v5494_v22, %s4238_s25  ;;  %v1449_v22 = vsel %vm1448_vm8, %v1416_v18, %v9545_v2  ;;  %v9548_v2 = vld [vmem:[#allocation71_spill] sm:$0xff] }
 0x2fc   : > { %v1482_v8 = vsel %vm1481_vm7, %v1449_v22, %v9546_v24  ;;  %v1351_v18 = vsel %vm203_vm0, %v4165_v23, %v9548_v2  ;;  %v4166_v2 = vld [vmem:[#allocation2 + $0x18] sm:$0xff] }
 0x2fd   : > { %v5923_v61 = vpop.permute.xlu1 %1196  ;;  %v1515_v40 = vsel %vm1514_vm9, %v1482_v8, %v5706_v43  ;;  %v1384_v22 = vsel %vm1382_vm5, %v1351_v18, %v9549_v42  ;;  %v9551_v43 = vld [vmem:[#allocation169_spill] sm:$0xff]  ;;  %v9552_v18 = vld [vmem:[#allocation76_spill] sm:$0xff]  ;;  %v9553_v42 = vld [vmem:[#allocation118_spill] sm:$0xff] }
 0x2fe   : > { %v1548_v30 = vsel %vm1547_vm11, %v1515_v40, %v5819_v3  ;;  %v1417_v8 = vsel %vm1415_vm6, %v1384_v22, %v9550_v26  ;;  %v1352_v26 = vsel %vm203_vm0, %v4166_v2, %v9552_v18  ;;  %v9556_v2 = vld [vmem:[#allocation82_spill] sm:$0xff] }
 0x303   : > { %v5927_v27 = vpop.permute.xlu0 %1204 }
 0x304   : > { %9542 = vst [vmem:[#allocation69_spill] sm:$0xff] %v5927_v27  ;;  %v1450_v27 = vsel %vm1448_vm8, %v1417_v8, %v9551_v43  ;;  %v9555_v8 = vld [vmem:[#allocation159_spill] sm:$0xff] }
 0x305   : > { %v1255_v13 = vpop.permute.xlu1 %1254  ;;  %v1483_v3 = vsel %vm1481_vm7, %v1450_v27, %v5562_v21  ;;  %v1385_v21 = vsel %vm1382_vm5, %v1352_v26, %v9553_v42  ;;  %v9554_v27 = vld [vmem:[#allocation143_spill] sm:$0xff]  ;;  %v4168_v26 = vld [vmem:[#allocation2 + $0xc0] sm:$0xff] }
 0x306   : > { %v1581_v5 = vsel %vm1580_vm10, %v1548_v30, %v1255_v13  ;;  %v1516_v40 = vsel %vm1514_vm9, %v1483_v3, %v5654_v1  ;;  %v5959_v13 = vpop.permute.xlu2 %1210  ;;  %v1418_v1 = vsel %vm1415_vm6, %v1385_v21, %v9554_v27  ;;  %v9557_v42 = vld [vmem:[#allocation99_spill] sm:$0xff] }
 0x307   : > { %4055 = vmatmul.msk.f32.vlgmr.msra.gmra.mxu0 %vm1618_vm12, %v1581_v5  ;;  %v1549_v30 = vsel %vm1547_vm11, %v1516_v40, %v5837_v45  ;;  %v1451_v45 = vsel %vm1448_vm8, %v1418_v1, %v9555_v8  ;;  %v1366_v21 = vsel %vm203_vm0, %v4168_v26, %v9557_v42  ;;  %v9560_v8 = vld [vmem:[#allocation35_spill] sm:$0xff] }
 0x308   : > { %v1484_v43 = vsel %vm1481_vm7, %v1451_v45, %v5582_v11  ;;  %v9558_v11 = vld [vmem:[#allocation105_spill] sm:$0xff] }
 0x309   : > { %v1517_v3 = vsel %vm1514_vm9, %v1484_v43, %v5698_v54  ;;  %v9561_v45 = vld [vmem:[#allocation145_spill] sm:$0xff] }
 0x30a   : > { %v1550_v40 = vsel %vm1547_vm11, %v1517_v3, %v5801_v50  ;;  %v9559_v50 = vld [vmem:[#allocation130_spill] sm:$0xff]  ;;  %v9562_v3 = vld [vmem:[#allocation167_spill] sm:$0xff] }
 0x30b   : > { %v1259_v24 = vpop.permute.xlu0 %1258  ;;  %v1399_v1 = vsel %vm1382_vm5, %v1366_v21, %v9559_v50 }
 0x30c   : > { %v1432_v43 = vsel %vm1415_vm6, %v1399_v1, %v9561_v45  ;;  %v4169_v45 = vld [vmem:[#allocation2 + $0xc8] sm:$0xff] }
 0x30d   : > { %v1257_v5 = vpop.permute.xlu1 %1256 }
 0x30e   : > { %v1582_v23 = vsel %vm1580_vm10, %v1549_v30, %v1257_v5  ;;  %v1583_v5 = vsel %vm1580_vm10, %v1550_v40, %v1259_v24  ;;  %v5984_v27 = vpop.permute.xlu2 %1212 }
 0x30f   : > { %4056 = vmatmul.msk.f32.gmra.mxu0 %vm1618_vm12, %v1582_v23  ;;  %v4167_v23 = vld [vmem:[#allocation2 + $0x20] sm:$0xff] }
 0x310   : > { %v1353_v18 = vsel %vm203_vm0, %v4167_v23, %v9556_v2  ;;  %v9563_v23 = vld [vmem:[#allocation95_spill] sm:$0xff] }
 0x311   : > { %v1386_v54 = vsel %vm1382_vm5, %v1353_v18, %v9558_v11  ;;  %v1465_v2 = vsel %vm1448_vm8, %v1432_v43, %v9563_v23  ;;  %v9570_v23 = vld [vmem:[#allocation152_spill] sm:$0xff] }
 0x312   : > { %v1419_v24 = vsel %vm1415_vm6, %v1386_v54, %v9560_v8  ;;  %v1498_v18 = vsel %vm1481_vm7, %v1465_v2, %v5622_v16  ;;  %v9564_v8 = vld [vmem:[#allocation57_spill] sm:$0xff]  ;;  %v9565_v16 = vld [vmem:[#allocation188_spill] sm:$0xff] }
 0x313   : > { %v1261_v22 = vpop.permute.xlu0 %1260  ;;  %v1452_v40 = vsel %vm1448_vm8, %v1419_v24, %v9562_v3  ;;  %v1531_v21 = vsel %vm1514_vm9, %v1498_v18, %v5714_v17  ;;  %v1354_v24 = vsel %vm203_vm0, %v9565_v16, %v9564_v8  ;;  %v9567_v17 = vld [vmem:[#allocation116_spill] sm:$0xff] }
 0x314   : > { %v1564_v54 = vsel %vm1547_vm11, %v1531_v21, %v5914_v33  ;;  %v9568_v33 = vld [vmem:[#allocation135_spill] sm:$0xff]  ;;  %v9569_v3 = vld [vmem:[#allocation140_spill] sm:$0xff] }
 0x315   : > { %v5977_v30 = vpop.permute.xlu1 %1208  ;;  %v9571_v18 = vld [vmem:[#allocation172_spill] sm:$0xff]  ;;  %v9572_v21 = vld [vmem:[#allocation171_spill] sm:$0xff] }
 0x317   : > { %4057 = vmatmul.msk.f32.gmra.mxu0 %vm1618_vm12, %v1583_v5  ;;  %v1485_v5 = vsel %vm1481_vm7, %v1452_v40, %v5524_v12 }
 0x318   : > { %v1518_v42 = vsel %vm1514_vm9, %v1485_v5, %v5718_v48  ;;  %v9566_v48 = vld [vmem:[#allocation79_spill] sm:$0xff]  ;;  %v1265_v5 = vpop.permute.xlu2 %1264 }
 0x319   : > { %v1551_v11 = vsel %vm1547_vm11, %v1518_v42, %v5830_v38  ;;  %v1367_v43 = vsel %vm203_vm0, %v4169_v45, %v9566_v48  ;;  %v1387_v38 = vsel %vm1382_vm5, %v1354_v24, %v9567_v17 }
 0x31a   : > { %v1584_v1 = vsel %vm1580_vm10, %v1551_v11, %v1261_v22  ;;  %v1400_v22 = vsel %vm1382_vm5, %v1367_v43, %v9568_v33  ;;  %v1420_v40 = vsel %vm1415_vm6, %v1387_v38, %v9569_v3  ;;  %v9573_v43 = vld [vmem:[#allocation60_spill] sm:$0xff]  ;;  %v9575_v38 = vld [vmem:[#allocation97_spill] sm:$0xff] }
 0x31b   : > { %v1263_v26 = vpop.permute.xlu0 %1262  ;;  %v1433_v2 = vsel %vm1415_vm6, %v1400_v22, %v9570_v23  ;;  %v1453_v42 = vsel %vm1448_vm8, %v1420_v40, %v9571_v18  ;;  %v9577_v33 = vld [vmem:[#allocation120_spill] sm:$0xff]  ;;  %v9579_v40 = vld [vmem:[#allocation54_spill] sm:$0xff] }
 0x31c   : > { %v1466_v11 = vsel %vm1448_vm8, %v1433_v2, %v9572_v21  ;;  %v9578_v22 = vld [vmem:[#allocation144_spill] sm:$0xff]  ;;  %v9580_v2 = vld [vmem:[#allocation162_spill] sm:$0xff] }
 0x31d   : > { %v1287_v50 = vpop.permute.xlu1 %1286 }
 0x31e   : > { %v1597_v12 = vsel %vm1580_vm10, %v1564_v54, %v1287_v50  ;;  %v1486_v54 = vsel %vm1481_vm7, %v1453_v42, %v5574_v46  ;;  %v1499_v50 = vsel %vm1481_vm7, %v1466_v11, %v5644_v28  ;;  %v9574_v28 = vld [vmem:[#allocation182_spill] sm:$0xff]  ;;  %v9581_v42 = vld [vmem:[#allocation179_spill] sm:$0xff] }
 0x31f   : > { %4058 = vmatmul.msk.f32.gmra.mxu0 %vm1618_vm12, %v1584_v1  ;;  %4071 = vmatmul.msk.f32.vlgmr.msra.gmra.mxu2 %vm1618_vm12, %v1597_v12  ;;  %v1519_v1 = vsel %vm1514_vm9, %v1486_v54, %v5666_v15  ;;  %v1532_v12 = vsel %vm1514_vm9, %v1499_v50, %v5758_v52  ;;  %v1355_v17 = vsel %vm203_vm0, %v9574_v28, %v9573_v43  ;;  %v4170_v15 = vld [vmem:[#allocation2 + $0xd8] sm:$0xff]  ;;  %v9584_v28 = vld [vmem:[#allocation103_spill] sm:$0xff] }
 0x320   : > { %v1552_v8 = vsel %vm1547_vm11, %v1519_v1, %v5850_v29  ;;  %v1565_v16 = vsel %vm1547_vm11, %v1532_v12, %v5887_v44  ;;  %v1368_v52 = vsel %vm203_vm0, %v4170_v15, %v9575_v38  ;;  %v9576_v29 = vld [vmem:[#allocation123_spill] sm:$0xff]  ;;  %v1267_v50 = vpop.permute.xlu2 %1266  ;;  %v9586_v15 = vld [vmem:[#allocation133_spill] sm:$0xff] }
 0x321   : > { %v1585_v48 = vsel %vm1580_vm10, %v1552_v8, %v1263_v26  ;;  %v1388_v44 = vsel %vm1382_vm5, %v1355_v17, %v9576_v29  ;;  %v1401_v26 = vsel %vm1382_vm5, %v1368_v52, %v9577_v33  ;;  %v9588_v52 = vld [vmem:[#allocation147_spill] sm:$0xff] }
 0x322   : > { %v1421_v3 = vsel %vm1415_vm6, %v1388_v44, %v9578_v22  ;;  %v1434_v23 = vsel %vm1415_vm6, %v1401_v26, %v9579_v40  ;;  %v9589_v44 = vld [vmem:[#allocation170_spill] sm:$0xff]  ;;  %v9590_v26 = vld [vmem:[#allocation184_spill] sm:$0xff] }
 0x323   : > { %v1291_v45 = vpop.permute.xlu0 %1290  ;;  %v1454_v18 = vsel %vm1448_vm8, %v1421_v3, %v9580_v2  ;;  %v1467_v21 = vsel %vm1448_vm8, %v1434_v23, %v9581_v42 }
 0x324   : > { %v1487_v11 = vsel %vm1481_vm7, %v1454_v18, %v5594_v51  ;;  %v1500_v54 = vsel %vm1481_vm7, %v1467_v21, %v5590_v58  ;;  %v9582_v58 = vld [vmem:[#allocation77_spill] sm:$0xff] }
 0x325   : > { %v1289_v24 = vpop.permute.xlu1 %1288  ;;  %v1520_v1 = vsel %vm1514_vm9, %v1487_v11, %v5710_v62  ;;  %v1533_v12 = vsel %vm1514_vm9, %v1500_v54, %v5776_v37  ;;  %v4171_v62 = vld [vmem:[#allocation2 + $0xe0] sm:$0xff] }
 0x326   : > { %v1598_v46 = vsel %vm1580_vm10, %v1565_v16, %v1289_v24  ;;  %v1553_v8 = vsel %vm1547_vm11, %v1520_v1, %v5813_v34  ;;  %v1566_v16 = vsel %vm1547_vm11, %v1533_v12, %v5908_v6  ;;  %v1369_v37 = vsel %vm203_vm0, %v4171_v62, %v9584_v28  ;;  %v9585_v6 = vld [vmem:[#allocation108_spill] sm:$0xff]  ;;  %v4172_v1 = vld [vmem:[#allocation2 + $0xf0] sm:$0xff]  ;;  %v9592_v12 = vld [vmem:[#allocation85_spill] sm:$0xff] }
 0x327   : > { %4059 = vmatmul.msk.f32.gmra.mxu0 %vm1618_vm12, %v1585_v48  ;;  %4072 = vmatmul.msk.f32.gmra.mxu2 %vm1618_vm12, %v1598_v46  ;;  %v1586_v51 = vsel %vm1580_vm10, %v1553_v8, %v1265_v5  ;;  %v1599_v48 = vsel %vm1580_vm10, %v1566_v16, %v1291_v45  ;;  %v9583_v46 = vld [vmem:[#allocation185_spill] sm:$0xff]  ;;  %v1402_v5 = vsel %vm1382_vm5, %v1369_v37, %v9586_v15  ;;  %v9587_v45 = vld [vmem:[#allocation42_spill] sm:$0xff] }
 0x328   : > { %v1356_v43 = vsel %vm203_vm0, %v9583_v46, %v9582_v58  ;;  %v1435_v29 = vsel %vm1415_vm6, %v1402_v5, %v9588_v52  ;;  %v1269_v21 = vpop.permute.xlu2 %1268  ;;  %v9594_v8 = vld [vmem:[#allocation138_spill] sm:$0xff]  ;;  %v9598_v62 = vld [vmem:[#allocation173_spill] sm:$0xff]  ;;  %v9599_v52 = vld [vmem:[#allocation63_spill] sm:$0xff] }
 0x329   : > { %v1389_v34 = vsel %vm1382_vm5, %v1356_v43, %v9585_v6  ;;  %v1468_v22 = vsel %vm1448_vm8, %v1435_v29, %v9590_v26  ;;  %v9595_v16 = vld [vmem:[#allocation34_spill] sm:$0xff]  ;;  %v9600_v29 = vld [vmem:[#allocation187_spill] sm:$0xff]  ;;  %v9603_v26 = vld [vmem:[#allocation125_spill] sm:$0xff] }
 0x32a   : > { %v1422_v38 = vsel %vm1415_vm6, %v1389_v34, %v9587_v45  ;;  %v1501_v40 = vsel %vm1481_vm7, %v1468_v22, %v5636_v19  ;;  %v9591_v19 = vld [vmem:[#allocation87_spill] sm:$0xff]  ;;  %v9597_v46 = vld [vmem:[#allocation174_spill] sm:$0xff] }
 0x32b   : > { %v1293_v17 = vpop.permute.xlu0 %1292  ;;  %v1455_v33 = vsel %vm1448_vm8, %v1422_v38, %v9589_v44  ;;  %v1534_v2 = vsel %vm1514_vm9, %v1501_v40, %v5726_v10  ;;  %v1370_v10 = vsel %vm203_vm0, %v4172_v1, %v9592_v12  ;;  %v4173_v44 = vld [vmem:[#allocation2 + $0xf8] sm:$0xff] }
 0x32c   : > { %v1488_v3 = vsel %vm1481_vm7, %v1455_v33, %v5540_v41  ;;  %v1567_v42 = vsel %vm1547_vm11, %v1534_v2, %v5923_v61 }
 0x32d   : > { %v6077_v24 = vpop.permute.xlu1 %1214  ;;  %v1521_v23 = vsel %vm1514_vm9, %v1488_v3, %v5730_v9  ;;  %v1600_v54 = vsel %vm1580_vm10, %v1567_v42, %v1293_v17  ;;  %v1357_v9 = vsel %vm203_vm0, %v5542_v55, %v9591_v19  ;;  %v9604_v3 = vld [vmem:[#allocation146_spill] sm:$0xff] }
 0x32e   : > { %v1554_v18 = vsel %vm1547_vm11, %v1521_v23, %v5840_v25  ;;  %v9593_v25 = vld [vmem:[#allocation119_spill] sm:$0xff]  ;;  %v9605_v23 = vld [vmem:[#allocation160_spill] sm:$0xff] }
 0x32f   : > { %4060 = vmatmul.msk.f32.gmra.mxu0 %vm1618_vm12, %v1586_v51  ;;  %4073 = vmatmul.msk.f32.gmra.mxu2 %vm1618_vm12, %v1599_v48  ;;  %v1587_v41 = vsel %vm1580_vm10, %v1554_v18, %v1267_v50  ;;  %v1390_v61 = vsel %vm1382_vm5, %v1357_v9, %v9593_v25  ;;  %v1403_v50 = vsel %vm1382_vm5, %v1370_v10, %v9594_v8  ;;  %v9596_v48 = vld [vmem:[#allocation156_spill] sm:$0xff] }
 0x330   : > { %v1423_v51 = vsel %vm1415_vm6, %v1390_v61, %v9595_v16  ;;  %v1436_v55 = vsel %vm1415_vm6, %v1403_v50, %v9596_v48  ;;  %v9606_v18 = vld [vmem:[#allocation164_spill] sm:$0xff]  ;;  %v9609_v50 = vld [vmem:[#allocation190_spill] sm:$0xff] }
 0x331   : > { %v1456_v43 = vsel %vm1448_vm8, %v1423_v51, %v9597_v46  ;;  %v1469_v28 = vsel %vm1448_vm8, %v1436_v55, %v9598_v62  ;;  %v4174_v51 = vld [vmem:[#allocation2 + $0x108] sm:$0xff] }
 0x332   : > { %v1489_v37 = vsel %vm1481_vm7, %v1456_v43, %v5586_v0  ;;  %v1502_v17 = vsel %vm1481_vm7, %v1469_v28, %v5658_v56  ;;  %v1358_v56 = vsel %vm203_vm0, %v9600_v29, %v9599_v52  ;;  %v9614_v43 = vld [vmem:[#allocation149_spill] sm:$0xff] }
 0x333   : > { %v1295_v58 = vpop.permute.xlu0 %1294  ;;  %v1522_v6 = vsel %vm1514_vm9, %v1489_v37, %v5678_v32  ;;  %v1535_v34 = vsel %vm1514_vm9, %v1502_v17, %v5770_v4  ;;  %v9601_v32 = vld [vmem:[#allocation100_spill] sm:$0xff]  ;;  %v1297_v4 = vpop.permute.xlu2 %1296  ;;  %v9615_v37 = vld [vmem:[#allocation81_spill] sm:$0xff] }
 0x334   : > { %v1555_v15 = vsel %vm1547_vm11, %v1522_v6, %v5863_v35  ;;  %v1568_v5 = vsel %vm1547_vm11, %v1535_v34, %v5906_v47  ;;  %v1371_v33 = vsel %vm203_vm0, %v4173_v44, %v9601_v32  ;;  %v9602_v35 = vld [vmem:[#allocation126_spill] sm:$0xff]  ;;  %v9616_v6 = vld [vmem:[#allocation189_spill] sm:$0xff]  ;;  %v4175_v44 = vld [vmem:[#allocation2 + $0x78] sm:$0xff] }
 0x335   : > { %v6112_v11 = vpop.permute.xlu1 %1216  ;;  %v1588_v38 = vsel %vm1580_vm10, %v1555_v15, %v1269_v21  ;;  %v1601_v0 = vsel %vm1580_vm10, %v1568_v5, %v1295_v58  ;;  %v1391_v47 = vsel %vm1382_vm5, %v1358_v56, %v9602_v35  ;;  %v1404_v22 = vsel %vm1382_vm5, %v1371_v33, %v9603_v26  ;;  %v9607_v21 = vld [vmem:[#allocation181_spill] sm:$0xff]  ;;  %v9621_v26 = vld [vmem:[#allocation39_spill] sm:$0xff] }
 0x336   : > { %v1424_v40 = vsel %vm1415_vm6, %v1391_v47, %v9604_v3  ;;  %v1437_v2 = vsel %vm1415_vm6, %v1404_v22, %v9605_v23  ;;  %v9613_v58 = vld [vmem:[#allocation45_spill] sm:$0xff]  ;;  %v9622_v3 = vld [vmem:[#allocation56_spill] sm:$0xff]  ;;  %v9623_v23 = vld [vmem:[#allocation86_spill] sm:$0xff] }
 0x337   : > { %4061 = vmatmul.msk.f32.gmra.mxu0 %vm1618_vm12, %v1587_v41  ;;  %4074 = vmatmul.msk.f32.gmra.mxu2 %vm1618_vm12, %v1600_v54  ;;  %v1457_v42 = vsel %vm1448_vm8, %v1424_v40, %v9606_v18  ;;  %v1470_v41 = vsel %vm1448_vm8, %v1437_v2, %v9607_v21  ;;  %v9618_v33 = vld [vmem:[#allocation89_spill] sm:$0xff]  ;;  %v9624_v18 = vld [vmem:[#allocation176_spill] sm:$0xff]  ;;  %v9625_v21 = vld [vmem:[#allocation198_spill] sm:$0xff] }
 0x338   : > { %v1490_v54 = vsel %vm1481_vm7, %v1457_v42, %v5606_v49  ;;  %v1503_v19 = vsel %vm1481_vm7, %v1470_v41, %v5602_v39  ;;  %v9608_v39 = vld [vmem:[#allocation83_spill] sm:$0xff]  ;;  %v9620_v35 = vld [vmem:[#allocation141_spill] sm:$0xff] }
 0x339   : > { %v1523_v1 = vsel %vm1514_vm9, %v1490_v54, %v5722_v20  ;;  %v1536_v12 = vsel %vm1514_vm9, %v1503_v19, %v5791_v7  ;;  %v1359_v16 = vsel %vm203_vm0, %v9609_v50, %v9608_v39  ;;  %v9610_v20 = vld [vmem:[#allocation106_spill] sm:$0xff]  ;;  %v9630_v39 = vld [vmem:[#allocation69_spill] sm:$0xff] }
 0x33a   : > { %v1556_v10 = vsel %vm1547_vm11, %v1523_v1, %v5828_v63  ;;  %v1569_v25 = vsel %vm1547_vm11, %v1536_v12, %v5917_v14  ;;  %v1372_v48 = vsel %vm203_vm0, %v4174_v51, %v9610_v20  ;;  %v9611_v63 = vld [vmem:[#allocation111_spill] sm:$0xff]  ;;  %v9612_v14 = vld [vmem:[#allocation136_spill] sm:$0xff]  ;;  %v9626_v54 = vld [vmem:[#allocation206_spill] sm:$0xff] }
 0x33b   : > { %v6172_v9 = vpop.permute.xlu0 %1218  ;;  %v1602_v8 = vsel %vm1580_vm10, %v1569_v25, %v1297_v4  ;;  %v1392_v7 = vsel %vm1382_vm5, %v1359_v16, %v9611_v63  ;;  %v1405_v55 = vsel %vm1382_vm5, %v1372_v48, %v9612_v14  ;;  %v1299_v28 = vpop.permute.xlu2 %1298  ;;  %v9627_v12 = vld [vmem:[#allocation210_spill] sm:$0xff]  ;;  %v9628_v25 = vld [vmem:[#allocation49_spill] sm:$0xff]  ;;  %v9631_v48 = vld [vmem:[#allocation68_spill] sm:$0xff] }
 0x33c   : > { %v1425_v46 = vsel %vm1415_vm6, %v1392_v7, %v9613_v58  ;;  %v1438_v62 = vsel %vm1415_vm6, %v1405_v55, %v9614_v43  ;;  %v4177_v20 = vld [vmem:[#allocation2 + $0x80] sm:$0xff]  ;;  %v9632_v14 = vld [vmem:[#allocation104_spill] sm:$0xff] }
 0x33d   : > { %v1271_v45 = vpop.permute.xlu1 %1270  ;;  %v1458_v17 = vsel %vm1448_vm8, %v1425_v46, %v9615_v37  ;;  %v1471_v34 = vsel %vm1448_vm8, %v1438_v62, %v9616_v6  ;;  %v1361_v63 = vsel %vm203_vm0, %v4177_v20, %v9631_v48  ;;  %v4178_v7 = vld [vmem:[#allocation2 + $0x120] sm:$0xff]  ;;  %v9634_v62 = vld [vmem:[#allocation128_spill] sm:$0xff]  ;;  %v9636_v6 = vld [vmem:[#allocation59_spill] sm:$0xff] }
 0x33e   : > { %v1589_v49 = vsel %vm1580_vm10, %v1556_v10, %v1271_v45  ;;  %v1491_v15 = vsel %vm1481_vm7, %v1458_v17, %v5554_v53  ;;  %v1504_v5 = vsel %vm1481_vm7, %v1471_v34, %v5648_v60  ;;  %v9617_v60 = vld [vmem:[#allocation92_spill] sm:$0xff]  ;;  %v1374_v55 = vsel %vm203_vm0, %v4178_v7, %v9632_v14  ;;  %v9633_v46 = vld [vmem:[#allocation129_spill] sm:$0xff]  ;;  %v9656_v14 = vld [vmem:[#allocation50_spill] sm:$0xff] }
 0x33f   : > { %4062 = vmatmul.msk.f32.gmra.mxu0 %vm1618_vm12, %v1588_v38  ;;  %4075 = vmatmul.msk.f32.gmra.mxu2 %vm1618_vm12, %v1601_v0  ;;  %v1524_v45 = vsel %vm1514_vm9, %v1491_v15, %v5742_v31  ;;  %v1537_v38 = vsel %vm1514_vm9, %v1504_v5, %v5740_v36  ;;  %v1360_v32 = vsel %vm203_vm0, %v4175_v44, %v9617_v60  ;;  %v4176_v31 = vld [vmem:[#allocation2 + $0x110] sm:$0xff]  ;;  %v9635_v37 = vld [vmem:[#allocation148_spill] sm:$0xff]  ;;  %v9637_v5 = vld [vmem:[#allocation166_spill] sm:$0xff] }
 0x340   : > { %v1557_v0 = vsel %vm1547_vm11, %v1524_v45, %v5855_v57  ;;  %v1570_v52 = vsel %vm1547_vm11, %v1537_v38, %v5919_v59  ;;  %v1373_v36 = vsel %vm203_vm0, %v4176_v31, %v9618_v33  ;;  %v9619_v57 = vld [vmem:[#allocation124_spill] sm:$0xff]  ;;  %v1394_v43 = vsel %vm1382_vm5, %v1361_v63, %v9633_v46  ;;  %v9638_v38 = vld [vmem:[#allocation186_spill] sm:$0xff]  ;;  %v9641_v60 = vld [vmem:[#allocation31_spill] sm:$0xff] }
 0x341   : > { %v1603_v53 = vsel %vm1580_vm10, %v1570_v52, %v1299_v28  ;;  %v1393_v59 = vsel %vm1382_vm5, %v1360_v32, %v9619_v57  ;;  %v1406_v47 = vsel %vm1382_vm5, %v1373_v36, %v9620_v35  ;;  %v1407_v28 = vsel %vm1382_vm5, %v1374_v55, %v9634_v62  ;;  %v9639_v52 = vld [vmem:[#allocation201_spill] sm:$0xff]  ;;  %v9642_v31 = vld [vmem:[#allocation55_spill] sm:$0xff]  ;;  %v9643_v36 = vld [vmem:[#allocation62_spill] sm:$0xff] }
 0x342   : > { %v1426_v22 = vsel %vm1415_vm6, %v1393_v59, %v9621_v26  ;;  %v1439_v40 = vsel %vm1415_vm6, %v1406_v47, %v9622_v3  ;;  %v1427_v17 = vsel %vm1415_vm6, %v1394_v43, %v9635_v37  ;;  %v1440_v34 = vsel %vm1415_vm6, %v1407_v28, %v9636_v6  ;;  %v9644_v57 = vld [vmem:[#allocation70_spill] sm:$0xff]  ;;  %v4179_v26 = vld [vmem:[#allocation2 + $0x90] sm:$0xff]  ;;  %v9655_v63 = vld [vmem:[#allocation36_spill] sm:$0xff] }
 0x343   : > { %v6215_v29 = vpop.permute.xlu0 %1220  ;;  %v1459_v2 = vsel %vm1448_vm8, %v1426_v22, %v9623_v23  ;;  %v1472_v42 = vsel %vm1448_vm8, %v1439_v40, %v9624_v18  ;;  %v1301_v1 = vpop.permute.xlu2 %1300  ;;  %v1460_v45 = vsel %vm1448_vm8, %v1427_v17, %v9637_v5  ;;  %v9645_v22 = vld [vmem:[#allocation88_spill] sm:$0xff]  ;;  %v4180_v40 = vld [vmem:[#allocation2 + $0x128] sm:$0xff]  ;;  %v9646_v23 = vld [vmem:[#allocation109_spill] sm:$0xff] }
 0x344   : > { %v1492_v41 = vsel %vm1481_vm7, %v1459_v2, %v9625_v21  ;;  %v1505_v19 = vsel %vm1481_vm7, %v1472_v42, %v9626_v54  ;;  %v1362_v3 = vsel %vm203_vm0, %v4179_v26, %v9645_v22  ;;  %v1375_v2 = vsel %vm203_vm0, %v4180_v40, %v9646_v23  ;;  %v9647_v42 = vld [vmem:[#allocation114_spill] sm:$0xff]  ;;  %v4181_v37 = vld [vmem:[#allocation2 + $0x98] sm:$0xff]  ;;  %v9670_v23 = vld [vmem:[#allocation91_spill] sm:$0xff] }
 0x345   : > { %v1273_v61 = vpop.permute.xlu1 %1272  ;;  %v1525_v10 = vsel %vm1514_vm9, %v1492_v41, %v9627_v12  ;;  %v1395_v21 = vsel %vm1382_vm5, %v1362_v3, %v9647_v42  ;;  %v9648_v41 = vld [vmem:[#allocation139_spill] sm:$0xff]  ;;  %v9658_v17 = vld [vmem:[#allocation96_spill] sm:$0xff] }
 0x346   : > { %v1590_v56 = vsel %vm1580_vm10, %v1557_v0, %v1273_v61  ;;  %v1538_v61 = vsel %vm1514_vm9, %v1505_v19, %v9628_v25  ;;  %v1473_v0 = vsel %vm1448_vm8, %v1440_v34, %v9638_v38  ;;  %v1408_v54 = vsel %vm1382_vm5, %v1375_v2, %v9648_v41  ;;  %v9649_v19 = vld [vmem:[#allocation48_spill] sm:$0xff]  ;;  %v9650_v12 = vld [vmem:[#allocation151_spill] sm:$0xff]  ;;  %v4183_v41 = vld [vmem:[#allocation2 + $0xa8] sm:$0xff] }
 0x347   : > { %4063 = vmatmul.msk.f32.gmra.mxu0 %vm1618_vm12, %v1589_v49  ;;  %4076 = vmatmul.msk.f32.gmra.mxu2 %vm1618_vm12, %v1602_v8  ;;  %v9629_v49 = vld [vmem:[#allocation158_spill] sm:$0xff]  ;;  %v1571_v50 = vsel %vm1547_vm11, %v1538_v61, %v9630_v39  ;;  %v9651_v61 = vld [vmem:[#allocation175_spill] sm:$0xff]  ;;  %v1363_v6 = vsel %vm203_vm0, %v4181_v37, %v9658_v17  ;;  %v4182_v34 = vld [vmem:[#allocation2 + $0x138] sm:$0xff] }
 0x348   : > { %v1558_v8 = vsel %vm1547_vm11, %v1525_v10, %v9629_v49  ;;  %v1604_v51 = vsel %vm1580_vm10, %v1571_v50, %v1301_v1  ;;  %v1428_v1 = vsel %vm1415_vm6, %v1395_v21, %v9649_v19  ;;  %v1441_v10 = vsel %vm1415_vm6, %v1408_v54, %v9650_v12  ;;  %v9653_v50 = vld [vmem:[#allocation195_spill] sm:$0xff]  ;;  %v9668_v26 = vld [vmem:[#allocation212_spill] sm:$0xff]  ;;  %v9671_v54 = vld [vmem:[#allocation73_spill] sm:$0xff] }
 0x349   : > { %v1461_v49 = vsel %vm1448_vm8, %v1428_v1, %v9651_v61  ;;  %v9669_v3 = vld [vmem:[#allocation51_spill] sm:$0xff]  ;;  %v1364_v19 = vsel %vm203_vm0, %v4183_v41, %v9671_v54  ;;  %v4184_v1 = vld [vmem:[#allocation2 + $0x140] sm:$0xff]  ;;  %v9673_v61 = vld [vmem:[#allocation132_spill] sm:$0xff] }
 0x34a   : > { %v9672_v12 = vld [vmem:[#allocation107_spill] sm:$0xff]  ;;  %v9683_v17 = vld [vmem:[#allocation72_spill] sm:$0xff]  ;;  %v9696_v41 = vld [vmem:[#allocation66_spill] sm:$0xff] }
 0x34b   : > { %v1277_v58 = vpop.permute.xlu0 %1276  ;;  %v1279_v18 = vpop.permute.xlu2 %1278 }
 0x34d   : > { %v1275_v4 = vpop.permute.xlu1 %1274 }
 0x34e   : > { %v1591_v16 = vsel %vm1580_vm10, %v1558_v8, %v1275_v4  ;;  %v9652_v8 = vld [vmem:[#allocation192_spill] sm:$0xff] }
 0x34f   : > { %4064 = vmatmul.msk.f32.gmra.mxu0 %vm1618_vm12, %v1590_v56  ;;  %4077 = vmatmul.msk.f32.gmra.mxu2 %vm1618_vm12, %v1603_v53  ;;  %v1493_v56 = vsel %vm1481_vm7, %v1460_v45, %v9639_v52  ;;  %v9640_v53 = vld [vmem:[#allocation200_spill] sm:$0xff]  ;;  %v1474_v39 = vsel %vm1448_vm8, %v1441_v10, %v9652_v8  ;;  %v9660_v45 = vld [vmem:[#allocation127_spill] sm:$0xff]  ;;  %v1377_v10 = vsel %vm203_vm0, %v4184_v1, %v9672_v12  ;;  %v9675_v8 = vld [vmem:[#allocation150_spill] sm:$0xff] }
 0x350   : > { %v1506_v44 = vsel %vm1481_vm7, %v1473_v0, %v9640_v53  ;;  %v1526_v32 = vsel %vm1514_vm9, %v1493_v56, %v9641_v60  ;;  %v1396_v38 = vsel %vm1382_vm5, %v1363_v6, %v9660_v45  ;;  %v9662_v52 = vld [vmem:[#allocation44_spill] sm:$0xff]  ;;  %v9663_v53 = vld [vmem:[#allocation161_spill] sm:$0xff]  ;;  %v4185_v45 = vld [vmem:[#allocation2 + $0xb0] sm:$0xff] }
 0x351   : > { %v1539_v33 = vsel %vm1514_vm9, %v1506_v44, %v9642_v31  ;;  %v1559_v4 = vsel %vm1547_vm11, %v1526_v32, %v9643_v36  ;;  %v1429_v56 = vsel %vm1415_vm6, %v1396_v38, %v9662_v52  ;;  %v9664_v32 = vld [vmem:[#allocation90_spill] sm:$0xff]  ;;  %v9684_v38 = vld [vmem:[#allocation93_spill] sm:$0xff]  ;;  %v9685_v52 = vld [vmem:[#allocation112_spill] sm:$0xff] }
 0x352   : > { %v1572_v59 = vsel %vm1547_vm11, %v1539_v33, %v9644_v57  ;;  %v1592_v35 = vsel %vm1580_vm10, %v1559_v4, %v1277_v58  ;;  %v9657_v58 = vld [vmem:[#allocation154_spill] sm:$0xff]  ;;  %v1462_v31 = vsel %vm1448_vm8, %v1429_v56, %v9664_v32  ;;  %v9666_v4 = vld [vmem:[#allocation199_spill] sm:$0xff] }
 0x353   : > { %v1281_v25 = vpop.permute.xlu0 %1280  ;;  %v1283_v60 = vpop.permute.xlu2 %1282  ;;  %v9665_v33 = vld [vmem:[#allocation178_spill] sm:$0xff]  ;;  %v1495_v57 = vsel %vm1481_vm7, %v1462_v31, %v9666_v4  ;;  %v9688_v32 = vld [vmem:[#allocation155_spill] sm:$0xff] }
 0x354   : > { %v1528_v22 = vsel %vm1514_vm9, %v1495_v57, %v9668_v26  ;;  %v9690_v57 = vld [vmem:[#allocation177_spill] sm:$0xff] }
 0x355   : > { %v1303_v15 = vpop.permute.xlu1 %1302  ;;  %v1561_v2 = vsel %vm1547_vm11, %v1528_v22, %v9670_v23  ;;  %v9692_v26 = vld [vmem:[#allocation197_spill] sm:$0xff] }
 0x356   : > { %v1605_v47 = vsel %vm1580_vm10, %v1572_v59, %v1303_v15  ;;  %v9659_v15 = vld [vmem:[#allocation94_spill] sm:$0xff]  ;;  %v9667_v59 = vld [vmem:[#allocation208_spill] sm:$0xff]  ;;  %v1594_v42 = vsel %vm1580_vm10, %v1561_v2, %v1281_v25  ;;  %v9694_v2 = vld [vmem:[#allocation43_spill] sm:$0xff] }
 0x357   : > { %4065 = vmatmul.msk.f32.gmra.mxu0 %vm1618_vm12, %v1591_v16  ;;  %4078 = vmatmul.msk.f32.gmra.mxu2 %vm1618_vm12, %v1604_v51  ;;  %v1494_v16 = vsel %vm1481_vm7, %v1461_v49, %v9653_v50  ;;  %v9654_v51 = vld [vmem:[#allocation205_spill] sm:$0xff]  ;;  %v1376_v5 = vsel %vm203_vm0, %v4182_v34, %v9659_v15  ;;  %v1397_v49 = vsel %vm1382_vm5, %v1364_v19, %v9673_v61  ;;  %v9697_v61 = vld [vmem:[#allocation98_spill] sm:$0xff] }
 0x358   : > { %v1507_v20 = vsel %vm1481_vm7, %v1474_v39, %v9654_v51  ;;  %v1527_v7 = vsel %vm1514_vm9, %v1494_v16, %v9655_v63  ;;  %v1430_v39 = vsel %vm1415_vm6, %v1397_v49, %v9675_v8  ;;  %v9676_v50 = vld [vmem:[#allocation61_spill] sm:$0xff]  ;;  %v9677_v51 = vld [vmem:[#allocation168_spill] sm:$0xff]  ;;  %v9699_v8 = vld [vmem:[#allocation163_spill] sm:$0xff] }
 0x359   : > { %v1540_v55 = vsel %vm1514_vm9, %v1507_v20, %v9656_v14  ;;  %v1560_v46 = vsel %vm1547_vm11, %v1527_v7, %v9657_v58  ;;  %v1463_v20 = vsel %vm1448_vm8, %v1430_v39, %v9677_v51  ;;  %v9679_v7 = vld [vmem:[#allocation203_spill] sm:$0xff] }
 0x35a   : > { %v1573_v43 = vsel %vm1547_vm11, %v1540_v55, %v5977_v30  ;;  %v1593_v62 = vsel %vm1580_vm10, %v1560_v46, %v1279_v18  ;;  %v9661_v30 = vld [vmem:[#allocation21_spill] sm:$0xff]  ;;  %v1496_v14 = vsel %vm1481_vm7, %v1463_v20, %v9679_v7  ;;  %v9680_v55 = vld [vmem:[#allocation202_spill] sm:$0xff] }
 0x35b   : > { %v1409_v0 = vsel %vm1382_vm5, %v1376_v5, %v9661_v30  ;;  %v1309_v46 = vpop.permute.xlu2 %1308  ;;  %v1365_v30 = vsel %vm203_vm0, %v4185_v45, %v9684_v38  ;;  %v9708_v45 = vld [vmem:[#allocation67_spill] sm:$0xff] }
 0x35c   : > { %v1442_v44 = vsel %vm1415_vm6, %v1409_v0, %v9663_v53  ;;  %v4186_v0 = vld [vmem:[#allocation2 + $0x150] sm:$0xff]  ;;  %v9686_v53 = vld [vmem:[#allocation117_spill] sm:$0xff] }
 0x35d   : > { %v1305_v48 = vpop.permute.xlu1 %1304  ;;  %v1475_v36 = vsel %vm1448_vm8, %v1442_v44, %v9665_v33  ;;  %v1378_v56 = vsel %vm203_vm0, %v4186_v0, %v9685_v52  ;;  %v1398_v44 = vsel %vm1382_vm5, %v1365_v30, %v9686_v53  ;;  %v9689_v33 = vld [vmem:[#allocation153_spill] sm:$0xff]  ;;  %v9709_v53 = vld [vmem:[#allocation115_spill] sm:$0xff] }
 0x35e   : > { %v1606_v28 = vsel %vm1580_vm10, %v1573_v43, %v1305_v48  ;;  %v9678_v48 = vld [vmem:[#allocation191_spill] sm:$0xff]  ;;  %v1431_v31 = vsel %vm1415_vm6, %v1398_v44, %v9688_v32  ;;  %v9711_v32 = vld [vmem:[#allocation157_spill] sm:$0xff] }
 0x35f   : > { %4066 = vmatmul.msk.f32.gmra.mxu0 %vm1618_vm12, %v1592_v35  ;;  %4079 = vmatmul.msk.f32.gmra.mxu2 %vm1618_vm12, %v1605_v47  ;;  %v1508_v35 = vsel %vm1481_vm7, %v1475_v36, %v9667_v59  ;;  %v1307_v47 = vpop.permute.xlu0 %1306  ;;  %v9681_v43 = vld [vmem:[#allocation47_spill] sm:$0xff]  ;;  %v1464_v59 = vsel %vm1448_vm8, %v1431_v31, %v9690_v57 }
 0x360   : > { %v1541_v40 = vsel %vm1514_vm9, %v1508_v35, %v9669_v3  ;;  %v9691_v35 = vld [vmem:[#allocation194_spill] sm:$0xff]  ;;  %v1497_v22 = vsel %vm1481_vm7, %v1464_v59, %v9692_v26  ;;  %v9693_v3 = vld [vmem:[#allocation207_spill] sm:$0xff] }
 0x361   : > { %v1574_v18 = vsel %vm1547_vm11, %v1541_v40, %v5959_v13  ;;  %v9674_v13 = vld [vmem:[#allocation131_spill] sm:$0xff]  ;;  %v9714_v59 = vld [vmem:[#allocation46_spill] sm:$0xff] }
 0x362   : > { %v1607_v21 = vsel %vm1580_vm10, %v1574_v18, %v1307_v47  ;;  %v1410_v25 = vsel %vm1382_vm5, %v1377_v10, %v9674_v13  ;;  %v1530_v18 = vsel %vm1514_vm9, %v1497_v22, %v9694_v2  ;;  %v4187_v10 = vld [vmem:[#allocation2 + $0x158] sm:$0xff] }
 0x363   : > { %v1443_v16 = vsel %vm1415_vm6, %v1410_v25, %v9676_v50  ;;  %v1563_v54 = vsel %vm1547_vm11, %v1530_v18, %v9696_v41  ;;  %v1379_v49 = vsel %vm203_vm0, %v4187_v10, %v9697_v61  ;;  %v9698_v13 = vld [vmem:[#allocation24_spill] sm:$0xff] }
 0x364   : > { %v1476_v63 = vsel %vm1448_vm8, %v1443_v16, %v9678_v48  ;;  %v1412_v25 = vsel %vm1382_vm5, %v1379_v49, %v9698_v13  ;;  %v9700_v50 = vld [vmem:[#allocation180_spill] sm:$0xff]  ;;  %v9701_v16 = vld [vmem:[#allocation211_spill] sm:$0xff]  ;;  %v9702_v48 = vld [vmem:[#allocation58_spill] sm:$0xff] }
 0x365   : > { %v1509_v58 = vsel %vm1481_vm7, %v1476_v63, %v9680_v55  ;;  %v1285_v4 = vpop.permute.xlu1 %1284  ;;  %v1445_v39 = vsel %vm1415_vm6, %v1412_v25, %v9699_v8 }
 0x366   : > { %v1596_v1 = vsel %vm1580_vm10, %v1563_v54, %v1285_v4  ;;  %v9713_v4 = vld [vmem:[#allocation209_spill] sm:$0xff] }
 0x367   : > { %4067 = vmatmul.msk.f32.gmra.mxu0 %vm1618_vm12, %v1593_v62  ;;  %4080 = vmatmul.msk.f32.gmra.mxu2 %vm1618_vm12, %v1606_v28  ;;  %v1529_v62 = vsel %vm1514_vm9, %v1496_v14, %v9681_v43  ;;  %v9682_v28 = vld [vmem:[#allocation52_spill] sm:$0xff]  ;;  %v1311_v23 = vpop.permute.xlu0 %1310 }
 0x368   : > { %v1542_v37 = vsel %vm1514_vm9, %v1509_v58, %v9682_v28  ;;  %v1562_v6 = vsel %vm1547_vm11, %v1529_v62, %v9683_v17  ;;  %v4188_v58 = vld [vmem:[#allocation2 + $0x168] sm:$0xff] }
 0x369   : > { %v1575_v34 = vsel %vm1547_vm11, %v1542_v37, %v5984_v27  ;;  %v1595_v15 = vsel %vm1580_vm10, %v1562_v6, %v1283_v60  ;;  %v9687_v27 = vld [vmem:[#allocation142_spill] sm:$0xff]  ;;  %v9705_v37 = vld [vmem:[#allocation64_spill] sm:$0xff]  ;;  %v9706_v6 = vld [vmem:[#allocation193_spill] sm:$0xff] }
 0x36a   : > { %v1608_v5 = vsel %vm1580_vm10, %v1575_v34, %v1309_v46  ;;  %v1411_v60 = vsel %vm1382_vm5, %v1378_v56, %v9687_v27  ;;  %v9703_v46 = vld [vmem:[#allocation110_spill] sm:$0xff]  ;;  %v4189_v56 = vld [vmem:[#allocation2 + $0x170] sm:$0xff]  ;;  %v9710_v27 = vld [vmem:[#allocation25_spill] sm:$0xff] }
 0x36b   : > { %v1444_v36 = vsel %vm1415_vm6, %v1411_v60, %v9689_v33  ;;  %v1380_v43 = vsel %vm203_vm0, %v4188_v58, %v9703_v46  ;;  %v9704_v62 = vld [vmem:[#allocation134_spill] sm:$0xff]  ;;  %v1381_v44 = vsel %vm203_vm0, %v4189_v56, %v9709_v53  ;;  %v9712_v33 = vld [vmem:[#allocation196_spill] sm:$0xff] }
 0x36c   : > { %v1477_v47 = vsel %vm1448_vm8, %v1444_v36, %v9691_v35  ;;  %v1413_v28 = vsel %vm1382_vm5, %v1380_v43, %v9704_v62  ;;  %v1414_v60 = vsel %vm1382_vm5, %v1381_v44, %v9710_v27 }
 0x36d   : > { %v1510_v40 = vsel %vm1481_vm7, %v1477_v47, %v9693_v3  ;;  %v1313_v20 = vpop.permute.xlu1 %1312  ;;  %v1446_v17 = vsel %vm1415_vm6, %v1413_v28, %v9705_v37  ;;  %v1447_v31 = vsel %vm1415_vm6, %v1414_v60, %v9711_v32 }
 0x36e   : > { %v1479_v34 = vsel %vm1448_vm8, %v1446_v17, %v9706_v6  ;;  %v1480_v36 = vsel %vm1448_vm8, %v1447_v31, %v9712_v33 }
 0x36f   : > { %4068 = vmatmul.msk.f32.gmra.mxu0 %vm1618_vm12, %v1594_v42  ;;  %4081 = vmatmul.msk.f32.gmra.mxu2 %vm1618_vm12, %v1607_v21  ;;  %v9695_v42 = vld [vmem:[#allocation53_spill] sm:$0xff]  ;;  %v1317_v57 = vpop.permute.xlu0 %1316 }
 0x370   : > { %v1543_v21 = vsel %vm1514_vm9, %v1510_v40, %v9695_v42 }
 0x371   : > { %v1576_v19 = vsel %vm1547_vm11, %v1543_v21, %v6077_v24  ;;  %v1478_v24 = vsel %vm1448_vm8, %v1445_v39, %v9700_v50 }
 0x372   : > { %v1609_v12 = vsel %vm1580_vm10, %v1576_v19, %v1311_v23  ;;  %v1511_v51 = vsel %vm1481_vm7, %v1478_v24, %v9701_v16 }
 0x373   : > { %v1544_v63 = vsel %vm1514_vm9, %v1511_v51, %v9702_v48 }
 0x374   : > { %v1577_v14 = vsel %vm1547_vm11, %v1544_v63, %v6112_v11 }
 0x375   : > { %v1610_v55 = vsel %vm1580_vm10, %v1577_v14, %v1313_v20 }
 0x377   : > { %4069 = vmatmul.msk.f32.gmra.mxu0 %vm1618_vm12, %v1595_v15  ;;  %4082 = vmatmul.msk.f32.gmra.mxu2 %vm1618_vm12, %v1608_v5  ;;  %v9707_v15 = vld [vmem:[#allocation204_spill] sm:$0xff]  ;;  %v1315_v5 = vpop.permute.xlu2 %1314 }
 0x378   : > { %v1512_v11 = vsel %vm1481_vm7, %v1479_v34, %v9707_v15 }
 0x379   : > { %v1545_v38 = vsel %vm1514_vm9, %v1512_v11, %v9708_v45 }
 0x37a   : > { %v1578_v0 = vsel %vm1547_vm11, %v1545_v38, %v6172_v9  ;;  %v1513_v9 = vsel %vm1481_vm7, %v1480_v36, %v9713_v4 }
 0x37b   : > { %v1611_v52 = vsel %vm1580_vm10, %v1578_v0, %v1315_v5  ;;  %v1546_v35 = vsel %vm1514_vm9, %v1513_v9, %v9714_v59 }
 0x37c   : > { %v1579_v26 = vsel %vm1547_vm11, %v1546_v35, %v6215_v29 }
 0x37d   : > { %v1612_v22 = vsel %vm1580_vm10, %v1579_v26, %v1317_v57 }
 0x37f   : > { %4070 = vmatmul.msk.f32.gmra.mxu0 %vm1618_vm12, %v1596_v1  ;;  %4083 = vmatmul.msk.f32.gmra.mxu2 %vm1618_vm12, %v1609_v12 }
 0x384   : > { %v6425_v7 = vpop.f32.mrf.mxu0 }
 0x385   : > { %v1832_v8 = vsel %vm203_vm0, %v6425_v7, 0.0 }
 0x387   : > { %4084 = vmatmul.msk.f32.gmra.mxu2 %vm1618_vm12, %v1610_v55 }
 0x38c   : > { %v6443_v30 = vpop.f32.mrf.mxu0 }
 0x38d   : > { %v1833_v25 = vsel %vm203_vm0, %v6443_v30, 0.0 }
 0x38e   : > { %v1834_v50 = vadd.f32 %v1833_v25, %v1832_v8 }
 0x38f   : > { %4085 = vmatmul.msk.f32.gmra.mxu2 %vm1618_vm12, %v1611_v52 }
 0x394   : > { %v6461_v47 = vpop.f32.mrf.mxu0 }
 0x395   : > { %v1835_v39 = vsel %vm203_vm0, %v6461_v47, 0.0 }
 0x396   : > { %v1836_v51 = vadd.f32 %v1835_v39, %v1834_v50 }
 0x397   : > { %4086 = vmatmul.msk.f32.gmra.mxu2 %vm1618_vm12, %v1612_v22 }
 0x39c   : > { %v6467_v3 = vpop.f32.mrf.mxu0 }
 0x39d   : > { %v1837_v16 = vsel %vm203_vm0, %v6467_v3, 0.0 }
 0x39e   : > { %v1838_v63 = vadd.f32 %v1837_v16, %v1836_v51 }
 0x3a2   : > { %v6469_v40 = vpop.f32.mrf.mxu2 }
 0x3a3   : > { %v1863_v57 = vsel %vm203_vm0, %v6469_v40, 0.0 }
 0x3a4   : > { %v6471_v23 = vpop.f32.mrf.mxu0 }
 0x3a5   : > { %v1839_v48 = vsel %vm203_vm0, %v6471_v23, 0.0 }
 0x3a6   : > { %v1840_v55 = vadd.f32 %v1839_v48, %v1838_v63 }
 0x3aa   : > { %v6473_v2 = vpop.f32.mrf.mxu2 }
 0x3ab   : > { %v1865_v35 = vsel %vm203_vm0, %v6473_v2, 0.0 }
 0x3ac   : > { %v6475_v18 = vpop.f32.mrf.mxu0 }
 0x3ad   : > { %v1841_v14 = vsel %vm203_vm0, %v6475_v18, 0.0 }
 0x3ae   : > { %v1842_v46 = vadd.f32 %v1841_v14, %v1840_v55 }
 0x3b2   : > { %v6477_v42 = vpop.f32.mrf.mxu2 }
 0x3b3   : > { %v1867_v25 = vsel %vm203_vm0, %v6477_v42, 0.0 }
 0x3b4   : > { %v6479_v21 = vpop.f32.mrf.mxu0 }
 0x3b5   : > { %v1843_v58 = vsel %vm203_vm0, %v6479_v21, 0.0 }
 0x3b6   : > { %v1844_v28 = vadd.f32 %v1843_v58, %v1842_v46 }
 0x3ba   : > { %v6481_v41 = vpop.f32.mrf.mxu2 }
 0x3bb   : > { %v1869_v39 = vsel %vm203_vm0, %v6481_v41, 0.0 }
 0x3bc   : > { %v6483_v29 = vpop.f32.mrf.mxu0 }
 0x3bd   : > { %v1845_v62 = vsel %vm203_vm0, %v6483_v29, 0.0 }
 0x3be   : > { %v1846_v6 = vadd.f32 %v1845_v62, %v1844_v28 }
 0x3c2   : > { %v6485_v54 = vpop.f32.mrf.mxu2 }
 0x3c3   : > { %v1871_v16 = vsel %vm203_vm0, %v6485_v54, 0.0 }
 0x3c4   : > { %v6487_v19 = vpop.f32.mrf.mxu0 }
 0x3c5   : > { %v1847_v17 = vsel %vm203_vm0, %v6487_v19, 0.0 }
 0x3c6   : > { %v1848_v15 = vadd.f32 %v1847_v17, %v1846_v6 }
 0x3ca   : > { %v6489_v1 = vpop.f32.mrf.mxu2 }
 0x3cb   : > { %v1873_v48 = vsel %vm203_vm0, %v6489_v1, 0.0 }
 0x3cc   : > { %v6491_v12 = vpop.f32.mrf.mxu0 }
 0x3cd   : > { %v1849_v34 = vsel %vm203_vm0, %v6491_v12, 0.0 }
 0x3ce   : > { %v1850_v5 = vadd.f32 %v1849_v34, %v1848_v15 }
 0x3d2   : > { %v6493_v10 = vpop.f32.mrf.mxu2 }
 0x3d3   : > { %v1875_v55 = vsel %vm203_vm0, %v6493_v10, 0.0 }
 0x3d4   : > { %v6495_v61 = vpop.f32.mrf.mxu0 }
 0x3d5   : > { %v1851_v11 = vsel %vm203_vm0, %v6495_v61, 0.0 }
 0x3d6   : > { %v1852_v0 = vadd.f32 %v1851_v11, %v1850_v5 }
 0x3da   : > { %v6497_v49 = vpop.f32.mrf.mxu2 }
 0x3db   : > { %v1877_v46 = vsel %vm203_vm0, %v6497_v49, 0.0 }
 0x3dc   : > { %v6499_v13 = vpop.f32.mrf.mxu0 }
 0x3dd   : > { %v1853_v38 = vsel %vm203_vm0, %v6499_v13, 0.0 }
 0x3de   : > { %v1854_v53 = vadd.f32 %v1853_v38, %v1852_v0 }
 0x3e2   : > { %v6507_v24 = vpop.f32.mrf.mxu2 }
 0x3e3   : > { %v1879_v28 = vsel %vm203_vm0, %v6507_v24, 0.0 }
 0x3e4   : > { %v6511_v20 = vpop.f32.mrf.mxu0 }
 0x3e5   : > { %v1855_v56 = vsel %vm203_vm0, %v6511_v20, 0.0 }
 0x3e6   : > { %v1856_v27 = vadd.f32 %v1855_v56, %v1854_v53  ;;  %v4239_v56 = vmov 256.0  }
 0x3e7   : > { %4152 = vrcp.f32 %v4239_v56 }
 0x3ea   : > { %v6519_v43 = vpop.f32.mrf.mxu2 }
 0x3eb   : > { %v1881_v6 = vsel %vm203_vm0, %v6519_v43, 0.0 }
 0x3ec   : > { %v6523_v37 = vpop.f32.mrf.mxu0 }
 0x3ed   : > { %v1857_v44 = vsel %vm203_vm0, %v6523_v37, 0.0 }
 0x3ee   : > { %v1858_v32 = vadd.f32 %v1857_v44, %v1856_v27 }
 0x3f2   : > { %v6531_v45 = vpop.f32.mrf.mxu2 }
 0x3f3   : > { %v1883_v11 = vsel %vm203_vm0, %v6531_v45, 0.0 }
 0x3f4   : > { %v6535_v52 = vpop.f32.mrf.mxu0 }
 0x3f5   : > { %v1859_v60 = vsel %vm203_vm0, %v6535_v52, 0.0 }
 0x3f6   : > { %v1860_v33 = vadd.f32 %v1859_v60, %v1858_v32 }
 0x3fa   : > { %v6543_v31 = vpop.f32.mrf.mxu2 }
 0x3fb   : > { %v1885_v38 = vsel %vm203_vm0, %v6543_v31, 0.0 }
 0x3fc   : > { %v6545_v36 = vpop.f32.mrf.mxu0 }
 0x3fd   : > { %v1861_v4 = vsel %vm203_vm0, %v6545_v36, 0.0 }
 0x3fe   : > { %v1862_v9 = vadd.f32 %v1861_v4, %v1860_v33  ;;  %v4153_v4 = vpop.eup %4152 }
 0x3ff   : > { %vm1906_vm13 = vweird.f32 %v4153_v4 }
 0x400   : > { %v1864_v59 = vadd.f32 %v1863_v57, %v1862_v9 }
 0x402   : > { %v1866_v26 = vadd.f32 %v1865_v35, %v1864_v59  ;;  %v6553_v22 = vpop.f32.mrf.mxu2  ;;  %v1902_v35 = vmul.f32 256.0, %v4153_v4 }
 0x403   : > { %v1887_v53 = vsel %vm203_vm0, %v6553_v22, 0.0 }
 0x404   : > { %v1868_v8 = vadd.f32 %v1867_v25, %v1866_v26 }
 0x406   : > { %v1870_v50 = vadd.f32 %v1869_v39, %v1868_v8  ;;  %v1903_v8 = vsub.f32 1.0, %v1902_v35 }
 0x408   : > { %v1872_v51 = vadd.f32 %v1871_v16, %v1870_v50  ;;  %v1904_v16 = vmul.f32 %v4153_v4, %v1903_v8 }
 0x40a   : > { %v1874_v63 = vadd.f32 %v1873_v48, %v1872_v51  ;;  %v6563_v14 = vpop.f32.mrf.mxu2  ;;  %v1905_v48 = vadd.f32 %v4153_v4, %v1904_v16 }
 0x40b   : > { %v1889_v27 = vsel %vm203_vm0, %v6563_v14, 0.0 }
 0x40c   : > { %v1876_v58 = vadd.f32 %v1875_v55, %v1874_v63  ;;  %v6589_v55 = vsel %vm1906_vm13, %v4153_v4, %v1905_v48 }
 0x40d   : > { %9715 = vst [vmem:[#allocation74_spill] sm:$0xff] %v6589_v55 }
 0x40e   : > { %v1878_v62 = vadd.f32 %v1877_v46, %v1876_v58 }
 0x410   : > { %v1880_v17 = vadd.f32 %v1879_v28, %v1878_v62 }
 0x412   : > { %v1882_v34 = vadd.f32 %v1881_v6, %v1880_v17  ;;  %v6573_v15 = vpop.f32.mrf.mxu2 }
 0x413   : > { %v1891_v33 = vsel %vm203_vm0, %v6573_v15, 0.0 }
 0x414   : > { %v1884_v5 = vadd.f32 %v1883_v11, %v1882_v34 }
 0x416   : > { %v1886_v0 = vadd.f32 %v1885_v38, %v1884_v5 }
 0x418   : > { %v1888_v44 = vadd.f32 %v1887_v53, %v1886_v0 }
 0x41a   : > { %v1890_v60 = vadd.f32 %v1889_v27, %v1888_v44  ;;  %v6583_v32 = vpop.f32.mrf.mxu2 }
 0x41b   : > { %v1893_v57 = vsel %vm203_vm0, %v6583_v32, 0.0 }
 0x41c   : > { %v1892_v9 = vadd.f32 %v1891_v33, %v1890_v60 }
 0x41e   : > { %v1894_v59 = vadd.f32 %v1893_v57, %v1892_v9 }
 0x420   : > { %v1895_v26 = vrot.slane %v1894_v59, 4 }
 0x422   : > { %v1896_v25 = vadd.f32 %v1895_v26, %v1894_v59 }
 0x424   : > { %v1897_v39 = vrot.slane %v1896_v25, 2 }
 0x426   : > { %v1898_v50 = vadd.f32 %v1897_v39, %v1896_v25 }
 0x428   : > { %v1899_v51 = vrot.slane %v1898_v50, 1 }
 0x42a   : > { %v1900_v63 = vadd.f32 %v1899_v51, %v1898_v50 }
 0x42c   : > { %v6592_v58 = vmul.f32 %v6589_v55, %v1900_v63 }
 0x42e   : > { %v6596_v46 = vsub.f32 %v6425_v7, %v6592_v58  ;;  %v6600_v62 = vsub.f32 %v6443_v30, %v6592_v58  ;;  %v6604_v28 = vsub.f32 %v6461_v47, %v6592_v58  ;;  %v6608_v17 = vsub.f32 %v6467_v3, %v6592_v58 }
 0x42f   : > { %v6616_v7 = vsub.f32 %v6471_v23, %v6592_v58  ;;  %v6622_v47 = vsub.f32 %v6475_v18, %v6592_v58  ;;  %v6630_v0 = vsub.f32 %v6479_v21, %v6592_v58  ;;  %v6637_v18 = vsub.f32 %v6483_v29, %v6592_v58 }
 0x430   : > { %v1941_v6 = vmul.f32 %v6596_v46, %v6596_v46  ;;  %v1942_v34 = vmul.f32 %v6600_v62, %v6600_v62  ;;  %v1943_v30 = vmul.f32 %v6604_v28, %v6604_v28  ;;  %v1944_v3 = vmul.f32 %v6608_v17, %v6608_v17 }
 0x431   : > { %v1945_v23 = vmul.f32 %v6616_v7, %v6616_v7  ;;  %v1946_v44 = vmul.f32 %v6622_v47, %v6622_v47  ;;  %v6644_v21 = vsub.f32 %v6487_v19, %v6592_v58  ;;  %v1947_v33 = vmul.f32 %v6630_v0, %v6630_v0 }
 0x432   : > { %v1973_v11 = vsel %vm203_vm0, %v1941_v6, 0.0  ;;  %v1974_v5 = vsel %vm203_vm0, %v1942_v34, 0.0  ;;  %v1976_v56 = vsel %vm203_vm0, %v1943_v30, 0.0  ;;  %v1978_v27 = vsel %vm203_vm0, %v1944_v3, 0.0 }
 0x433   : > { %v1975_v38 = vadd.f32 %v1974_v5, %v1973_v11  ;;  %v1980_v4 = vsel %vm203_vm0, %v1945_v23, 0.0  ;;  %v6651_v29 = vsub.f32 %v6491_v12, %v6592_v58  ;;  %v1948_v57 = vmul.f32 %v6637_v18, %v6637_v18 }
 0x434   : > { %v1982_v59 = vsel %vm203_vm0, %v1946_v44, 0.0  ;;  %v6658_v19 = vsub.f32 %v6495_v61, %v6592_v58  ;;  %v1949_v26 = vmul.f32 %v6644_v21, %v6644_v21  ;;  %v1984_v25 = vsel %vm203_vm0, %v1947_v33, 0.0 }
 0x435   : > { %v1977_v53 = vadd.f32 %v1976_v56, %v1975_v38  ;;  %v6665_v12 = vsub.f32 %v6499_v13, %v6592_v58  ;;  %v1950_v39 = vmul.f32 %v6651_v29, %v6651_v29  ;;  %v1986_v50 = vsel %vm203_vm0, %v1948_v57, 0.0 }
 0x436   : > { %v6672_v61 = vsub.f32 %v6511_v20, %v6592_v58  ;;  %v1951_v51 = vmul.f32 %v6658_v19, %v6658_v19  ;;  %v1988_v48 = vsel %vm203_vm0, %v1949_v26, 0.0  ;;  %v6679_v13 = vsub.f32 %v6523_v37, %v6592_v58 }
 0x437   : > { %v1979_v60 = vadd.f32 %v1978_v27, %v1977_v53  ;;  %v1952_v6 = vmul.f32 %v6665_v12, %v6665_v12  ;;  %v1990_v34 = vsel %vm203_vm0, %v1950_v39, 0.0  ;;  %v6686_v20 = vsub.f32 %v6535_v52, %v6592_v58 }
 0x438   : > { %v1953_v3 = vmul.f32 %v6672_v61, %v6672_v61  ;;  %v1992_v11 = vsel %vm203_vm0, %v1951_v51, 0.0  ;;  %v6693_v37 = vsub.f32 %v6545_v36, %v6592_v58  ;;  %v1954_v38 = vmul.f32 %v6679_v13, %v6679_v13 }
 0x439   : > { %v1981_v9 = vadd.f32 %v1980_v4, %v1979_v60  ;;  %v1994_v23 = vsel %vm203_vm0, %v1952_v6, 0.0  ;;  %v6700_v52 = vsub.f32 %v6469_v40, %v6592_v58  ;;  %v1955_v53 = vmul.f32 %v6686_v20, %v6686_v20 }
 0x43a   : > { %v1996_v44 = vsel %vm203_vm0, %v1953_v3, 0.0  ;;  %v6707_v36 = vsub.f32 %v6473_v2, %v6592_v58  ;;  %v1956_v60 = vmul.f32 %v6693_v37, %v6693_v37  ;;  %v1998_v33 = vsel %vm203_vm0, %v1954_v38, 0.0 }
 0x43b   : > { %v1983_v35 = vadd.f32 %v1982_v59, %v1981_v9  ;;  %v6714_v40 = vsub.f32 %v6477_v42, %v6592_v58  ;;  %v1957_v9 = vmul.f32 %v6700_v52, %v6700_v52  ;;  %v2000_v57 = vsel %vm203_vm0, %v1955_v53, 0.0 }
 0x43c   : > { %v6721_v2 = vsub.f32 %v6481_v41, %v6592_v58  ;;  %v2002_v26 = vsel %vm203_vm0, %v1956_v60, 0.0  ;;  %v6728_v42 = vsub.f32 %v6485_v54, %v6592_v58  ;;  %v6735_v41 = vsub.f32 %v6489_v1, %v6592_v58 }
 0x43d   : > { %v1985_v8 = vadd.f32 %v1984_v25, %v1983_v35  ;;  %v1958_v35 = vmul.f32 %v6707_v36, %v6707_v36  ;;  %v2004_v39 = vsel %vm203_vm0, %v1957_v9, 0.0  ;;  %v6742_v54 = vsub.f32 %v6493_v10, %v6592_v58 }
 0x43e   : > { %v6749_v1 = vsub.f32 %v6497_v49, %v6592_v58  ;;  %v6756_v10 = vsub.f32 %v6507_v24, %v6592_v58  ;;  %v6763_v49 = vsub.f32 %v6519_v43, %v6592_v58  ;;  %v6770_v24 = vsub.f32 %v6531_v45, %v6592_v58 }
 0x43f   : > { %v1987_v16 = vadd.f32 %v1986_v50, %v1985_v8  ;;  %v1959_v8 = vmul.f32 %v6714_v40, %v6714_v40  ;;  %v2006_v51 = vsel %vm203_vm0, %v1958_v35, 0.0  ;;  %v6777_v43 = vsub.f32 %v6543_v31, %v6592_v58 }
 0x440   : > { %v6784_v45 = vsub.f32 %v6553_v22, %v6592_v58  ;;  %v6791_v31 = vsub.f32 %v6563_v14, %v6592_v58  ;;  %v6798_v22 = vsub.f32 %v6573_v15, %v6592_v58  ;;  %v1940_v14 = vsub.f32 %v6583_v32, %v6592_v58 }
 0x441   : > { %v1989_v63 = vadd.f32 %v1988_v48, %v1987_v16  ;;  %v1960_v16 = vmul.f32 %v6721_v2, %v6721_v2  ;;  %v2008_v6 = vsel %vm203_vm0, %v1959_v8, 0.0 }
 0x443   : > { %v1991_v30 = vadd.f32 %v1990_v34, %v1989_v63  ;;  %v1961_v63 = vmul.f32 %v6728_v42, %v6728_v42  ;;  %v2010_v3 = vsel %vm203_vm0, %v1960_v16, 0.0 }
 0x445   : > { %v1993_v5 = vadd.f32 %v1992_v11, %v1991_v30  ;;  %v1962_v30 = vmul.f32 %v6735_v41, %v6735_v41  ;;  %v2012_v38 = vsel %vm203_vm0, %v1961_v63, 0.0 }
 0x447   : > { %v1995_v56 = vadd.f32 %v1994_v23, %v1993_v5  ;;  %v1963_v5 = vmul.f32 %v6742_v54, %v6742_v54  ;;  %v2014_v53 = vsel %vm203_vm0, %v1962_v30, 0.0 }
 0x449   : > { %v1997_v27 = vadd.f32 %v1996_v44, %v1995_v56  ;;  %v1964_v56 = vmul.f32 %v6749_v1, %v6749_v1  ;;  %v2016_v60 = vsel %vm203_vm0, %v1963_v5, 0.0 }
 0x44b   : > { %v1999_v4 = vadd.f32 %v1998_v33, %v1997_v27  ;;  %v1965_v27 = vmul.f32 %v6756_v10, %v6756_v10  ;;  %v2018_v9 = vsel %vm203_vm0, %v1964_v56, 0.0 }
 0x44d   : > { %v2001_v59 = vadd.f32 %v2000_v57, %v1999_v4  ;;  %v1966_v4 = vmul.f32 %v6763_v49, %v6763_v49  ;;  %v2020_v35 = vsel %vm203_vm0, %v1965_v27, 0.0 }
 0x44f   : > { %v2003_v25 = vadd.f32 %v2002_v26, %v2001_v59  ;;  %v1967_v59 = vmul.f32 %v6770_v24, %v6770_v24  ;;  %v2022_v8 = vsel %vm203_vm0, %v1966_v4, 0.0  ;;  %v6814_v4 = vld [vmem:[#allocation2 + $0x8] sm:$0xff] }
 0x451   : > { %v2005_v50 = vadd.f32 %v2004_v39, %v2003_v25  ;;  %v1968_v25 = vmul.f32 %v6777_v43, %v6777_v43  ;;  %v2024_v16 = vsel %vm203_vm0, %v1967_v59, 0.0 }
 0x453   : > { %v2007_v48 = vadd.f32 %v2006_v51, %v2005_v50  ;;  %v1969_v50 = vmul.f32 %v6784_v45, %v6784_v45  ;;  %v2026_v63 = vsel %vm203_vm0, %v1968_v25, 0.0 }
 0x455   : > { %v2009_v34 = vadd.f32 %v2008_v6, %v2007_v48  ;;  %v1970_v48 = vmul.f32 %v6791_v31, %v6791_v31  ;;  %v2028_v15 = vsel %vm203_vm0, %v1969_v50, 0.0 }
 0x457   : > { %v2011_v11 = vadd.f32 %v2010_v3, %v2009_v34  ;;  %v1971_v34 = vmul.f32 %v6798_v22, %v6798_v22  ;;  %v1972_v3 = vmul.f32 %v1940_v14, %v1940_v14 }
 0x459   : > { %v2013_v23 = vadd.f32 %v2012_v38, %v2011_v11  ;;  %v2030_v11 = vsel %vm203_vm0, %v1970_v48, 0.0  ;;  %v2032_v38 = vsel %vm203_vm0, %v1971_v34, 0.0  ;;  %v2034_v32 = vsel %vm203_vm0, %v1972_v3, 0.0 }
 0x45b   : > { %v2015_v44 = vadd.f32 %v2014_v53, %v2013_v23 }
 0x45d   : > { %v2017_v33 = vadd.f32 %v2016_v60, %v2015_v44 }
 0x45f   : > { %v2019_v57 = vadd.f32 %v2018_v9, %v2017_v33  ;;  %v6816_v9 = vld [vmem:[#allocation2 + $0x10] sm:$0x3] }
 0x460   : > { %v2255_v59 = vrot.slane %v6816_v9, 1 }
 0x461   : > { %v2021_v26 = vadd.f32 %v2020_v35, %v2019_v57  ;;  %v2253_v57 = vrot.slane %v6814_v4, 1 }
 0x463   : > { %v2023_v39 = vadd.f32 %v2022_v8, %v2021_v26  ;;  %v2256_v26 = vsel %vm394_vm1, %v2253_v57, %v2255_v59  ;;  %v6823_v8 = vld [vmem:[#allocation2] sm:$0xff] }
 0x464   : > { %2440 = vrot.lane.b32.xlu2 %v2256_v26, %s4231_s14 }
 0x465   : > { %v2025_v51 = vadd.f32 %v2024_v16, %v2023_v39  ;;  %v2252_v39 = vrot.slane %v6823_v8, 1 }
 0x467   : > { %v2027_v6 = vadd.f32 %v2026_v63, %v2025_v51  ;;  %v2254_v50 = vsel %vm394_vm1, %v2252_v39, %v2253_v57 }
 0x468   : > { %2438 = vrot.lane.b32.xlu1 %v2254_v50, %s4231_s14 }
 0x469   : > { %v2029_v30 = vadd.f32 %v2028_v15, %v2027_v6 }
 0x46b   : > { %v2031_v5 = vadd.f32 %v2030_v11, %v2029_v30 }
 0x46d   : > { %v2033_v23 = vadd.f32 %v2032_v38, %v2031_v5 }
 0x46f   : > { %v2035_v58 = vadd.f32 %v2034_v32, %v2033_v23 }
 0x471   : > { %v2036_v56 = vrot.slane %v2035_v58, 4 }
 0x473   : > { %v2037_v53 = vadd.f32 %v2036_v56, %v2035_v58 }
 0x475   : > { %v2038_v44 = vrot.slane %v2037_v53, 2 }
 0x477   : > { %v2039_v27 = vadd.f32 %v2038_v44, %v2037_v53 }
 0x479   : > { %v2040_v60 = vrot.slane %v2039_v27, 1 }
 0x47b   : > { %v2041_v33 = vadd.f32 %v2040_v60, %v2039_v27 }
 0x47d   : > { %v2042_v35 = vmul.f32 %v2041_v33, %v6589_v55 }
 0x47f   : > { %v2043_v25 = vadd.f32 1e-05, %v2042_v35 }
 0x481   : > { %4154 = vrsqrt.f32 %v2043_v25  ;;  %vm2050_vm15 = vweird.f32 %v2043_v25 }
 0x487   : > { %v4155_v16 = vpop.eup %4154 }
 0x488   : > { %v2045_v51 = vmul.f32 %v4155_v16, %v2043_v25  ;;  %vm2051_vm14 = vweird.f32 %v4155_v16 }
 0x489   : > { %vm2052_vm2 = vmor %vm2050_vm15, %vm2051_vm14 }
 0x48a   : > { %v2046_v48 = vmul.f32 %v4155_v16, %v2045_v51 }
 0x48c   : > { %v2047_v63 = vmul.f32 0.5, %v2046_v48 }
 0x48e   : > { %v2048_v6 = vsub.f32 1.5, %v2047_v63 }
 0x490   : > { %v2049_v34 = vmul.f32 %v4155_v16, %v2048_v6 }
 0x492   : > { %v6828_v15 = vsel %vm2052_vm2, %v4155_v16, %v2049_v34 }
 0x493   : > { %v2085_v30 = vmul.f32 %v6828_v15, %v1940_v14  ;;  %v2054_v11 = vmul.f32 %v6828_v15, %v6596_v46  ;;  %v2055_v5 = vmul.f32 %v6828_v15, %v6600_v62  ;;  %v2056_v38 = vmul.f32 %v6828_v15, %v6604_v28 }
 0x494   : > { %v2057_v23 = vmul.f32 %v6828_v15, %v6608_v17  ;;  %v2058_v32 = vmul.f32 %v6828_v15, %v6616_v7  ;;  %v2059_v14 = vmul.f32 %v6828_v15, %v6622_v47  ;;  %v2060_v58 = vmul.f32 %v6828_v15, %v6630_v0 }
 0x495   : > { %v2117_v3 = vmax.f32 %v2085_v30, 0.0  ;;  %v2086_v56 = vmax.f32 %v2054_v11, 0.0  ;;  %v2087_v46 = vmax.f32 %v2055_v5, 0.0  ;;  %v2088_v53 = vmax.f32 %v2056_v38, 0.0 }
 0x496   : > { %v2061_v62 = vmul.f32 %v6828_v15, %v6637_v18  ;;  %v2089_v44 = vmax.f32 %v2057_v23, 0.0  ;;  %v2062_v28 = vmul.f32 %v6828_v15, %v6644_v21  ;;  %v2090_v17 = vmax.f32 %v2058_v32, 0.0 }
 0x497   : > { %2149 = vst.msk [vmem:[#allocation2 + $0x189] sm:$0xff] %vm203_vm0, %v2117_v3  ;;  %v2063_v7 = vmul.f32 %v6828_v15, %v6651_v29  ;;  %v2091_v47 = vmax.f32 %v2059_v14, 0.0  ;;  %v2064_v0 = vmul.f32 %v6828_v15, %v6658_v19  ;;  %v2092_v27 = vmax.f32 %v2060_v58, 0.0 }
 0x498   : > { %2118 = vst.msk [vmem:[#allocation2 + $0x19] sm:$0xff] %vm203_vm0, %v2086_v56  ;;  %v2065_v18 = vmul.f32 %v6828_v15, %v6665_v12  ;;  %v2093_v60 = vmax.f32 %v2061_v62, 0.0  ;;  %v2066_v21 = vmul.f32 %v6828_v15, %v6672_v61  ;;  %v2094_v33 = vmax.f32 %v2062_v28, 0.0 }
 0x499   : > { %2119 = vst.msk [vmem:[#allocation2 + $0x21] sm:$0xff] %vm203_vm0, %v2087_v46  ;;  %v2067_v29 = vmul.f32 %v6828_v15, %v6679_v13  ;;  %v2095_v57 = vmax.f32 %v2063_v7, 0.0  ;;  %v2068_v19 = vmul.f32 %v6828_v15, %v6686_v20  ;;  %v2096_v59 = vmax.f32 %v2064_v0, 0.0 }
 0x49a   : > { %2120 = vst.msk [vmem:[#allocation2 + $0x31] sm:$0xff] %vm203_vm0, %v2088_v53  ;;  %v2069_v12 = vmul.f32 %v6828_v15, %v6693_v37  ;;  %v2097_v35 = vmax.f32 %v2065_v18, 0.0  ;;  %v2070_v13 = vmul.f32 %v6828_v15, %v6700_v52  ;;  %v2098_v26 = vmax.f32 %v2066_v21, 0.0 }
 0x49b   : > { %2121 = vst.msk [vmem:[#allocation2 + $0x39] sm:$0xff] %vm203_vm0, %v2089_v44  ;;  %v2071_v37 = vmul.f32 %v6828_v15, %v6707_v36  ;;  %v2099_v50 = vmax.f32 %v2067_v29, 0.0  ;;  %v2072_v48 = vmul.f32 %v6828_v15, %v6714_v40  ;;  %v2073_v63 = vmul.f32 %v6828_v15, %v6721_v2 }
 0x49c   : > { %2122 = vst.msk [vmem:[#allocation2 + $0x49] sm:$0xff] %vm203_vm0, %v2090_v17  ;;  %v2100_v6 = vmax.f32 %v2068_v19, 0.0  ;;  %v2101_v30 = vmax.f32 %v2069_v12, 0.0  ;;  %v2074_v2 = vmul.f32 %v6828_v15, %v6728_v42  ;;  %v2102_v5 = vmax.f32 %v2070_v13, 0.0 }
 0x49d   : > { %2123 = vst.msk [vmem:[#allocation2 + $0x51] sm:$0xff] %vm203_vm0, %v2091_v47  ;;  %v2075_v14 = vmul.f32 %v6828_v15, %v6735_v41  ;;  %v2103_v58 = vmax.f32 %v2071_v37, 0.0  ;;  %v2076_v56 = vmul.f32 %v6828_v15, %v6742_v54  ;;  %v2077_v46 = vmul.f32 %v6828_v15, %v6749_v1 }
 0x49e   : > { %2124 = vst.msk [vmem:[#allocation2 + $0x61] sm:$0xff] %vm203_vm0, %v2092_v27  ;;  %v2104_v53 = vmax.f32 %v2072_v48, 0.0  ;;  %v2105_v41 = vmax.f32 %v2073_v63, 0.0  ;;  %v2078_v1 = vmul.f32 %v6828_v15, %v6756_v10  ;;  %v2106_v17 = vmax.f32 %v2074_v2, 0.0 }
 0x49f   : > { %2125 = vst.msk [vmem:[#allocation2 + $0x69] sm:$0xff] %vm203_vm0, %v2093_v60  ;;  %v6872_v61 = vld [vmem:[#allocation2 + $0x18] sm:$0xff]  ;;  %v2079_v7 = vmul.f32 %v6828_v15, %v6763_v49  ;;  %v2107_v47 = vmax.f32 %v2075_v14, 0.0  ;;  %v2080_v27 = vmul.f32 %v6828_v15, %v6770_v24  ;;  %v2108_v18 = vmax.f32 %v2076_v56, 0.0 }
 0x4a0   : > { %2126 = vst.msk [vmem:[#allocation2 + $0x79] sm:$0xff] %vm203_vm0, %v2094_v33  ;;  %v6877_v25 = vld [vmem:[#allocation2 + $0x20] sm:$0xff]  ;;  %v6879_v20 = vld [vmem:[#allocation2 + $0x28] sm:$0x3]  ;;  %v2257_v39 = vrot.slane %v6872_v61, 1  ;;  %v2081_v10 = vmul.f32 %v6828_v15, %v6777_v43  ;;  %v2109_v60 = vmax.f32 %v2077_v46, 0.0  ;;  %v2082_v33 = vmul.f32 %v6828_v15, %v6784_v45 }
 0x4a1   : > { %2127 = vst.msk [vmem:[#allocation2 + $0x81] sm:$0xff] %vm203_vm0, %v2095_v57  ;;  %v6885_v16 = vld [vmem:[#allocation2 + $0x30] sm:$0xff]  ;;  %v2258_v51 = vrot.slane %v6877_v25, 1  ;;  %v2260_v52 = vrot.slane %v6879_v20, 1  ;;  %v2110_v29 = vmax.f32 %v2078_v1, 0.0  ;;  %v2083_v19 = vmul.f32 %v6828_v15, %v6791_v31 }
 0x4a2   : > { %2128 = vst.msk [vmem:[#allocation2 + $0x91] sm:$0xff] %vm203_vm0, %v2096_v59  ;;  %v6894_v34 = vld [vmem:[#allocation2 + $0x38] sm:$0xff]  ;;  %v2262_v36 = vrot.slane %v6885_v16, 1  ;;  %v6916_v32 = vld [vmem:[#allocation2 + $0x40] sm:$0x3]  ;;  %v2111_v59 = vmax.f32 %v2079_v7, 0.0  ;;  %v2084_v12 = vmul.f32 %v6828_v15, %v6798_v22 }
 0x4a3   : > { %2129 = vst.msk [vmem:[#allocation2 + $0x99] sm:$0xff] %vm203_vm0, %v2097_v35  ;;  %v2263_v3 = vrot.slane %v6894_v34, 1  ;;  %v6900_v11 = vsel %vm394_vm1, %v2258_v51, %v2260_v52  ;;  %v6903_v40 = vsel %vm394_vm1, %v2257_v39, %v2258_v51  ;;  %v6914_v23 = vld [vmem:[#allocation2 + $0x48] sm:$0xff]  ;;  %v2265_v54 = vrot.slane %v6916_v32, 1 }
 0x4a4   : > { %2130 = vst.msk [vmem:[#allocation2 + $0xa9] sm:$0xff] %vm203_vm0, %v2098_v26  ;;  %2444 = vrot.lane.b32.xlu1 %v6900_v11, %s4231_s14  ;;  %2442 = vrot.lane.b32.xlu0 %v6903_v40, %s4231_s14  ;;  %v6912_v38 = vld [vmem:[#allocation2 + $0x50] sm:$0xff]  ;;  %v6931_v62 = vld [vmem:[#allocation2 + $0x58] sm:$0x3]  ;;  %v2267_v28 = vrot.slane %v6914_v23, 1  ;;  %v2112_v35 = vmax.f32 %v2080_v27, 0.0 }
 0x4a5   : > { %2131 = vst.msk [vmem:[#allocation2 + $0xb1] sm:$0xff] %vm203_vm0, %v2099_v50  ;;  %v6922_v42 = vsel %vm394_vm1, %v2262_v36, %v2263_v3  ;;  %v2268_v44 = vrot.slane %v6912_v38, 1  ;;  %v2270_v0 = vrot.slane %v6931_v62, 1  ;;  %v6954_v49 = vsel %vm394_vm1, %v2263_v3, %v2265_v54  ;;  %v6967_v57 = vld [vmem:[#allocation2 + $0x60] sm:$0xff] }
 0x4a6   : > { %2132 = vst.msk [vmem:[#allocation2 + $0xc1] sm:$0xff] %vm203_vm0, %v2100_v6  ;;  %2446 = vrot.lane.b32.xlu2 %v6922_v42, %s4231_s14  ;;  %v6963_v24 = vld [vmem:[#allocation2 + $0x68] sm:$0xff]  ;;  %v6965_v43 = vld [vmem:[#allocation2 + $0x70] sm:$0x3]  ;;  %v2113_v31 = vmax.f32 %v2081_v10, 0.0  ;;  %v2272_v50 = vrot.slane %v6967_v57, 1 }
 0x4a7   : > { %2133 = vst.msk [vmem:[#allocation2 + $0xc9] sm:$0xff] %vm203_vm0, %v2101_v30  ;;  %v6951_v21 = vsel %vm394_vm1, %v2267_v28, %v2268_v44  ;;  %v6973_v45 = vsel %vm394_vm1, %v2268_v44, %v2270_v0  ;;  %v6980_v13 = vld [vmem:[#allocation2 + $0x78] sm:$0xff]  ;;  %v2273_v39 = vrot.slane %v6963_v24, 1  ;;  %v2275_v37 = vrot.slane %v6965_v43, 1 }
 0x4a8   : > { %2134 = vst.msk [vmem:[#allocation2 + $0xd9] sm:$0xff] %vm203_vm0, %v2102_v5  ;;  %v6982_v26 = vld [vmem:[#allocation2 + $0x80] sm:$0xff]  ;;  %v2114_v22 = vmax.f32 %v2082_v33, 0.0  ;;  %v2115_v15 = vmax.f32 %v2083_v19, 0.0  ;;  %v2277_v51 = vrot.slane %v6980_v13, 1  ;;  %v2116_v48 = vmax.f32 %v2084_v12, 0.0 }
 0x4a9   : > { %2135 = vst.msk [vmem:[#allocation2 + $0xe1] sm:$0xff] %vm203_vm0, %v2103_v58  ;;  %v2278_v52 = vrot.slane %v6982_v26, 1  ;;  %v6995_v63 = vsel %vm394_vm1, %v2273_v39, %v2275_v37  ;;  %v6998_v6 = vsel %vm394_vm1, %v2272_v50, %v2273_v39  ;;  %v7007_v30 = vld [vmem:[#allocation2 + $0x90] sm:$0xff]  ;;  %v7009_v3 = vld [vmem:[#allocation2 + $0x88] sm:$0x3] }
 0x4aa   : > { %2136 = vst.msk [vmem:[#allocation2 + $0xf1] sm:$0xff] %vm203_vm0, %v2104_v53  ;;  %v7005_v36 = vld [vmem:[#allocation2 + $0x98] sm:$0xff]  ;;  %v7018_v5 = vld [vmem:[#allocation2 + $0xa0] sm:$0x3]  ;;  %v2282_v58 = vrot.slane %v7007_v30, 1  ;;  %v2280_v56 = vrot.slane %v7009_v3, 1 }
 0x4ab   : > { %2137 = vst.msk [vmem:[#allocation2 + $0xf9] sm:$0xff] %vm203_vm0, %v2105_v41  ;;  %v7013_v2 = vsel %vm394_vm1, %v2277_v51, %v2278_v52  ;;  %v2283_v14 = vrot.slane %v7005_v36, 1  ;;  %v2285_v46 = vrot.slane %v7018_v5, 1  ;;  %v7038_v54 = vld [vmem:[#allocation2 + $0xa8] sm:$0xff] }
 0x4ac   : > { %2138 = vst.msk [vmem:[#allocation2 + $0x109] sm:$0xff] %vm203_vm0, %v2106_v17  ;;  %2450 = vrot.lane.b32.xlu1 %v6951_v21, %s4231_s14  ;;  %2448 = vrot.lane.b32.xlu0 %v6954_v49, %s4231_s14  ;;  %v7028_v41 = vsel %vm394_vm1, %v2278_v52, %v2280_v56  ;;  %v7034_v44 = vld [vmem:[#allocation2 + $0xb0] sm:$0xff]  ;;  %v7036_v28 = vld [vmem:[#allocation2 + $0xb8] sm:$0x3]  ;;  %v2287_v27 = vrot.slane %v7038_v54, 1 }
 0x4ad   : > { %2139 = vst.msk [vmem:[#allocation2 + $0x111] sm:$0xff] %vm203_vm0, %v2107_v47  ;;  %v7025_v53 = vsel %vm394_vm1, %v2282_v58, %v2283_v14  ;;  %v7041_v1 = vsel %vm394_vm1, %v2283_v14, %v2285_v46  ;;  %v7045_v17 = vld [vmem:[#allocation2 + $0xc0] sm:$0xff]  ;;  %v2288_v47 = vrot.slane %v7034_v44, 1  ;;  %v2290_v0 = vrot.slane %v7036_v28, 1 }
 0x4ae   : > { %9716 = vst [vmem:[#allocation78_spill] sm:$0xff] %v6973_v45  ;;  %2452 = vrot.lane.b32.xlu2 %v6973_v45, %s4231_s14  ;;  %v7047_v7 = vld [vmem:[#allocation2 + $0xc8] sm:$0xff]  ;;  %v2335_v45 = vrot.slane %v6816_v9, 2 }
 0x4af   : > { %2140 = vst.msk [vmem:[#allocation2 + $0x121] sm:$0xff] %vm203_vm0, %v2108_v18  ;;  %v2292_v18 = vrot.slane %v7045_v17, 1  ;;  %v2293_v10 = vrot.slane %v7047_v7, 1  ;;  %v7058_v33 = vsel %vm394_vm1, %v2287_v27, %v2288_v47  ;;  %v7066_v19 = vld [vmem:[#allocation2 + $0xd8] sm:$0xff] }
 0x4b0   : > { %2141 = vst.msk [vmem:[#allocation2 + $0x129] sm:$0xff] %vm203_vm0, %v2109_v60  ;;  %v7055_v60 = vsel %vm394_vm1, %v2288_v47, %v2290_v0  ;;  %v2297_v39 = vrot.slane %v7066_v19, 1 }
 0x4b1   : > { %2142 = vst.msk [vmem:[#allocation2 + $0x139] sm:$0xff] %vm203_vm0, %v2110_v29  ;;  %v7064_v29 = vld [vmem:[#allocation2 + $0xe0] sm:$0xff]  ;;  %v7071_v12 = vsel %vm394_vm1, %v2292_v18, %v2293_v10 }
 0x4b2   : > { %2143 = vst.msk [vmem:[#allocation2 + $0x141] sm:$0xff] %vm203_vm0, %v2111_v59  ;;  %v7068_v59 = vld [vmem:[#allocation2 + $0xd0] sm:$0x3]  ;;  %v7091_v51 = vld [vmem:[#allocation2 + $0xf8] sm:$0xff]  ;;  %v7093_v52 = vld [vmem:[#allocation2 + $0x100] sm:$0x3] }
 0x4b3   : > { %2144 = vst.msk [vmem:[#allocation2 + $0x151] sm:$0xff] %vm203_vm0, %v2112_v35  ;;  %v7075_v35 = vld [vmem:[#allocation2 + $0xe8] sm:$0x3]  ;;  %v2295_v37 = vrot.slane %v7068_v59, 1  ;;  %v2303_v46 = vrot.slane %v7091_v51, 1  ;;  %v2305_v47 = vrot.slane %v7093_v52, 1 }
 0x4b4   : > { %2145 = vst.msk [vmem:[#allocation2 + $0x159] sm:$0xff] %vm203_vm0, %v2113_v31  ;;  %2456 = vrot.lane.b32.xlu1 %v6995_v63, %s4231_s14  ;;  %2454 = vrot.lane.b32.xlu0 %v6998_v6, %s4231_s14  ;;  %v2298_v31 = vrot.slane %v7064_v29, 1  ;;  %v2300_v50 = vrot.slane %v7075_v35, 1  ;;  %v7102_v58 = vld [vmem:[#allocation2 + $0x108] sm:$0xff]  ;;  %v7104_v56 = vld [vmem:[#allocation2 + $0x110] sm:$0xff] }
 0x4b5   : > { %9717 = vst [vmem:[#allocation84_spill] sm:$0xff] %v6995_v63  ;;  %v2307_v27 = vrot.slane %v7102_v58, 1  ;;  %v2308_v18 = vrot.slane %v7104_v56, 1 }
 0x4b6   : > { %9718 = vst [vmem:[#allocation75_spill] sm:$0xff] %v6998_v6  ;;  %2458 = vrot.lane.b32.xlu2 %v7013_v2, %s4231_s14  ;;  %v7098_v14 = vsel %vm394_vm1, %v2298_v31, %v2300_v50  ;;  %v7125_v50 = vld [vmem:[#allocation2 + $0x118] sm:$0x3]  ;;  %v2332_v6 = vrot.slane %v6823_v8, 2  ;;  %v2342_v8 = vrot.slane %v6885_v16, 2 }
 0x4b7   : > { %2146 = vst.msk [vmem:[#allocation2 + $0x169] sm:$0xff] %vm203_vm0, %v2114_v22  ;;  %v7082_v22 = vsel %vm394_vm1, %v2297_v39, %v2298_v31  ;;  %v7121_v39 = vld [vmem:[#allocation2 + $0x128] sm:$0xff]  ;;  %v7128_v55 = vsel %vm394_vm1, %v2307_v27, %v2308_v18 }
 0x4b8   : > { %2147 = vst.msk [vmem:[#allocation2 + $0x171] sm:$0xff] %vm203_vm0, %v2115_v15  ;;  %v7085_v15 = vsel %vm394_vm1, %v2293_v10, %v2295_v37  ;;  %v7112_v10 = vsel %vm394_vm1, %v2303_v46, %v2305_v47  ;;  %v7123_v37 = vld [vmem:[#allocation2 + $0x120] sm:$0xff]  ;;  %v2313_v47 = vrot.slane %v7121_v39, 1 }
 0x4b9   : > { %9719 = vst [vmem:[#allocation101_spill] sm:$0xff] %v7013_v2  ;;  %v7148_v27 = vld [vmem:[#allocation2 + $0x140] sm:$0xff] }
 0x4ba   : > { %2148 = vst.msk [vmem:[#allocation2 + $0x181] sm:$0xff] %vm203_vm0, %v2116_v48  ;;  %v7095_v48 = vld [vmem:[#allocation2 + $0xf0] sm:$0xff] }
 0x4bb   : > { %9720 = vst [vmem:[#allocation80_spill] sm:$0xff] %v7025_v53  ;;  %v2302_v0 = vrot.slane %v7095_v48, 1 }
 0x4bc   : > { %9721 = vst [vmem:[#allocation65_spill] sm:$0xff] %v7028_v41  ;;  %2462 = vrot.lane.b32.xlu1 %v7025_v53, %s4231_s14  ;;  %2460 = vrot.lane.b32.xlu0 %v7028_v41, %s4231_s14  ;;  %v7182_v53 = vld [vmem:[#allocation2 + $0x160] sm:$0x3] }
 0x4bd   : > { %9722 = vst [vmem:[#allocation102_spill] sm:$0xff] %v7041_v1  ;;  %v7115_v31 = vsel %vm394_vm1, %v2302_v0, %v2303_v46  ;;  %v7132_v46 = vld [vmem:[#allocation2 + $0x130] sm:$0x3]  ;;  %v2312_v0 = vrot.slane %v7123_v37, 1 }
 0x4be   : > { %2464 = vrot.lane.b32.xlu2 %v7041_v1, %s4231_s14  ;;  %9723 = vst [vmem:[#allocation30_spill] sm:$0xff] %v7055_v60  ;;  %v7224_v9 = vpop.permute.xlu2 %2440 }
 0x4bf   : > { %9724 = vst [vmem:[#allocation165_spill] sm:$0xff] %v7058_v33 }
 0x4c0   : > { %9725 = vst [vmem:[#allocation183_spill] sm:$0xff] %v7071_v12 }
 0x4c1   : > { %9726 = vst [vmem:[#allocation71_spill] sm:$0xff] %v7082_v22 }
 0x4c2   : > { %9727 = vst [vmem:[#allocation113_spill] sm:$0xff] %v7085_v15 }
 0x4c3   : > { %9728 = vst [vmem:[#allocation137_spill] sm:$0xff] %v7098_v14 }
 0x4c4   : > { %2468 = vrot.lane.b32.xlu1 %v7055_v60, %s4231_s14  ;;  %2466 = vrot.lane.b32.xlu0 %v7058_v33, %s4231_s14  ;;  %9729 = vst [vmem:[#allocation169_spill] sm:$0xff] %v7112_v10  ;;  %v7139_v60 = vsel %vm394_vm1, %v2312_v0, %v2313_v47  ;;  %v2318_v0 = vrot.slane %v7148_v27, 1  ;;  %v7180_v33 = vld [vmem:[#allocation2 + $0x168] sm:$0xff] }
 0x4c5   : > { %9730 = vst [vmem:[#allocation76_spill] sm:$0xff] %v7115_v31 }
 0x4c6   : > { %2470 = vrot.lane.b32.xlu2 %v7071_v12, %s4231_s14  ;;  %9731 = vst [vmem:[#allocation118_spill] sm:$0xff] %v7128_v55  ;;  %v2315_v12 = vrot.slane %v7132_v46, 1 }
 0x4c7   : > { %9732 = vst [vmem:[#allocation143_spill] sm:$0xff] %v7139_v60 }
 0x4c8   : > { %9741 = vst [vmem:[#allocation95_spill] sm:$0xff] %v7224_v9  ;;  %v2368_v9 = vrot.slane %v7034_v44, 2 }
 0x4cc   : > { %2474 = vrot.lane.b32.xlu1 %v7082_v22, %s4231_s14  ;;  %2472 = vrot.lane.b32.xlu0 %v7085_v15, %s4231_s14  ;;  %v2310_v15 = vrot.slane %v7125_v50, 1 }
 0x4ce   : > { %2476 = vrot.lane.b32.xlu2 %v7098_v14, %s4231_s14  ;;  %v7152_v14 = vld [vmem:[#allocation2 + $0x138] sm:$0xff] }
 0x4d4   : > { %2480 = vrot.lane.b32.xlu1 %v7112_v10, %s4231_s14  ;;  %2478 = vrot.lane.b32.xlu0 %v7115_v31, %s4231_s14  ;;  %v7142_v10 = vsel %vm394_vm1, %v2308_v18, %v2310_v15  ;;  %v7155_v31 = vsel %vm394_vm1, %v2313_v47, %v2315_v12  ;;  %v7159_v15 = vld [vmem:[#allocation2 + $0x150] sm:$0xff]  ;;  %v7161_v18 = vld [vmem:[#allocation2 + $0x158] sm:$0xff] }
 0x4d5   : > { %9733 = vst [vmem:[#allocation159_spill] sm:$0xff] %v7142_v10  ;;  %v2322_v22 = vrot.slane %v7159_v15, 1  ;;  %v2323_v1 = vrot.slane %v7161_v18, 1 }
 0x4d6   : > { %2482 = vrot.lane.b32.xlu2 %v7128_v55, %s4231_s14  ;;  %v7150_v55 = vld [vmem:[#allocation2 + $0x148] sm:$0x3]  ;;  %9734 = vst [vmem:[#allocation82_spill] sm:$0xff] %v7155_v31 }
 0x4d7   : > { %v7185_v2 = vsel %vm394_vm1, %v2322_v22, %v2323_v1 }
 0x4d8   : > { %9737 = vst [vmem:[#allocation130_spill] sm:$0xff] %v7185_v2 }
 0x4dc   : > { %2486 = vrot.lane.b32.xlu1 %v7139_v60, %s4231_s14  ;;  %2484 = vrot.lane.b32.xlu0 %v7142_v10, %s4231_s14  ;;  %v2320_v60 = vrot.slane %v7150_v55, 1  ;;  %v2317_v10 = vrot.slane %v7152_v14, 1 }
 0x4de   : > { %2488 = vrot.lane.b32.xlu2 %v7155_v31, %s4231_s14  ;;  %v7169_v12 = vsel %vm394_vm1, %v2318_v0, %v2320_v60  ;;  %v7172_v47 = vsel %vm394_vm1, %v2317_v10, %v2318_v0  ;;  %v7178_v31 = vld [vmem:[#allocation2 + $0x170] sm:$0xff]  ;;  %v7189_v60 = vld [vmem:[#allocation2 + $0x178] sm:$0x3]  ;;  %v2327_v0 = vrot.slane %v7180_v33, 1 }
 0x4df   : > { %9735 = vst [vmem:[#allocation99_spill] sm:$0xff] %v7169_v12  ;;  %v2328_v10 = vrot.slane %v7178_v31, 1 }
 0x4e0   : > { %9736 = vst [vmem:[#allocation105_spill] sm:$0xff] %v7172_v47 }
 0x4e1   : > { %v7196_v41 = vsel %vm394_vm1, %v2327_v0, %v2328_v10  ;;  %v2338_v0 = vrot.slane %v6877_v25, 2 }
 0x4e2   : > { %9738 = vst [vmem:[#allocation35_spill] sm:$0xff] %v7196_v41 }
 0x4e4   : > { %2492 = vrot.lane.b32.xlu1 %v7169_v12, %s4231_s14  ;;  %2490 = vrot.lane.b32.xlu0 %v7172_v47, %s4231_s14  ;;  %v2325_v12 = vrot.slane %v7182_v53, 1  ;;  %v2330_v47 = vrot.slane %v7189_v60, 1 }
 0x4e6   : > { %2494 = vrot.lane.b32.xlu2 %v7185_v2, %s4231_s14  ;;  %v7199_v63 = vsel %vm394_vm1, %v2323_v1, %v2325_v12  ;;  %v7206_v22 = vsel %vm394_vm1, %v2328_v10, %v2330_v47  ;;  %v2333_v2 = vrot.slane %v6814_v4, 2  ;;  %v2337_v12 = vrot.slane %v6872_v61, 2 }
 0x4e7   : > { %9739 = vst [vmem:[#allocation145_spill] sm:$0xff] %v7199_v63  ;;  %v2340_v47 = vrot.slane %v6879_v20, 2  ;;  %v2348_v20 = vrot.slane %v6912_v38, 2 }
 0x4e8   : > { %9740 = vst [vmem:[#allocation167_spill] sm:$0xff] %v7206_v22  ;;  %v2336_v1 = vsel %vm475_vm3, %v2333_v2, %v2335_v45  ;;  %v7220_v4 = vsel %vm475_vm3, %v2337_v12, %v2338_v0  ;;  %v2343_v45 = vrot.slane %v6894_v34, 2 }
 0x4ec   : > { %2498 = vrot.lane.b32.xlu1 %v7196_v41, %s4231_s14  ;;  %2496 = vrot.lane.b32.xlu0 %v7199_v63, %s4231_s14  ;;  %v2334_v41 = vsel %vm475_vm3, %v2332_v6, %v2333_v2  ;;  %v2345_v6 = vrot.slane %v6916_v32, 2  ;;  %v7231_v2 = vsel %vm475_vm3, %v2342_v8, %v2343_v45  ;;  %v2350_v32 = vrot.slane %v6931_v62, 2 }
 0x4ed   : > { %v2353_v8 = vrot.slane %v6963_v24, 2 }
 0x4ee   : > { %2500 = vrot.lane.b32.xlu2 %v7206_v22, %s4231_s14  ;;  %v7241_v10 = vsel %vm475_vm3, %v2343_v45, %v2345_v6  ;;  %v2357_v6 = vrot.slane %v6980_v13, 2  ;;  %v2355_v22 = vrot.slane %v6965_v43, 2 }
 0x4f4   : > { %2536 = vrot.lane.b32.xlu1 %v2336_v1, %s4232_s19  ;;  %2534 = vrot.lane.b32.xlu0 %v2334_v41, %s4232_s19  ;;  %v7234_v41 = vsel %vm475_vm3, %v2338_v0, %v2340_v47  ;;  %v2347_v1 = vrot.slane %v6914_v23, 2  ;;  %v2352_v0 = vrot.slane %v6967_v57, 2  ;;  %v7253_v47 = vsel %vm475_vm3, %v2348_v20, %v2350_v32 }
 0x4f5   : > { %v2358_v32 = vrot.slane %v6982_v26, 2 }
 0x4f6   : > { %2538 = vrot.lane.b32.xlu2 %v7220_v4, %s4232_s19  ;;  %v7256_v45 = vsel %vm475_vm3, %v2347_v1, %v2348_v20  ;;  %v7263_v62 = vsel %vm475_vm3, %v2352_v0, %v2353_v8  ;;  %v2360_v1 = vrot.slane %v7009_v3, 2  ;;  %v7283_v0 = vpop.permute.xlu1 %2438  ;;  %v2363_v3 = vrot.slane %v7005_v36, 2 }
 0x4f7   : > { %v7274_v63 = vsel %vm475_vm3, %v2357_v6, %v2358_v32  ;;  %v2365_v6 = vrot.slane %v7018_v5, 2 }
 0x4f8   : > { %9744 = vst [vmem:[#allocation79_spill] sm:$0xff] %v7274_v63  ;;  %v7286_v43 = vsel %vm475_vm3, %v2358_v32, %v2360_v1 }
 0x4f9   : > { %9745 = vst [vmem:[#allocation116_spill] sm:$0xff] %v7286_v43 }
 0x4fc   : > { %2542 = vrot.lane.b32.xlu1 %v7231_v2, %s4232_s19  ;;  %2540 = vrot.lane.b32.xlu0 %v7234_v41, %s4232_s19 }
 0x4fe   : > { %2544 = vrot.lane.b32.xlu2 %v7241_v10, %s4232_s19 }
 0x500   : > { %v7248_v12 = vpop.permute.xlu2 %2446 }
 0x501   : > { %9742 = vst [vmem:[#allocation57_spill] sm:$0xff] %v7248_v12  ;;  %v7277_v12 = vsel %vm475_vm3, %v2353_v8, %v2355_v22  ;;  %v2362_v22 = vrot.slane %v7007_v30, 2 }
 0x503   : > { %v7301_v32 = vsel %vm475_vm3, %v2362_v22, %v2363_v3  ;;  %v2370_v22 = vrot.slane %v7036_v28, 2 }
 0x504   : > { %2548 = vrot.lane.b32.xlu1 %v7253_v47, %s4232_s19  ;;  %2546 = vrot.lane.b32.xlu0 %v7256_v45, %s4232_s19  ;;  %9748 = vst [vmem:[#allocation152_spill] sm:$0xff] %v7301_v32 }
 0x506   : > { %2550 = vrot.lane.b32.xlu2 %v7263_v62, %s4232_s19 }
 0x508   : > { %v7270_v20 = vpop.permute.xlu2 %2452 }
 0x509   : > { %9743 = vst [vmem:[#allocation188_spill] sm:$0xff] %v7270_v20  ;;  %v2367_v20 = vrot.slane %v7038_v54, 2 }
 0x50b   : > { %v7308_v5 = vsel %vm475_vm3, %v2367_v20, %v2368_v9 }
 0x50c   : > { %2554 = vrot.lane.b32.xlu1 %v7274_v63, %s4232_s19  ;;  %2552 = vrot.lane.b32.xlu0 %v7277_v12, %s4232_s19  ;;  %v7298_v63 = vsel %vm475_vm3, %v2363_v3, %v2365_v6  ;;  %9749 = vst [vmem:[#allocation172_spill] sm:$0xff] %v7308_v5  ;;  %v2372_v6 = vrot.slane %v7045_v17, 2  ;;  %v2373_v3 = vrot.slane %v7047_v7, 2 }
 0x50d   : > { %9747 = vst [vmem:[#allocation140_spill] sm:$0xff] %v7298_v63 }
 0x50e   : > { %2556 = vrot.lane.b32.xlu2 %v7286_v43, %s4232_s19  ;;  %v7323_v20 = vsel %vm475_vm3, %v2372_v6, %v2373_v3  ;;  %v7326_v43 = vsel %vm475_vm3, %v2368_v9, %v2370_v22  ;;  %v2378_v6 = vrot.slane %v7064_v29, 2  ;;  %v2380_v9 = vrot.slane %v7075_v35, 2 }
 0x50f   : > { %9753 = vst [vmem:[#allocation97_spill] sm:$0xff] %v7323_v20  ;;  %v2377_v22 = vrot.slane %v7066_v19, 2 }
 0x510   : > { %v7293_v8 = vpop.permute.xlu2 %2458  ;;  %9754 = vst [vmem:[#allocation123_spill] sm:$0xff] %v7326_v43 }
 0x511   : > { %9746 = vst [vmem:[#allocation135_spill] sm:$0xff] %v7293_v8 }
 0x514   : > { %2560 = vrot.lane.b32.xlu1 %v7298_v63, %s4232_s19  ;;  %2558 = vrot.lane.b32.xlu0 %v7301_v32, %s4232_s19  ;;  %v2375_v32 = vrot.slane %v7068_v59, 2 }
 0x516   : > { %2562 = vrot.lane.b32.xlu2 %v7308_v5, %s4232_s19  ;;  %v7312_v1 = vpop.permute.xlu0 %2442  ;;  %v7314_v8 = vpop.permute.xlu1 %2444  ;;  %v7333_v5 = vsel %vm475_vm3, %v2373_v3, %v2375_v32  ;;  %v2383_v32 = vrot.slane %v7091_v51, 2  ;;  %v7349_v3 = vsel %vm475_vm3, %v2378_v6, %v2380_v9  ;;  %v2387_v9 = vrot.slane %v7102_v58, 2 }
 0x517   : > { %9750 = vst [vmem:[#allocation171_spill] sm:$0xff] %v7312_v1 }
 0x518   : > { %9751 = vst [vmem:[#allocation60_spill] sm:$0xff] %v7314_v8  ;;  %v7319_v63 = vpop.permute.xlu2 %2464 }
 0x519   : > { %9752 = vst [vmem:[#allocation182_spill] sm:$0xff] %v7319_v63 }
 0x51a   : > { %9755 = vst [vmem:[#allocation120_spill] sm:$0xff] %v7333_v5 }
 0x51b   : > { %9759 = vst [vmem:[#allocation179_spill] sm:$0xff] %v7349_v3 }
 0x51c   : > { %2566 = vrot.lane.b32.xlu1 %v7323_v20, %s4232_s19  ;;  %2564 = vrot.lane.b32.xlu0 %v7326_v43, %s4232_s19  ;;  %v2382_v20 = vrot.slane %v7095_v48, 2 }
 0x51e   : > { %2568 = vrot.lane.b32.xlu2 %v7333_v5, %s4232_s19  ;;  %v7337_v28 = vpop.permute.xlu0 %2448  ;;  %v7339_v59 = vpop.permute.xlu1 %2450  ;;  %v7352_v5 = vsel %vm475_vm3, %v2377_v22, %v2378_v6  ;;  %v7359_v35 = vsel %vm475_vm3, %v2382_v20, %v2383_v32  ;;  %v2388_v6 = vrot.slane %v7104_v56, 2  ;;  %v2385_v22 = vrot.slane %v7093_v52, 2 }
 0x51f   : > { %9756 = vst [vmem:[#allocation144_spill] sm:$0xff] %v7337_v28 }
 0x520   : > { %9757 = vst [vmem:[#allocation54_spill] sm:$0xff] %v7339_v59  ;;  %v7344_v63 = vpop.permute.xlu2 %2470  ;;  %v7374_v20 = vsel %vm475_vm3, %v2387_v9, %v2388_v6  ;;  %v7377_v8 = vsel %vm475_vm3, %v2383_v32, %v2385_v22  ;;  %v2393_v9 = vrot.slane %v7121_v39, 2  ;;  %v2395_v32 = vrot.slane %v7132_v46, 2 }
 0x521   : > { %9758 = vst [vmem:[#allocation162_spill] sm:$0xff] %v7344_v63  ;;  %v2390_v63 = vrot.slane %v7125_v50, 2  ;;  %v2392_v22 = vrot.slane %v7123_v37, 2 }
 0x522   : > { %9760 = vst [vmem:[#allocation77_spill] sm:$0xff] %v7352_v5 }
 0x523   : > { %v7403_v1 = vsel %vm475_vm3, %v2392_v22, %v2393_v9  ;;  %v2400_v22 = vrot.slane %v7150_v55, 2 }
 0x524   : > { %2572 = vrot.lane.b32.xlu1 %v7349_v3, %s4232_s19  ;;  %2570 = vrot.lane.b32.xlu0 %v7352_v5, %s4232_s19  ;;  %9768 = vst [vmem:[#allocation184_spill] sm:$0xff] %v7403_v1 }
 0x526   : > { %2574 = vrot.lane.b32.xlu2 %v7359_v35, %s4232_s19  ;;  %v7363_v43 = vpop.permute.xlu0 %2454  ;;  %v7365_v59 = vpop.permute.xlu1 %2456 }
 0x527   : > { %9761 = vst [vmem:[#allocation185_spill] sm:$0xff] %v7363_v43 }
 0x528   : > { %9762 = vst [vmem:[#allocation103_spill] sm:$0xff] %v7365_v59  ;;  %v7370_v28 = vpop.permute.xlu2 %2476  ;;  %v7384_v59 = vsel %vm475_vm3, %v2388_v6, %v2390_v63  ;;  %v2398_v63 = vrot.slane %v7148_v27, 2  ;;  %v7400_v6 = vsel %vm475_vm3, %v2393_v9, %v2395_v32  ;;  %v2402_v32 = vrot.slane %v7159_v15, 2 }
 0x529   : > { %9763 = vst [vmem:[#allocation108_spill] sm:$0xff] %v7370_v28  ;;  %v2397_v28 = vrot.slane %v7152_v14, 2  ;;  %v2403_v9 = vrot.slane %v7161_v18, 2 }
 0x52a   : > { %9767 = vst [vmem:[#allocation170_spill] sm:$0xff] %v7400_v6 }
 0x52b   : > { %v7410_v46 = vsel %vm475_vm3, %v2397_v28, %v2398_v63  ;;  %v7425_v28 = vsel %vm475_vm3, %v2402_v32, %v2403_v9  ;;  %v2408_v32 = vrot.slane %v7178_v31, 2 }
 0x52c   : > { %2578 = vrot.lane.b32.xlu1 %v7374_v20, %s4232_s19  ;;  %2576 = vrot.lane.b32.xlu0 %v7377_v8, %s4232_s19  ;;  %9772 = vst [vmem:[#allocation138_spill] sm:$0xff] %v7425_v28 }
 0x52e   : > { %2580 = vrot.lane.b32.xlu2 %v7384_v59, %s4232_s19  ;;  %v7388_v52 = vpop.permute.xlu0 %2460  ;;  %v7390_v50 = vpop.permute.xlu1 %2462 }
 0x52f   : > { %9764 = vst [vmem:[#allocation133_spill] sm:$0xff] %v7388_v52 }
 0x530   : > { %9765 = vst [vmem:[#allocation42_spill] sm:$0xff] %v7390_v50  ;;  %v7395_v43 = vpop.permute.xlu2 %2482 }
 0x531   : > { %9766 = vst [vmem:[#allocation147_spill] sm:$0xff] %v7395_v43 }
 0x534   : > { %2584 = vrot.lane.b32.xlu1 %v7400_v6, %s4232_s19  ;;  %2582 = vrot.lane.b32.xlu0 %v7403_v1, %s4232_s19  ;;  %v2405_v6 = vrot.slane %v7182_v53, 2  ;;  %v7428_v1 = vsel %vm475_vm3, %v2398_v63, %v2400_v22  ;;  %v2410_v63 = vrot.slane %v7189_v60, 2  ;;  %v2407_v22 = vrot.slane %v7180_v33, 2 }
 0x535   : > { %9773 = vst [vmem:[#allocation34_spill] sm:$0xff] %v7428_v1 }
 0x536   : > { %2586 = vrot.lane.b32.xlu2 %v7410_v46, %s4232_s19  ;;  %v7414_v50 = vpop.permute.xlu0 %2466  ;;  %v7416_v52 = vpop.permute.xlu1 %2468 }
 0x537   : > { %9769 = vst [vmem:[#allocation87_spill] sm:$0xff] %v7414_v50 }
 0x538   : > { %9770 = vst [vmem:[#allocation85_spill] sm:$0xff] %v7416_v52  ;;  %v7421_v43 = vpop.permute.xlu2 %2488  ;;  %v7435_v52 = vsel %vm475_vm3, %v2403_v9, %v2405_v6  ;;  %v7452_v6 = vsel %vm475_vm3, %v2407_v22, %v2408_v32 }
 0x539   : > { %9771 = vst [vmem:[#allocation119_spill] sm:$0xff] %v7421_v43  ;;  %v7449_v43 = vsel %vm475_vm3, %v2408_v32, %v2410_v63 }
 0x53a   : > { %9774 = vst [vmem:[#allocation156_spill] sm:$0xff] %v7435_v52 }
 0x53b   : > { %9776 = vst [vmem:[#allocation173_spill] sm:$0xff] %v7449_v43 }
 0x53c   : > { %2590 = vrot.lane.b32.xlu1 %v7425_v28, %s4232_s19  ;;  %2588 = vrot.lane.b32.xlu0 %v7428_v1, %s4232_s19  ;;  %9777 = vst [vmem:[#allocation63_spill] sm:$0xff] %v7452_v6 }
 0x53e   : > { %2592 = vrot.lane.b32.xlu2 %v7435_v52, %s4232_s19  ;;  %v7439_v55 = vpop.permute.xlu0 %2472  ;;  %v7441_v53 = vpop.permute.xlu1 %2474 }
 0x540   : > { %v7446_v50 = vpop.permute.xlu2 %2494 }
 0x541   : > { %9775 = vst [vmem:[#allocation174_spill] sm:$0xff] %v7446_v50 }
 0x544   : > { %2596 = vrot.lane.b32.xlu1 %v7449_v43, %s4232_s19  ;;  %2594 = vrot.lane.b32.xlu0 %v7452_v6, %s4232_s19 }
 0x546   : > { %2630 = vrot.lane.b32.xlu2 %v6872_v61, %s4233_s20  ;;  %v7460_v60 = vpop.permute.xlu0 %2478  ;;  %v7462_v9 = vpop.permute.xlu1 %2480 }
 0x547   : > { %9778 = vst [vmem:[#allocation187_spill] sm:$0xff] %v7460_v60  ;;  %v9816_v60 = vld [vmem:[#allocation80_spill] sm:$0xff] }
 0x548   : > { %9779 = vst [vmem:[#allocation100_spill] sm:$0xff] %v7462_v9  ;;  %v7464_v50 = vpop.permute.xlu2 %2500 }
 0x549   : > { %9780 = vst [vmem:[#allocation126_spill] sm:$0xff] %v7464_v50 }
 0x54c   : > { %2634 = vrot.lane.b32.xlu1 %v6885_v16, %s4233_s20  ;;  %2632 = vrot.lane.b32.xlu0 %v6877_v25, %s4233_s20 }
 0x54e   : > { %2636 = vrot.lane.b32.xlu2 %v6894_v34, %s4233_s20  ;;  %v7472_v32 = vpop.permute.xlu0 %2484  ;;  %v7474_v63 = vpop.permute.xlu1 %2486 }
 0x54f   : > { %9781 = vst [vmem:[#allocation125_spill] sm:$0xff] %v7472_v32 }
 0x550   : > { %9782 = vst [vmem:[#allocation146_spill] sm:$0xff] %v7474_v63  ;;  %v7476_v61 = vpop.permute.xlu2 %2538 }
 0x554   : > { %2640 = vrot.lane.b32.xlu1 %v6912_v38, %s4233_s20  ;;  %2638 = vrot.lane.b32.xlu0 %v6914_v23, %s4233_s20 }
 0x556   : > { %2642 = vrot.lane.b32.xlu2 %v6967_v57, %s4233_s20  ;;  %v7484_v22 = vpop.permute.xlu0 %2490  ;;  %v7486_v25 = vpop.permute.xlu1 %2492 }
 0x557   : > { %9783 = vst [vmem:[#allocation160_spill] sm:$0xff] %v7484_v22 }
 0x558   : > { %9784 = vst [vmem:[#allocation164_spill] sm:$0xff] %v7486_v25  ;;  %v7488_v50 = vpop.permute.xlu2 %2544 }
 0x55c   : > { %2646 = vrot.lane.b32.xlu1 %v6980_v13, %s4233_s20  ;;  %2644 = vrot.lane.b32.xlu0 %v6963_v24, %s4233_s20 }
 0x55e   : > { %2648 = vrot.lane.b32.xlu2 %v6982_v26, %s4233_s20  ;;  %v7496_v63 = vpop.permute.xlu0 %2496  ;;  %v7498_v32 = vpop.permute.xlu1 %2498 }
 0x55f   : > { %9785 = vst [vmem:[#allocation181_spill] sm:$0xff] %v7496_v63 }
 0x560   : > { %9786 = vst [vmem:[#allocation83_spill] sm:$0xff] %v7498_v32  ;;  %v7500_v43 = vpop.permute.xlu2 %2550 }
 0x561   : > { %9787 = vst [vmem:[#allocation190_spill] sm:$0xff] %v7500_v43 }
 0x564   : > { %2652 = vrot.lane.b32.xlu1 %v7005_v36, %s4233_s20  ;;  %2650 = vrot.lane.b32.xlu0 %v7007_v30, %s4233_s20 }
 0x566   : > { %2654 = vrot.lane.b32.xlu2 %v7038_v54, %s4233_s20  ;;  %v7508_v25 = vpop.permute.xlu0 %2534  ;;  %v7510_v22 = vpop.permute.xlu1 %2536 }
 0x568   : > { %v7512_v6 = vpop.permute.xlu2 %2556 }
 0x569   : > { %9788 = vst [vmem:[#allocation106_spill] sm:$0xff] %v7512_v6 }
 0x56c   : > { %2658 = vrot.lane.b32.xlu1 %v7045_v17, %s4233_s20  ;;  %2656 = vrot.lane.b32.xlu0 %v7034_v44, %s4233_s20 }
 0x56e   : > { %2660 = vrot.lane.b32.xlu2 %v7047_v7, %s4233_s20  ;;  %v7520_v36 = vpop.permute.xlu0 %2540  ;;  %v7522_v32 = vpop.permute.xlu1 %2542 }
 0x570   : > { %v7524_v54 = vpop.permute.xlu2 %2562 }
 0x571   : > { %9789 = vst [vmem:[#allocation111_spill] sm:$0xff] %v7524_v54 }
 0x574   : > { %2664 = vrot.lane.b32.xlu1 %v7064_v29, %s4233_s20  ;;  %2662 = vrot.lane.b32.xlu0 %v7066_v19, %s4233_s20 }
 0x576   : > { %2666 = vrot.lane.b32.xlu2 %v7095_v48, %s4233_s20  ;;  %v7532_v63 = vpop.permute.xlu0 %2546  ;;  %v7534_v44 = vpop.permute.xlu1 %2548 }
 0x577   : > { %9790 = vst [vmem:[#allocation136_spill] sm:$0xff] %v7532_v63 }
 0x578   : > { %9791 = vst [vmem:[#allocation45_spill] sm:$0xff] %v7534_v44  ;;  %v7536_v7 = vpop.permute.xlu2 %2568 }
 0x57c   : > { %2670 = vrot.lane.b32.xlu1 %v7102_v58, %s4233_s20  ;;  %2668 = vrot.lane.b32.xlu0 %v7091_v51, %s4233_s20 }
 0x57e   : > { %2672 = vrot.lane.b32.xlu2 %v7104_v56, %s4233_s20  ;;  %v7544_v29 = vpop.permute.xlu0 %2552  ;;  %v7546_v19 = vpop.permute.xlu1 %2554 }
 0x57f   : > { %9792 = vst [vmem:[#allocation149_spill] sm:$0xff] %v7544_v29 }
 0x580   : > { %9793 = vst [vmem:[#allocation81_spill] sm:$0xff] %v7546_v19  ;;  %v7548_v54 = vpop.permute.xlu2 %2574 }
 0x581   : > { %9794 = vst [vmem:[#allocation189_spill] sm:$0xff] %v7548_v54 }
 0x584   : > { %2676 = vrot.lane.b32.xlu1 %v7121_v39, %s4233_s20  ;;  %2674 = vrot.lane.b32.xlu0 %v7123_v37, %s4233_s20 }
 0x586   : > { %2678 = vrot.lane.b32.xlu2 %v7152_v14, %s4233_s20  ;;  %v7556_v6 = vpop.permute.xlu0 %2558  ;;  %v7558_v9 = vpop.permute.xlu1 %2560 }
 0x587   : > { %9795 = vst [vmem:[#allocation92_spill] sm:$0xff] %v7556_v6  ;;  %v7588_v6 = vld [vmem:[#allocation2 + $0x188] sm:$0xff] }
 0x588   : > { %9796 = vst [vmem:[#allocation89_spill] sm:$0xff] %v7558_v9  ;;  %v7560_v43 = vpop.permute.xlu2 %2580  ;;  %v7578_v9 = vld [vmem:[#allocation2 + $0x180] sm:$0xff] }
 0x589   : > { %9797 = vst [vmem:[#allocation124_spill] sm:$0xff] %v7560_v43  ;;  %v9810_v43 = vld [vmem:[#allocation84_spill] sm:$0xff] }
 0x58a   : > { %9800 = vst [vmem:[#allocation56_spill] sm:$0xff] %v7578_v9 }
 0x58b   : > { %9803 = vst [vmem:[#allocation198_spill] sm:$0xff] %v7588_v6 }
 0x58c   : > { %2682 = vrot.lane.b32.xlu1 %v7159_v15, %s4233_s20  ;;  %2680 = vrot.lane.b32.xlu0 %v7148_v27, %s4233_s20 }
 0x58e   : > { %2684 = vrot.lane.b32.xlu2 %v7161_v18, %s4233_s20  ;;  %v7568_v19 = vpop.permute.xlu0 %2564  ;;  %v7570_v29 = vpop.permute.xlu1 %2566 }
 0x58f   : > { %9798 = vst [vmem:[#allocation141_spill] sm:$0xff] %v7568_v19 }
 0x590   : > { %v7572_v52 = vpop.permute.xlu2 %2586 }
 0x591   : > { %9799 = vst [vmem:[#allocation39_spill] sm:$0xff] %v7572_v52 }
 0x594   : > { %2688 = vrot.lane.b32.xlu1 %v7178_v31, %s4233_s20  ;;  %2686 = vrot.lane.b32.xlu0 %v7180_v33, %s4233_s20 }
 0x596   : > { %2690 = vrot.lane.b32.xlu2 %v7578_v9, %s4233_s20  ;;  %v7582_v15 = vpop.permute.xlu0 %2570  ;;  %v7584_v18 = vpop.permute.xlu1 %2572  ;;  %v9809_v9 = vld [vmem:[#allocation78_spill] sm:$0xff] }
 0x597   : > { %9801 = vst [vmem:[#allocation86_spill] sm:$0xff] %v7584_v18 }
 0x598   : > { %v7586_v19 = vpop.permute.xlu2 %2592 }
 0x599   : > { %9802 = vst [vmem:[#allocation176_spill] sm:$0xff] %v7586_v19 }
 0x59c   : > { %2726 = vrot.lane.b32.xlu1 %v6903_v40, %s4234_s21  ;;  %2692 = vrot.lane.b32.xlu0 %v7588_v6, %s4233_s20  ;;  %v9808_v6 = vld [vmem:[#allocation75_spill] sm:$0xff] }
 0x59e   : > { %2728 = vrot.lane.b32.xlu2 %v6900_v11, %s4234_s21  ;;  %v7596_v33 = vpop.permute.xlu0 %2576  ;;  %v7598_v31 = vpop.permute.xlu1 %2578 }
 0x59f   : > { %9804 = vst [vmem:[#allocation206_spill] sm:$0xff] %v7596_v33 }
 0x5a0   : > { %9805 = vst [vmem:[#allocation210_spill] sm:$0xff] %v7598_v31  ;;  %v7600_v52 = vpop.permute.xlu2 %2630 }
 0x5a4   : > { %2732 = vrot.lane.b32.xlu1 %v6954_v49, %s4234_s21  ;;  %2730 = vrot.lane.b32.xlu0 %v6922_v42, %s4234_s21 }
 0x5a6   : > { %2734 = vrot.lane.b32.xlu2 %v6951_v21, %s4234_s21  ;;  %v7608_v40 = vpop.permute.xlu0 %2582  ;;  %v7610_v19 = vpop.permute.xlu1 %2584 }
 0x5a7   : > { %9806 = vst [vmem:[#allocation49_spill] sm:$0xff] %v7608_v40  ;;  %v9814_v40 = vld [vmem:[#allocation65_spill] sm:$0xff] }
 0x5a8   : > { %9807 = vst [vmem:[#allocation158_spill] sm:$0xff] %v7610_v19  ;;  %v7612_v11 = vpop.permute.xlu2 %2636  ;;  %v9815_v19 = vld [vmem:[#allocation101_spill] sm:$0xff] }
 0x5ac   : > { %2738 = vrot.lane.b32.xlu1 %v9808_v6, %s4234_s21  ;;  %2736 = vrot.lane.b32.xlu0 %v9809_v9, %s4234_s21 }
 0x5ae   : > { %2740 = vrot.lane.b32.xlu2 %v9810_v43, %s4234_s21  ;;  %v7620_v31 = vpop.permute.xlu0 %2588  ;;  %v7622_v33 = vpop.permute.xlu1 %2590 }
 0x5af   : > { %9811 = vst [vmem:[#allocation69_spill] sm:$0xff] %v7620_v31  ;;  %v9820_v31 = vld [vmem:[#allocation165_spill] sm:$0xff] }
 0x5b0   : > { %9812 = vst [vmem:[#allocation68_spill] sm:$0xff] %v7622_v33  ;;  %v7624_v54 = vpop.permute.xlu2 %2642  ;;  %v9821_v33 = vld [vmem:[#allocation102_spill] sm:$0xff] }
 0x5b1   : > { %9813 = vst [vmem:[#allocation104_spill] sm:$0xff] %v7624_v54 }
 0x5b4   : > { %2744 = vrot.lane.b32.xlu1 %v9814_v40, %s4234_s21  ;;  %2742 = vrot.lane.b32.xlu0 %v9815_v19, %s4234_s21 }
 0x5b6   : > { %2746 = vrot.lane.b32.xlu2 %v9816_v60, %s4234_s21  ;;  %v7632_v44 = vpop.permute.xlu0 %2594  ;;  %v7634_v28 = vpop.permute.xlu1 %2596 }
 0x5b7   : > { %9817 = vst [vmem:[#allocation129_spill] sm:$0xff] %v7632_v44 }
 0x5b8   : > { %9818 = vst [vmem:[#allocation128_spill] sm:$0xff] %v7634_v28  ;;  %v7636_v18 = vpop.permute.xlu2 %2648 }
 0x5b9   : > { %9819 = vst [vmem:[#allocation148_spill] sm:$0xff] %v7636_v18 }
 0x5bc   : > { %2750 = vrot.lane.b32.xlu1 %v9820_v31, %s4234_s21  ;;  %2748 = vrot.lane.b32.xlu0 %v9821_v33, %s4234_s21 }
 0x5be   : > { %2822 = vrot.lane.b32.xlu2 %v7220_v4, %s4235_s22  ;;  %v7644_v54 = vpop.permute.xlu0 %2632  ;;  %v7646_v63 = vpop.permute.xlu1 %2634 }
 0x5c0   : > { %v7648_v1 = vpop.permute.xlu2 %2654 }
 0x5c1   : > { %9822 = vst [vmem:[#allocation59_spill] sm:$0xff] %v7648_v1 }
 0x5c4   : > { %3014 = vrot.lane.b32.xlu1 %v6922_v42, %s4237_s24  ;;  %2918 = vrot.lane.b32.xlu0 %v6885_v16, %s4236_s23 }
 0x5c6   : > { %3110 = vrot.lane.b32.xlu2 %v7231_v2, %s4238_s25  ;;  %v7656_v28 = vpop.permute.xlu0 %2638  ;;  %v7658_v44 = vpop.permute.xlu1 %2640 }
 0x5c8   : > { %v7660_v4 = vpop.permute.xlu2 %2660 }
 0x5c9   : > { %9823 = vst [vmem:[#allocation166_spill] sm:$0xff] %v7660_v4 }
 0x5cc   : > { %2920 = vrot.lane.b32.xlu1 %v6894_v34, %s4236_s23  ;;  %2824 = vrot.lane.b32.xlu0 %v7234_v41, %s4235_s22 }
 0x5ce   : > { %3016 = vrot.lane.b32.xlu2 %v6954_v49, %s4237_s24  ;;  %v7668_v42 = vpop.permute.xlu0 %2644  ;;  %v7670_v16 = vpop.permute.xlu1 %2646 }
 0x5d0   : > { %v7672_v1 = vpop.permute.xlu2 %2666 }
 0x5d4   : > { %2826 = vrot.lane.b32.xlu1 %v7231_v2, %s4235_s22  ;;  %3112 = vrot.lane.b32.xlu0 %v7241_v10, %s4238_s25 }
 0x5d6   : > { %2922 = vrot.lane.b32.xlu2 %v6914_v23, %s4236_s23  ;;  %v7680_v34 = vpop.permute.xlu0 %2650  ;;  %v7682_v41 = vpop.permute.xlu1 %2652 }
 0x5d7   : > { %9824 = vst [vmem:[#allocation186_spill] sm:$0xff] %v7680_v34 }
 0x5d8   : > { %9825 = vst [vmem:[#allocation201_spill] sm:$0xff] %v7682_v41  ;;  %v7684_v49 = vpop.permute.xlu2 %2672  ;;  %v9830_v41 = vld [vmem:[#allocation71_spill] sm:$0xff] }
 0x5d9   : > { %9826 = vst [vmem:[#allocation200_spill] sm:$0xff] %v7684_v49 }
 0x5dc   : > { %3114 = vrot.lane.b32.xlu1 %v7256_v45, %s4238_s25  ;;  %3018 = vrot.lane.b32.xlu0 %v6951_v21, %s4237_s24 }
 0x5de   : > { %2828 = vrot.lane.b32.xlu2 %v7241_v10, %s4235_s22  ;;  %v7692_v2 = vpop.permute.xlu0 %2656  ;;  %v7694_v4 = vpop.permute.xlu1 %2658 }
 0x5df   : > { %9827 = vst [vmem:[#allocation31_spill] sm:$0xff] %v7692_v2 }
 0x5e0   : > { %9828 = vst [vmem:[#allocation55_spill] sm:$0xff] %v7694_v4  ;;  %v7696_v23 = vpop.permute.xlu2 %2678 }
 0x5e1   : > { %9829 = vst [vmem:[#allocation62_spill] sm:$0xff] %v7696_v23 }
 0x5e4   : > { %2924 = vrot.lane.b32.xlu1 %v6912_v38, %s4236_s23  ;;  %2758 = vrot.lane.b32.xlu0 %v9830_v41, %s4234_s21 }
 0x5e6   : > { %2854 = vrot.lane.b32.xlu2 %v7352_v5, %s4235_s22  ;;  %v7704_v34 = vpop.permute.xlu0 %2662  ;;  %v7706_v21 = vpop.permute.xlu1 %2664 }
 0x5e8   : > { %v7708_v10 = vpop.permute.xlu2 %2684 }
 0x5e9   : > { %9831 = vst [vmem:[#allocation70_spill] sm:$0xff] %v7708_v10  ;;  %v9833_v10 = vld [vmem:[#allocation76_spill] sm:$0xff] }
 0x5ec   : > { %2950 = vrot.lane.b32.xlu1 %v7095_v48, %s4236_s23  ;;  %3020 = vrot.lane.b32.xlu0 %v9809_v9, %s4237_s24 }
 0x5ee   : > { %3116 = vrot.lane.b32.xlu2 %v7253_v47, %s4238_s25  ;;  %v7716_v38 = vpop.permute.xlu0 %2668  ;;  %v7718_v4 = vpop.permute.xlu1 %2670 }
 0x5f0   : > { %v7720_v2 = vpop.permute.xlu2 %2690 }
 0x5f1   : > { %9832 = vst [vmem:[#allocation88_spill] sm:$0xff] %v7720_v2  ;;  %v9836_v2 = vld [vmem:[#allocation137_spill] sm:$0xff] }
 0x5f4   : > { %3142 = vrot.lane.b32.xlu1 %v7359_v35, %s4238_s25  ;;  %3046 = vrot.lane.b32.xlu0 %v9833_v10, %s4237_s24 }
 0x5f6   : > { %2830 = vrot.lane.b32.xlu2 %v7256_v45, %s4235_s22  ;;  %v7728_v48 = vpop.permute.xlu0 %2674  ;;  %v7730_v9 = vpop.permute.xlu1 %2676 }
 0x5f7   : > { %9834 = vst [vmem:[#allocation109_spill] sm:$0xff] %v7728_v48 }
 0x5f8   : > { %9835 = vst [vmem:[#allocation114_spill] sm:$0xff] %v7730_v9  ;;  %v7732_v23 = vpop.permute.xlu2 %2728  ;;  %v3464_v9 = vld [vmem:[%s9020_s2 + $0x10] sm:$0xff] }
 0x5fc   : > { %2926 = vrot.lane.b32.xlu1 %v6967_v57, %s4236_s23  ;;  %2760 = vrot.lane.b32.xlu0 %v9836_v2, %s4234_s21 }
 0x5fe   : > { %2856 = vrot.lane.b32.xlu2 %v7349_v3, %s4235_s22  ;;  %v7740_v5 = vpop.permute.xlu0 %2680  ;;  %v7742_v41 = vpop.permute.xlu1 %2682 }
 0x5ff   : > { %9837 = vst [vmem:[#allocation139_spill] sm:$0xff] %v7740_v5 }
 0x600   : > { %9838 = vst [vmem:[#allocation48_spill] sm:$0xff] %v7742_v41  ;;  %v7744_v45 = vpop.permute.xlu2 %2734  ;;  %v9841_v41 = vld [vmem:[#allocation169_spill] sm:$0xff] }
 0x604   : > { %2952 = vrot.lane.b32.xlu1 %v7091_v51, %s4236_s23  ;;  %3022 = vrot.lane.b32.xlu0 %v9808_v6, %s4237_s24 }
 0x606   : > { %3118 = vrot.lane.b32.xlu2 %v7263_v62, %s4238_s25  ;;  %v7752_v57 = vpop.permute.xlu0 %2686  ;;  %v7754_v2 = vpop.permute.xlu1 %2688 }
 0x607   : > { %9839 = vst [vmem:[#allocation151_spill] sm:$0xff] %v7752_v57  ;;  %v3465_v57 = vld [vmem:[%s9020_s2 + $0x18] sm:$0xff] }
 0x608   : > { %9840 = vst [vmem:[#allocation175_spill] sm:$0xff] %v7754_v2  ;;  %v7756_v3 = vpop.permute.xlu2 %2740  ;;  %v3466_v2 = vld [vmem:[%s9020_s2 + $0x20] sm:$0xf] }
 0x609   : > { %4087 = vmatpush.msk.msra.mxu1 %vm1715_vm4, %v3466_v2  ;;  %4129 = vmatpush.msk.msra.mxu3 %vm1715_vm4, %v3466_v2 }
 0x60b   : > { %3578 = vmatpush.msra.mxu1 %v3465_v57  ;;  %4130 = vmatpush.msra.mxu3 %v3465_v57 }
 0x60c   : > { %3144 = vrot.lane.b32.xlu1 %v7377_v8, %s4238_s25  ;;  %3048 = vrot.lane.b32.xlu0 %v9841_v41, %s4237_s24 }
 0x60d   : > { %3579 = vmatpush.msra.mxu1 %v3464_v9  ;;  %4131 = vmatpush.msra.mxu3 %v3464_v9 }
 0x60e   : > { %2832 = vrot.lane.b32.xlu2 %v7253_v47, %s4235_s22  ;;  %v7764_v51 = vpop.permute.xlu0 %2692  ;;  %v2727_v6 = vpop.permute.xlu1 %2726 }
 0x60f   : > { %9842 = vst [vmem:[#allocation192_spill] sm:$0xff] %v7764_v51 }
 0x610   : > { %v7766_v5 = vpop.permute.xlu2 %2746 }
 0x611   : > { %9843 = vst [vmem:[#allocation195_spill] sm:$0xff] %v7766_v5  ;;  %v9844_v5 = vld [vmem:[#allocation118_spill] sm:$0xff] }
 0x614   : > { %2928 = vrot.lane.b32.xlu1 %v6963_v24, %s4236_s23  ;;  %2762 = vrot.lane.b32.xlu0 %v9833_v10, %s4234_s21  ;;  %v3463_v24 = vld [vmem:[%s9020_s2 + $0x8] sm:$0xff] }
 0x615   : > { %3580 = vmatpush.msra.mxu1 %v3463_v24  ;;  %4132 = vmatpush.msra.mxu3 %v3463_v24 }
 0x616   : > { %2858 = vrot.lane.b32.xlu2 %v7359_v35, %s4235_s22  ;;  %v7782_v47 = vpop.permute.xlu0 %2730  ;;  %v7784_v51 = vpop.permute.xlu1 %2732  ;;  %v3462_v35 = vld [vmem:[%s9020_s2] sm:$0xff] }
 0x617   : > { %3581 = vmatpush.msra.mxu1 %v3462_v35  ;;  %4133 = vmatpush.msra.mxu3 %v3462_v35 }
 0x618   : > { %v2823_v2 = vpop.permute.xlu2 %2822 }
 0x61c   : > { %2954 = vrot.lane.b32.xlu1 %v7102_v58, %s4236_s23  ;;  %3024 = vrot.lane.b32.xlu0 %v9810_v43, %s4237_s24 }
 0x61e   : > { %3120 = vrot.lane.b32.xlu2 %v7277_v12, %s4238_s25  ;;  %v7801_v10 = vpop.permute.xlu0 %2736  ;;  %v7803_v9 = vpop.permute.xlu1 %2738 }
 0x620   : > { %v3111_v57 = vpop.permute.xlu2 %3110 }
 0x624   : > { %3050 = vrot.lane.b32.xlu0 %v9844_v5, %s4237_s24  ;;  %3146 = vrot.lane.b32.xlu1 %v7374_v20, %s4238_s25 }
 0x626   : > { %2834 = vrot.lane.b32.xlu2 %v7263_v62, %s4235_s22  ;;  %v7811_v58 = vpop.permute.xlu0 %2742  ;;  %v7813_v43 = vpop.permute.xlu1 %2744  ;;  %v4190_v62 = vld [vmem:[#allocation2] sm:$0xff] }
 0x627   : > { %9845 = vst [vmem:[#allocation205_spill] sm:$0xff] %v7813_v43  ;;  %v3206_v49 = vsel %vm203_vm0, %v4190_v62, %v7283_v0 }
 0x628   : > { %v3017_v24 = vpop.permute.xlu2 %3016  ;;  %v3238_v43 = vsel %vm1382_vm5, %v3206_v49, %v7508_v25 }
 0x62c   : > { %2764 = vrot.lane.b32.xlu0 %v9841_v41, %s4234_s21  ;;  %2930 = vrot.lane.b32.xlu1 %v6980_v13, %s4236_s23  ;;  %v3270_v41 = vsel %vm1415_vm6, %v3238_v43, %v7600_v52 }
 0x62d   : > { %v3302_v13 = vsel %vm1448_vm8, %v3270_v41, %v2727_v6 }
 0x62e   : > { %2860 = vrot.lane.b32.xlu2 %v7377_v8, %s4235_s22  ;;  %v7821_v35 = vpop.permute.xlu0 %2748  ;;  %v7823_v48 = vpop.permute.xlu1 %2750  ;;  %v3334_v8 = vsel %vm1481_vm7, %v3302_v13, %v2823_v2  ;;  %v9849_v2 = vld [vmem:[#allocation159_spill] sm:$0xff] }
 0x62f   : > { %9846 = vst [vmem:[#allocation36_spill] sm:$0xff] %v7823_v48  ;;  %v9847_v48 = vld [vmem:[#allocation79_spill] sm:$0xff] }
 0x630   : > { %v2923_v18 = vpop.permute.xlu2 %2922 }
 0x634   : > { %3026 = vrot.lane.b32.xlu0 %v9815_v19, %s4237_s24  ;;  %2956 = vrot.lane.b32.xlu1 %v7104_v56, %s4236_s23  ;;  %v4191_v19 = vld [vmem:[#allocation2 + $0x8] sm:$0xff]  ;;  %v9848_v56 = vld [vmem:[#allocation95_spill] sm:$0xff] }
 0x635   : > { %v3207_v6 = vsel %vm203_vm0, %v4191_v19, %v9848_v56 }
 0x636   : > { %3122 = vrot.lane.b32.xlu2 %v9847_v48, %s4238_s25  ;;  %v2919_v0 = vpop.permute.xlu0 %2918  ;;  %v3015_v62 = vpop.permute.xlu1 %3014  ;;  %v3239_v41 = vsel %vm1382_vm5, %v3207_v6, %v7510_v22 }
 0x637   : > { %v3366_v25 = vsel %vm1514_vm9, %v3334_v8, %v2919_v0  ;;  %v3271_v13 = vsel %vm1415_vm6, %v3239_v41, %v7644_v54  ;;  %v9851_v41 = vld [vmem:[#allocation116_spill] sm:$0xff] }
 0x638   : > { %v2829_v49 = vpop.permute.xlu2 %2828  ;;  %v3398_v52 = vsel %vm1547_vm11, %v3366_v25, %v3015_v62  ;;  %v3303_v0 = vsel %vm1448_vm8, %v3271_v13, %v7732_v23  ;;  %v9850_v23 = vld [vmem:[#allocation171_spill] sm:$0xff] }
 0x639   : > { %v3430_v43 = vsel %vm1580_vm10, %v3398_v52, %v3111_v57 }
 0x63a   : > { %4088 = vmatmul.msk.f32.vlgmr.msra.gmra.mxu1 %vm1618_vm12, %v3430_v43  ;;  %v4192_v43 = vld [vmem:[#allocation2 + $0x18] sm:$0xff] }
 0x63b   : > { %v3208_v19 = vsel %vm203_vm0, %v4192_v43, %v9850_v23 }
 0x63c   : > { %3052 = vrot.lane.b32.xlu0 %v9849_v2, %s4237_s24  ;;  %3148 = vrot.lane.b32.xlu1 %v7384_v59, %s4238_s25  ;;  %v3240_v6 = vsel %vm1382_vm5, %v3208_v19, %v7476_v61 }
 0x63e   : > { %2836 = vrot.lane.b32.xlu2 %v7277_v12, %s4235_s22  ;;  %v2825_v57 = vpop.permute.xlu0 %2824  ;;  %v2921_v8 = vpop.permute.xlu1 %2920 }
 0x63f   : > { %v3335_v25 = vsel %vm1481_vm7, %v3303_v0, %v2825_v57  ;;  %v9852_v0 = vld [vmem:[#allocation143_spill] sm:$0xff] }
 0x640   : > { %v2855_v62 = vpop.permute.xlu2 %2854  ;;  %v3367_v52 = vsel %vm1514_vm9, %v3335_v25, %v2921_v8 }
 0x641   : > { %v3399_v54 = vsel %vm1547_vm11, %v3367_v52, %v3017_v24  ;;  %v4193_v52 = vld [vmem:[#allocation2 + $0x20] sm:$0xff] }
 0x644   : > { %2766 = vrot.lane.b32.xlu0 %v9844_v5, %s4234_s21  ;;  %2932 = vrot.lane.b32.xlu1 %v6982_v26, %s4236_s23  ;;  %v3272_v26 = vsel %vm1415_vm6, %v3240_v6, %v7646_v63  ;;  %v9855_v6 = vld [vmem:[#allocation162_spill] sm:$0xff] }
 0x646   : > { %2862 = vrot.lane.b32.xlu2 %v7374_v20, %s4235_s22  ;;  %v3113_v12 = vpop.permute.xlu0 %3112  ;;  %v2827_v22 = vpop.permute.xlu1 %2826  ;;  %v3304_v20 = vsel %vm1448_vm8, %v3272_v26, %v7782_v47 }
 0x647   : > { %v3431_v56 = vsel %vm1580_vm10, %v3399_v54, %v3113_v12  ;;  %v3336_v24 = vsel %vm1481_vm7, %v3304_v20, %v2827_v22  ;;  %v9854_v12 = vld [vmem:[#allocation60_spill] sm:$0xff] }
 0x648   : > { %v3117_v5 = vpop.permute.xlu2 %3116  ;;  %4089 = vmatmul.msk.f32.gmra.mxu1 %vm1618_vm12, %v3431_v56  ;;  %v3368_v13 = vsel %vm1514_vm9, %v3336_v24, %v2923_v18  ;;  %v3209_v22 = vsel %vm203_vm0, %v4193_v52, %v9854_v12  ;;  %v9856_v20 = vld [vmem:[#allocation152_spill] sm:$0xff] }
 0x649   : > { %v3241_v54 = vsel %vm1382_vm5, %v3209_v22, %v7520_v36 }
 0x64a   : > { %v3273_v43 = vsel %vm1415_vm6, %v3241_v54, %v7612_v11  ;;  %v3222_v11 = vsel %vm203_vm0, %v7045_v17, %v9855_v6 }
 0x64b   : > { %v3305_v23 = vsel %vm1448_vm8, %v3273_v43, %v7784_v51 }
 0x64c   : > { %3028 = vrot.lane.b32.xlu0 %v9814_v40, %s4237_s24  ;;  %2958 = vrot.lane.b32.xlu1 %v7123_v37, %s4236_s23  ;;  %v9853_v40 = vld [vmem:[#allocation184_spill] sm:$0xff] }
 0x64e   : > { %3124 = vrot.lane.b32.xlu2 %v9851_v41, %s4238_s25  ;;  %v3019_v61 = vpop.permute.xlu0 %3018  ;;  %v3115_v57 = vpop.permute.xlu1 %3114 }
 0x64f   : > { %v3400_v63 = vsel %vm1547_vm11, %v3368_v13, %v3019_v61 }
 0x650   : > { %v2831_v8 = vpop.permute.xlu2 %2830  ;;  %v3432_v47 = vsel %vm1580_vm10, %v3400_v63, %v3115_v57 }
 0x651   : > { %4090 = vmatmul.msk.f32.gmra.mxu1 %vm1618_vm12, %v3432_v47  ;;  %v4194_v47 = vld [vmem:[#allocation2 + $0x30] sm:$0xff] }
 0x654   : > { %3054 = vrot.lane.b32.xlu0 %v9852_v0, %s4237_s24  ;;  %3150 = vrot.lane.b32.xlu1 %v9853_v40, %s4238_s25 }
 0x656   : > { %2838 = vrot.lane.b32.xlu2 %v9847_v48, %s4235_s22  ;;  %v2759_v37 = vpop.permute.xlu0 %2758  ;;  %v2925_v25 = vpop.permute.xlu1 %2924  ;;  %v3337_v48 = vsel %vm1481_vm7, %v3305_v23, %v2829_v49  ;;  %v7959_v23 = vld [vmem:[#allocation2 + $0xc8] sm:$0xff] }
 0x657   : > { %v3369_v19 = vsel %vm1514_vm9, %v3337_v48, %v2925_v25 }
 0x658   : > { %v7893_v18 = vpop.permute.xlu2 %2856 }
 0x65c   : > { %2768 = vrot.lane.b32.xlu0 %v9849_v2, %s4234_s21  ;;  %2934 = vrot.lane.b32.xlu1 %v7007_v30, %s4236_s23  ;;  %v3254_v2 = vsel %vm1382_vm5, %v3222_v11, %v7570_v29 }
 0x65d   : > { %v3286_v49 = vsel %vm1415_vm6, %v3254_v2, %v7704_v34 }
 0x65e   : > { %2864 = vrot.lane.b32.xlu2 %v7384_v59, %s4235_s22  ;;  %v3021_v36 = vpop.permute.xlu0 %3020  ;;  %v2951_v56 = vpop.permute.xlu1 %2950  ;;  %v3318_v59 = vsel %vm1448_vm8, %v3286_v49, %v2759_v37  ;;  %v9859_v37 = vld [vmem:[#allocation57_spill] sm:$0xff]  ;;  %v9862_v49 = vld [vmem:[#allocation144_spill] sm:$0xff] }
 0x65f   : > { %v3401_v51 = vsel %vm1547_vm11, %v3369_v19, %v3021_v36  ;;  %v3350_v17 = vsel %vm1481_vm7, %v3318_v59, %v2855_v62  ;;  %v3210_v25 = vsel %vm203_vm0, %v4194_v47, %v9859_v37  ;;  %v9863_v37 = vld [vmem:[#allocation172_spill] sm:$0xff] }
 0x660   : > { %v3119_v26 = vpop.permute.xlu2 %3118  ;;  %v3433_v30 = vsel %vm1580_vm10, %v3401_v51, %v3117_v5  ;;  %v3382_v29 = vsel %vm1514_vm9, %v3350_v17, %v2951_v56  ;;  %v3242_v52 = vsel %vm1382_vm5, %v3210_v25, %v7522_v32  ;;  %v9860_v56 = vld [vmem:[#allocation140_spill] sm:$0xff] }
 0x661   : > { %4091 = vmatmul.msk.f32.gmra.mxu1 %vm1618_vm12, %v3433_v30  ;;  %v3274_v12 = vsel %vm1415_vm6, %v3242_v52, %v7656_v28  ;;  %v4197_v30 = vld [vmem:[#allocation2 + $0x38] sm:$0xff] }
 0x662   : > { %v3306_v22 = vsel %vm1448_vm8, %v3274_v12, %v7744_v45  ;;  %v3223_v45 = vsel %vm203_vm0, %v7959_v23, %v7439_v55  ;;  %v3211_v59 = vsel %vm203_vm0, %v4197_v30, %v9862_v49  ;;  %v9871_v49 = vld [vmem:[#allocation30_spill] sm:$0xff] }
 0x663   : > { %v3338_v54 = vsel %vm1481_vm7, %v3306_v22, %v2831_v8  ;;  %v3255_v48 = vsel %vm1382_vm5, %v3223_v45, %v7536_v7  ;;  %v3243_v17 = vsel %vm1382_vm5, %v3211_v59, %v7488_v50  ;;  %v8076_v59 = vld [vmem:[#allocation2 + $0x150] sm:$0xff] }
 0x664   : > { %3030 = vrot.lane.b32.xlu0 %v9816_v60, %s4237_s24  ;;  %2960 = vrot.lane.b32.xlu1 %v7121_v39, %s4236_s23  ;;  %v9857_v60 = vld [vmem:[#allocation82_spill] sm:$0xff]  ;;  %v3287_v36 = vsel %vm1415_vm6, %v3255_v48, %v7706_v21 }
 0x665   : > { %v9858_v39 = vld [vmem:[#allocation170_spill] sm:$0xff] }
 0x666   : > { %3126 = vrot.lane.b32.xlu2 %v9856_v20, %s4238_s25  ;;  %v3047_v5 = vpop.permute.xlu0 %3046  ;;  %v3143_v24 = vpop.permute.xlu1 %3142 }
 0x667   : > { %v3414_v34 = vsel %vm1547_vm11, %v3382_v29, %v3047_v5  ;;  %v3275_v29 = vsel %vm1415_vm6, %v3243_v17, %v7658_v44 }
 0x668   : > { %v2833_v61 = vpop.permute.xlu2 %2832  ;;  %v3446_v13 = vsel %vm1580_vm10, %v3414_v34, %v3143_v24  ;;  %v3307_v5 = vsel %vm1448_vm8, %v3275_v29, %v7801_v10 }
 0x669   : > { %4104 = vmatmul.msk.f32.vlgmr.msra.gmra.mxu3 %vm1618_vm12, %v3446_v13  ;;  %v3339_v24 = vsel %vm1481_vm7, %v3307_v5, %v2833_v61  ;;  %v8010_v13 = vld [vmem:[#allocation2 + $0xd8] sm:$0xff]  ;;  %v9872_v5 = vld [vmem:[#allocation123_spill] sm:$0xff] }
 0x66a   : > { %v3224_v10 = vsel %vm203_vm0, %v8010_v13, %v7441_v53 }
 0x66c   : > { %3056 = vrot.lane.b32.xlu0 %v9857_v60, %s4237_s24  ;;  %3152 = vrot.lane.b32.xlu1 %v9858_v39, %s4238_s25 }
 0x66e   : > { %2840 = vrot.lane.b32.xlu2 %v9851_v41, %s4235_s22  ;;  %v2761_v62 = vpop.permute.xlu0 %2760  ;;  %v2927_v57 = vpop.permute.xlu1 %2926  ;;  %v7951_v41 = vld [vmem:[#allocation2 + $0x98] sm:$0xff] }
 0x66f   : > { %v3370_v43 = vsel %vm1514_vm9, %v3338_v54, %v2927_v57 }
 0x670   : > { %v7939_v63 = vpop.permute.xlu2 %2858 }
 0x674   : > { %2770 = vrot.lane.b32.xlu0 %v9852_v0, %s4234_s21  ;;  %2936 = vrot.lane.b32.xlu1 %v7951_v41, %s4236_s23 }
 0x676   : > { %2866 = vrot.lane.b32.xlu2 %v9853_v40, %s4235_s22  ;;  %v3023_v32 = vpop.permute.xlu0 %3022  ;;  %v2953_v28 = vpop.permute.xlu1 %2952  ;;  %v3319_v40 = vsel %vm1448_vm8, %v3287_v36, %v2761_v62  ;;  %v3256_v62 = vsel %vm1382_vm5, %v3224_v10, %v7582_v15  ;;  %v9873_v10 = vld [vmem:[#allocation130_spill] sm:$0xff] }
 0x677   : > { %v3402_v0 = vsel %vm1547_vm11, %v3370_v43, %v3023_v32  ;;  %v3351_v55 = vsel %vm1481_vm7, %v3319_v40, %v7893_v18  ;;  %v3288_v47 = vsel %vm1415_vm6, %v3256_v62, %v7672_v1  ;;  %v4200_v32 = vld [vmem:[#allocation2 + $0x48] sm:$0xff]  ;;  %v8053_v40 = vld [vmem:[#allocation2 + $0xb0] sm:$0xff] }
 0x678   : > { %v3121_v19 = vpop.permute.xlu2 %3120  ;;  %v3434_v8 = vsel %vm1580_vm10, %v3402_v0, %v3119_v26  ;;  %v3383_v7 = vsel %vm1514_vm9, %v3351_v55, %v2953_v28  ;;  %v9866_v28 = vld [vmem:[#allocation54_spill] sm:$0xff]  ;;  %v9867_v0 = vld [vmem:[#allocation136_spill] sm:$0xff] }
 0x679   : > { %4092 = vmatmul.msk.f32.gmra.mxu1 %vm1618_vm12, %v3434_v8  ;;  %v3212_v45 = vsel %vm203_vm0, %v4200_v32, %v9866_v28  ;;  %v4206_v32 = vld [vmem:[#allocation2 + $0xf0] sm:$0xff] }
 0x67a   : > { %v3244_v48 = vsel %vm1382_vm5, %v3212_v45, %v9867_v0  ;;  %v9878_v45 = vld [vmem:[#allocation189_spill] sm:$0xff] }
 0x67c   : > { %3032 = vrot.lane.b32.xlu0 %v9821_v33, %s4237_s24  ;;  %2962 = vrot.lane.b32.xlu1 %v7152_v14, %s4236_s23  ;;  %v9861_v33 = vld [vmem:[#allocation105_spill] sm:$0xff] }
 0x67e   : > { %3128 = vrot.lane.b32.xlu2 %v9860_v56, %s4238_s25  ;;  %v3049_v6 = vpop.permute.xlu0 %3048  ;;  %v3145_v21 = vpop.permute.xlu1 %3144 }
 0x67f   : > { %v3415_v11 = vsel %vm1547_vm11, %v3383_v7, %v3049_v6 }
 0x680   : > { %v2835_v51 = vpop.permute.xlu2 %2834  ;;  %v3447_v2 = vsel %vm1580_vm10, %v3415_v11, %v3145_v21  ;;  %v8061_v21 = vld [vmem:[#allocation2 + $0xe0] sm:$0xff] }
 0x681   : > { %4105 = vmatmul.msk.f32.gmra.mxu3 %vm1618_vm12, %v3447_v2 }
 0x684   : > { %3058 = vrot.lane.b32.xlu0 %v9861_v33, %s4237_s24  ;;  %3154 = vrot.lane.b32.xlu1 %v7410_v46, %s4238_s25 }
 0x686   : > { %2842 = vrot.lane.b32.xlu2 %v9856_v20, %s4235_s22  ;;  %v2763_v14 = vpop.permute.xlu0 %2762  ;;  %v2929_v18 = vpop.permute.xlu1 %2928  ;;  %v8002_v20 = vld [vmem:[#allocation2 + $0xa8] sm:$0xff] }
 0x687   : > { %v3371_v34 = vsel %vm1514_vm9, %v3339_v24, %v2929_v18 }
 0x688   : > { %v7990_v26 = vpop.permute.xlu2 %2860 }
 0x68c   : > { %2772 = vrot.lane.b32.xlu0 %v9857_v60, %s4234_s21  ;;  %2938 = vrot.lane.b32.xlu1 %v8002_v20, %s4236_s23 }
 0x68e   : > { %2868 = vrot.lane.b32.xlu2 %v9858_v39, %s4235_s22  ;;  %v3025_v50 = vpop.permute.xlu0 %3024  ;;  %v2955_v44 = vpop.permute.xlu1 %2954  ;;  %v3320_v39 = vsel %vm1448_vm8, %v3288_v47, %v2763_v14  ;;  %v9875_v47 = vld [vmem:[#allocation188_spill] sm:$0xff] }
 0x68f   : > { %v3403_v60 = vsel %vm1547_vm11, %v3371_v34, %v3025_v50  ;;  %v3352_v53 = vsel %vm1481_vm7, %v3320_v39, %v7939_v63 }
 0x690   : > { %v3123_v57 = vpop.permute.xlu2 %3122  ;;  %v3435_v61 = vsel %vm1580_vm10, %v3403_v60, %v3121_v19  ;;  %v3384_v15 = vsel %vm1514_vm9, %v3352_v53, %v2955_v44  ;;  %v9868_v19 = vld [vmem:[#allocation104_spill] sm:$0xff]  ;;  %v9874_v60 = vld [vmem:[#allocation138_spill] sm:$0xff]  ;;  %v9876_v53 = vld [vmem:[#allocation45_spill] sm:$0xff] }
 0x691   : > { %4093 = vmatmul.msk.f32.gmra.mxu1 %vm1618_vm12, %v3435_v61  ;;  %v3276_v8 = vsel %vm1415_vm6, %v3244_v48, %v9868_v19  ;;  %v4204_v61 = vld [vmem:[#allocation2 + $0x50] sm:$0xff] }
 0x692   : > { %v3308_v36 = vsel %vm1448_vm8, %v3276_v8, %v7803_v9  ;;  %v9869_v9 = vld [vmem:[#allocation108_spill] sm:$0xff]  ;;  %v3213_v39 = vsel %vm203_vm0, %v4204_v61, %v9875_v47  ;;  %v9879_v19 = vld [vmem:[#allocation183_spill] sm:$0xff]  ;;  %v9886_v47 = vld [vmem:[#allocation206_spill] sm:$0xff] }
 0x693   : > { %v3340_v55 = vsel %vm1481_vm7, %v3308_v36, %v2835_v51  ;;  %v3225_v11 = vsel %vm203_vm0, %v8061_v21, %v9869_v9  ;;  %v8123_v8 = vld [vmem:[#allocation2 + $0x158] sm:$0xff] }
 0x694   : > { %3034 = vrot.lane.b32.xlu0 %v9820_v31, %s4237_s24  ;;  %2964 = vrot.lane.b32.xlu1 %v7148_v27, %s4236_s23  ;;  %v9864_v31 = vld [vmem:[#allocation99_spill] sm:$0xff]  ;;  %v9865_v27 = vld [vmem:[#allocation34_spill] sm:$0xff] }
 0x696   : > { %3130 = vrot.lane.b32.xlu2 %v9863_v37, %s4238_s25  ;;  %v3051_v25 = vpop.permute.xlu0 %3050  ;;  %v3147_v1 = vpop.permute.xlu1 %3146 }
 0x697   : > { %v3416_v52 = vsel %vm1547_vm11, %v3384_v15, %v3051_v25  ;;  %v3245_v15 = vsel %vm1382_vm5, %v3213_v39, %v9876_v53 }
 0x698   : > { %v2837_v12 = vpop.permute.xlu2 %2836  ;;  %v3448_v22 = vsel %vm1580_vm10, %v3416_v52, %v3147_v1  ;;  %v3277_v25 = vsel %vm1415_vm6, %v3245_v15, %v7668_v42  ;;  %v9877_v42 = vld [vmem:[#allocation187_spill] sm:$0xff]  ;;  %v9888_v15 = vld [vmem:[#allocation113_spill] sm:$0xff] }
 0x699   : > { %4106 = vmatmul.msk.f32.gmra.mxu3 %vm1618_vm12, %v3448_v22  ;;  %v3309_v1 = vsel %vm1448_vm8, %v3277_v25, %v7756_v3  ;;  %v3226_v28 = vsel %vm203_vm0, %v4206_v32, %v9877_v42  ;;  %v9889_v32 = vld [vmem:[#allocation120_spill] sm:$0xff]  ;;  %v9891_v42 = vld [vmem:[#allocation63_spill] sm:$0xff] }
 0x69a   : > { %v3341_v52 = vsel %vm1481_vm7, %v3309_v1, %v2837_v12 }
 0x69c   : > { %3060 = vrot.lane.b32.xlu0 %v9864_v31, %s4237_s24  ;;  %3156 = vrot.lane.b32.xlu1 %v9865_v27, %s4238_s25 }
 0x69e   : > { %2844 = vrot.lane.b32.xlu2 %v9860_v56, %s4235_s22  ;;  %v2765_v63 = vpop.permute.xlu0 %2764  ;;  %v2931_v54 = vpop.permute.xlu1 %2930 }
 0x69f   : > { %v3372_v7 = vsel %vm1514_vm9, %v3340_v55, %v2931_v54 }
 0x6a0   : > { %v8041_v43 = vpop.permute.xlu2 %2862 }
 0x6a4   : > { %2774 = vrot.lane.b32.xlu0 %v9861_v33, %s4234_s21  ;;  %2940 = vrot.lane.b32.xlu1 %v8053_v40, %s4236_s23  ;;  %v9870_v33 = vld [vmem:[#allocation86_spill] sm:$0xff] }
 0x6a5   : > { %v3257_v14 = vsel %vm1382_vm5, %v3225_v11, %v9870_v33  ;;  %v9882_v33 = vld [vmem:[#allocation156_spill] sm:$0xff] }
 0x6a6   : > { %2870 = vrot.lane.b32.xlu2 %v7410_v46, %s4235_s22  ;;  %v3027_v56 = vpop.permute.xlu0 %3026  ;;  %v2957_v6 = vpop.permute.xlu1 %2956  ;;  %v3289_v30 = vsel %vm1415_vm6, %v3257_v14, %v7716_v38 }
 0x6a7   : > { %v3404_v2 = vsel %vm1547_vm11, %v3372_v7, %v3027_v56  ;;  %v3321_v46 = vsel %vm1448_vm8, %v3289_v30, %v2765_v63  ;;  %v9880_v7 = vld [vmem:[#allocation97_spill] sm:$0xff] }
 0x6a8   : > { %v3125_v18 = vpop.permute.xlu2 %3124  ;;  %v3436_v51 = vsel %vm1580_vm10, %v3404_v2, %v3123_v57  ;;  %v3353_v17 = vsel %vm1481_vm7, %v3321_v46, %v7990_v26  ;;  %v9881_v2 = vld [vmem:[#allocation145_spill] sm:$0xff] }
 0x6a9   : > { %4094 = vmatmul.msk.f32.gmra.mxu1 %vm1618_vm12, %v3436_v51  ;;  %v3385_v29 = vsel %vm1514_vm9, %v3353_v17, %v2957_v6  ;;  %v4208_v51 = vld [vmem:[#allocation2 + $0x60] sm:$0xff]  ;;  %v9884_v17 = vld [vmem:[#allocation190_spill] sm:$0xff] }
 0x6aa   : > { %v9883_v30 = vld [vmem:[#allocation185_spill] sm:$0xff] }
 0x6ab   : > { %v3214_v46 = vsel %vm203_vm0, %v4208_v51, %v9883_v30  ;;  %v9896_v51 = vld [vmem:[#allocation147_spill] sm:$0xff] }
 0x6ac   : > { %3036 = vrot.lane.b32.xlu0 %v9871_v49, %s4237_s24  ;;  %2966 = vrot.lane.b32.xlu1 %v8076_v59, %s4236_s23 }
 0x6ae   : > { %3132 = vrot.lane.b32.xlu2 %v9872_v5, %s4238_s25  ;;  %v3053_v38 = vpop.permute.xlu0 %3052  ;;  %v3149_v24 = vpop.permute.xlu1 %3148 }
 0x6af   : > { %v3417_v34 = vsel %vm1547_vm11, %v3385_v29, %v3053_v38  ;;  %v3246_v29 = vsel %vm1382_vm5, %v3214_v46, %v9884_v17 }
 0x6b0   : > { %v2839_v50 = vpop.permute.xlu2 %2838  ;;  %v3449_v44 = vsel %vm1580_vm10, %v3417_v34, %v3149_v24  ;;  %v3278_v38 = vsel %vm1415_vm6, %v3246_v29, %v7670_v16  ;;  %v9897_v29 = vld [vmem:[#allocation210_spill] sm:$0xff] }
 0x6b1   : > { %4107 = vmatmul.msk.f32.gmra.mxu3 %vm1618_vm12, %v3449_v44  ;;  %v3310_v24 = vsel %vm1448_vm8, %v3278_v38, %v7811_v58 }
 0x6b4   : > { %3062 = vrot.lane.b32.xlu0 %v9873_v10, %s4237_s24  ;;  %3158 = vrot.lane.b32.xlu1 %v9874_v60, %s4238_s25 }
 0x6b6   : > { %2846 = vrot.lane.b32.xlu2 %v9863_v37, %s4235_s22  ;;  %v2767_v26 = vpop.permute.xlu0 %2766  ;;  %v2933_v62 = vpop.permute.xlu1 %2932  ;;  %v4205_v37 = vld [vmem:[#allocation2 + $0xc0] sm:$0xff] }
 0x6b7   : > { %v3373_v22 = vsel %vm1514_vm9, %v3341_v52, %v2933_v62  ;;  %v9885_v62 = vld [vmem:[#allocation100_spill] sm:$0xff] }
 0x6b8   : > { %v8094_v57 = vpop.permute.xlu2 %2864 }
 0x6bc   : > { %2776 = vrot.lane.b32.xlu0 %v9864_v31, %s4234_s21  ;;  %2942 = vrot.lane.b32.xlu1 %v4205_v37, %s4236_s23  ;;  %v3258_v31 = vsel %vm1382_vm5, %v3226_v28, %v9878_v45  ;;  %v8176_v37 = vld [vmem:[#allocation2 + $0x168] sm:$0xff] }
 0x6bd   : > { %v3290_v12 = vsel %vm1415_vm6, %v3258_v31, %v7718_v4  ;;  %v4211_v31 = vld [vmem:[#allocation2 + $0x68] sm:$0xff] }
 0x6be   : > { %2872 = vrot.lane.b32.xlu2 %v9865_v27, %s4235_s22  ;;  %v3029_v63 = vpop.permute.xlu0 %3028  ;;  %v2959_v54 = vpop.permute.xlu1 %2958  ;;  %v3322_v27 = vsel %vm1448_vm8, %v3290_v12, %v2767_v26  ;;  %v4209_v26 = vld [vmem:[#allocation2 + $0xf8] sm:$0xff]  ;;  %v9893_v12 = vld [vmem:[#allocation149_spill] sm:$0xff] }
 0x6bf   : > { %v3405_v3 = vsel %vm1547_vm11, %v3373_v22, %v3029_v63  ;;  %v3354_v36 = vsel %vm1481_vm7, %v3322_v27, %v8041_v43  ;;  %v3227_v16 = vsel %vm203_vm0, %v4209_v26, %v9885_v62 }
 0x6c0   : > { %v3127_v0 = vpop.permute.xlu2 %3126  ;;  %v3437_v48 = vsel %vm1580_vm10, %v3405_v3, %v3125_v18  ;;  %v3386_v55 = vsel %vm1514_vm9, %v3354_v36, %v2959_v54  ;;  %v9894_v36 = vld [vmem:[#allocation148_spill] sm:$0xff] }
 0x6c1   : > { %4095 = vmatmul.msk.f32.gmra.mxu1 %vm1618_vm12, %v3437_v48 }
 0x6c4   : > { %3038 = vrot.lane.b32.xlu0 %v9879_v19, %s4237_s24  ;;  %2968 = vrot.lane.b32.xlu1 %v8123_v8, %s4236_s23 }
 0x6c6   : > { %3134 = vrot.lane.b32.xlu2 %v9880_v7, %s4238_s25  ;;  %v3055_v4 = vpop.permute.xlu0 %3054  ;;  %v3151_v56 = vpop.permute.xlu1 %3150 }
 0x6c7   : > { %v3418_v6 = vsel %vm1547_vm11, %v3386_v55, %v3055_v4  ;;  %v9895_v4 = vld [vmem:[#allocation205_spill] sm:$0xff] }
 0x6c8   : > { %v2841_v9 = vpop.permute.xlu2 %2840  ;;  %v3450_v11 = vsel %vm1580_vm10, %v3418_v6, %v3151_v56 }
 0x6c9   : > { %4108 = vmatmul.msk.f32.gmra.mxu3 %vm1618_vm12, %v3450_v11 }
 0x6cc   : > { %3064 = vrot.lane.b32.xlu0 %v9881_v2, %s4237_s24  ;;  %3160 = vrot.lane.b32.xlu1 %v9882_v33, %s4238_s25 }
 0x6ce   : > { %2752 = vrot.lane.b32.xlu2 %v9871_v49, %s4234_s21  ;;  %v2769_v43 = vpop.permute.xlu0 %2768  ;;  %v2935_v14 = vpop.permute.xlu1 %2934  ;;  %v3342_v49 = vsel %vm1481_vm7, %v3310_v24, %v2839_v50  ;;  %v9887_v50 = vld [vmem:[#allocation200_spill] sm:$0xff] }
 0x6cf   : > { %v3374_v34 = vsel %vm1514_vm9, %v3342_v49, %v2935_v14  ;;  %v4212_v14 = vld [vmem:[#allocation2 + $0x108] sm:$0xff] }
 0x6d0   : > { %v8141_v18 = vpop.permute.xlu2 %2866  ;;  %v3228_v30 = vsel %vm203_vm0, %v4212_v14, %v9896_v51 }
 0x6d4   : > { %2848 = vrot.lane.b32.xlu0 %v9872_v5, %s4235_s22  ;;  %2778 = vrot.lane.b32.xlu1 %v9873_v10, %s4234_s21  ;;  %v3259_v5 = vsel %vm1382_vm5, %v3227_v16, %v9886_v47 }
 0x6d5   : > { %v3291_v53 = vsel %vm1415_vm6, %v3259_v5, %v9887_v50  ;;  %v9902_v50 = vld [vmem:[#allocation135_spill] sm:$0xff] }
 0x6d6   : > { %2944 = vrot.lane.b32.xlu2 %v7959_v23, %s4236_s23  ;;  %v3031_v44 = vpop.permute.xlu0 %3030  ;;  %v2961_v61 = vpop.permute.xlu1 %2960  ;;  %v3323_v23 = vsel %vm1448_vm8, %v3291_v53, %v2769_v43 }
 0x6d7   : > { %v3406_v58 = vsel %vm1547_vm11, %v3374_v34, %v3031_v44  ;;  %v3355_v25 = vsel %vm1481_vm7, %v3323_v23, %v8094_v57  ;;  %v9890_v57 = vld [vmem:[#allocation35_spill] sm:$0xff]  ;;  %v9903_v23 = vld [vmem:[#allocation81_spill] sm:$0xff] }
 0x6d8   : > { %v3129_v39 = vpop.permute.xlu2 %3128  ;;  %v3438_v10 = vsel %vm1580_vm10, %v3406_v58, %v3127_v0  ;;  %v3387_v1 = vsel %vm1514_vm9, %v3355_v25, %v2961_v61  ;;  %v9892_v0 = vld [vmem:[#allocation103_spill] sm:$0xff] }
 0x6d9   : > { %4096 = vmatmul.msk.f32.gmra.mxu1 %vm1618_vm12, %v3438_v10  ;;  %v3215_v48 = vsel %vm203_vm0, %v4211_v31, %v9892_v0  ;;  %v9899_v44 = vld [vmem:[#allocation71_spill] sm:$0xff]  ;;  %v4214_v10 = vld [vmem:[#allocation2 + $0x78] sm:$0xff] }
 0x6da   : > { %v3247_v27 = vsel %vm1382_vm5, %v3215_v48, %v9893_v12  ;;  %v3216_v53 = vsel %vm203_vm0, %v4214_v10, %v9902_v50  ;;  %v4215_v0 = vld [vmem:[#allocation2 + $0x110] sm:$0xff]  ;;  %v9907_v48 = vld [vmem:[#allocation125_spill] sm:$0xff] }
 0x6db   : > { %v3279_v55 = vsel %vm1415_vm6, %v3247_v27, %v9894_v36  ;;  %v3248_v25 = vsel %vm1382_vm5, %v3216_v53, %v9903_v23  ;;  %v3229_v12 = vsel %vm203_vm0, %v4215_v0, %v9907_v48  ;;  %v2200_v23 = vld [vmem:[#allocation2 + $0x190] sm:$0x3] }
 0x6dc   : > { %2874 = vrot.lane.b32.xlu0 %v9874_v60, %s4235_s22  ;;  %3040 = vrot.lane.b32.xlu1 %v9888_v15, %s4237_s24  ;;  %v3311_v56 = vsel %vm1448_vm8, %v3279_v55, %v9895_v4  ;;  %v9908_v55 = vld [vmem:[#allocation124_spill] sm:$0xff] }
 0x6dd   : > { %v3343_v6 = vsel %vm1481_vm7, %v3311_v56, %v2841_v9  ;;  %v9898_v9 = vld [vmem:[#allocation109_spill] sm:$0xff]  ;;  %v3261_v4 = vsel %vm1382_vm5, %v3229_v12, %v9908_v55 }
 0x6de   : > { %2970 = vrot.lane.b32.xlu2 %v8176_v37, %s4236_s23  ;;  %v3057_v52 = vpop.permute.xlu0 %3056  ;;  %v3153_v63 = vpop.permute.xlu1 %3152 }
 0x6df   : > { %v3419_v22 = vsel %vm1547_vm11, %v3387_v1, %v3057_v52  ;;  %v9904_v1 = vld [vmem:[#allocation186_spill] sm:$0xff] }
 0x6e0   : > { %v2843_v54 = vpop.permute.xlu2 %2842  ;;  %v3451_v60 = vsel %vm1580_vm10, %v3419_v22, %v3153_v63  ;;  %v3280_v52 = vsel %vm1415_vm6, %v3248_v25, %v9904_v1  ;;  %v9905_v22 = vld [vmem:[#allocation195_spill] sm:$0xff]  ;;  %v4217_v25 = vld [vmem:[#allocation2 + $0x120] sm:$0xff]  ;;  %v9917_v1 = vld [vmem:[#allocation146_spill] sm:$0xff] }
 0x6e1   : > { %4109 = vmatmul.msk.f32.gmra.mxu3 %vm1618_vm12, %v3451_v60  ;;  %v3312_v63 = vsel %vm1448_vm8, %v3280_v52, %v9905_v22  ;;  %v9906_v60 = vld [vmem:[#allocation173_spill] sm:$0xff]  ;;  %v3230_v52 = vsel %vm203_vm0, %v4217_v25, %v9917_v1 }
 0x6e4   : > { %3136 = vrot.lane.b32.xlu0 %v9889_v32, %s4238_s25  ;;  %3066 = vrot.lane.b32.xlu1 %v9890_v57, %s4237_s24 }
 0x6e6   : > { %3162 = vrot.lane.b32.xlu2 %v9891_v42, %s4238_s25  ;;  %v2771_v28 = vpop.permute.xlu0 %2770  ;;  %v2937_v3 = vpop.permute.xlu1 %2936 }
 0x6e7   : > { %v3375_v11 = vsel %vm1514_vm9, %v3343_v6, %v2937_v3 }
 0x6e8   : > { %v8189_v45 = vpop.permute.xlu2 %2868 }
 0x6ec   : > { %2754 = vrot.lane.b32.xlu0 %v9879_v19, %s4234_s21  ;;  %2850 = vrot.lane.b32.xlu1 %v9880_v7, %s4235_s22  ;;  %v3260_v19 = vsel %vm1382_vm5, %v3228_v30, %v9897_v29 }
 0x6ed   : > { %v3292_v24 = vsel %vm1415_vm6, %v3260_v19, %v9898_v9 }
 0x6ee   : > { %2780 = vrot.lane.b32.xlu2 %v9881_v2, %s4234_s21  ;;  %v3033_v43 = vpop.permute.xlu0 %3032  ;;  %v2963_v17 = vpop.permute.xlu1 %2962  ;;  %v3324_v2 = vsel %vm1448_vm8, %v3292_v24, %v2771_v28  ;;  %v3344_v28 = vsel %vm1481_vm7, %v3312_v63, %v2843_v54  ;;  %v9909_v54 = vld [vmem:[#allocation114_spill] sm:$0xff]  ;;  %v9918_v63 = vld [vmem:[#allocation49_spill] sm:$0xff] }
 0x6ef   : > { %v3407_v46 = vsel %vm1547_vm11, %v3375_v11, %v3033_v43  ;;  %v3356_v49 = vsel %vm1481_vm7, %v3324_v2, %v8141_v18  ;;  %v9901_v18 = vld [vmem:[#allocation167_spill] sm:$0xff]  ;;  %v3293_v6 = vsel %vm1415_vm6, %v3261_v4, %v9909_v54 }
 0x6f0   : > { %v3131_v38 = vpop.permute.xlu2 %3130  ;;  %v3439_v7 = vsel %vm1580_vm10, %v3407_v46, %v3129_v39  ;;  %v3388_v34 = vsel %vm1514_vm9, %v3356_v49, %v2963_v17  ;;  %v4216_v49 = vld [vmem:[#allocation2 + $0x80] sm:$0xff] }
 0x6f1   : > { %4097 = vmatmul.msk.f32.gmra.mxu1 %vm1618_vm12, %v3439_v7 }
 0x6f4   : > { %2946 = vrot.lane.b32.xlu0 %v8010_v13, %s4236_s23  ;;  %2876 = vrot.lane.b32.xlu1 %v9882_v33, %s4235_s22  ;;  %v8229_v13 = vld [vmem:[#allocation2 + $0x170] sm:$0xff]  ;;  %v9900_v33 = vld [vmem:[#allocation77_spill] sm:$0xff] }
 0x6f6   : > { %3042 = vrot.lane.b32.xlu2 %v9899_v44, %s4237_s24  ;;  %v3059_v26 = vpop.permute.xlu0 %3058  ;;  %v3155_v16 = vpop.permute.xlu1 %3154 }
 0x6f7   : > { %v3420_v62 = vsel %vm1547_vm11, %v3388_v34, %v3059_v26  ;;  %v9914_v34 = vld [vmem:[#allocation133_spill] sm:$0xff]  ;;  %v9915_v26 = vld [vmem:[#allocation106_spill] sm:$0xff] }
 0x6f8   : > { %v2845_v58 = vpop.permute.xlu2 %2844  ;;  %v3452_v61 = vsel %vm1580_vm10, %v3420_v62, %v3155_v16  ;;  %v3217_v44 = vsel %vm203_vm0, %v4216_v49, %v9914_v34  ;;  %v9916_v16 = vld [vmem:[#allocation201_spill] sm:$0xff]  ;;  %v9923_v49 = vld [vmem:[#allocation36_spill] sm:$0xff] }
 0x6f9   : > { %4110 = vmatmul.msk.f32.gmra.mxu3 %vm1618_vm12, %v3452_v61  ;;  %v3249_v62 = vsel %vm1382_vm5, %v3217_v44, %v9915_v26 }
 0x6fa   : > { %v3281_v61 = vsel %vm1415_vm6, %v3249_v62, %v9916_v16  ;;  %v4219_v16 = vld [vmem:[#allocation2 + $0x128] sm:$0xff] }
 0x6fc   : > { %2972 = vrot.lane.b32.xlu0 %v8229_v13, %s4236_s23  ;;  %3138 = vrot.lane.b32.xlu1 %v9900_v33, %s4238_s25 }
 0x6fe   : > { %3068 = vrot.lane.b32.xlu2 %v9901_v18, %s4237_s24  ;;  %v2773_v47 = vpop.permute.xlu0 %2772  ;;  %v2939_v5 = vpop.permute.xlu1 %2938 }
 0x6ff   : > { %v3376_v3 = vsel %vm1514_vm9, %v3344_v28, %v2939_v5  ;;  %v3313_v5 = vsel %vm1448_vm8, %v3281_v61, %v7821_v35  ;;  %v3262_v28 = vsel %vm1382_vm5, %v3230_v52, %v9918_v63  ;;  %v9924_v61 = vld [vmem:[#allocation119_spill] sm:$0xff]  ;;  %v2203_v52 = vld [vmem:[#allocation2 + $0x1a8] sm:$0x3] }
 0x700   : > { %v8237_v39 = vpop.permute.xlu2 %2870  ;;  %v3345_v10 = vsel %vm1481_vm7, %v3313_v5, %v2845_v58  ;;  %v2436_v63 = vrot.slane %v2203_v52, 2 }
 0x704   : > { %3164 = vrot.lane.b32.xlu0 %v9906_v60, %s4238_s25  ;;  %2756 = vrot.lane.b32.xlu1 %v9888_v15, %s4234_s21 }
 0x706   : > { %2852 = vrot.lane.b32.xlu2 %v9889_v32, %s4235_s22  ;;  %v3035_v31 = vpop.permute.xlu0 %3034  ;;  %v2965_v36 = vpop.permute.xlu1 %2964  ;;  %v3325_v32 = vsel %vm1448_vm8, %v3293_v6, %v2773_v47  ;;  %v2201_v6 = vld [vmem:[#allocation2 + $0x198] sm:$0xff] }
 0x707   : > { %v3408_v27 = vsel %vm1547_vm11, %v3376_v3, %v3035_v31  ;;  %v3357_v11 = vsel %vm1481_vm7, %v3325_v32, %v8189_v45  ;;  %v9912_v45 = vld [vmem:[#allocation179_spill] sm:$0xff]  ;;  %v9919_v31 = vld [vmem:[#allocation62_spill] sm:$0xff]  ;;  %v2202_v32 = vld [vmem:[#allocation2 + $0x1a0] sm:$0xff] }
 0x708   : > { %v3133_v56 = vpop.permute.xlu2 %3132  ;;  %v3440_v15 = vsel %vm1580_vm10, %v3408_v27, %v3131_v38  ;;  %v3389_v43 = vsel %vm1514_vm9, %v3357_v11, %v2965_v36  ;;  %v9913_v38 = vld [vmem:[#allocation198_spill] sm:$0xff]  ;;  %v3294_v0 = vsel %vm1415_vm6, %v3262_v28, %v9919_v31  ;;  %v2428_v11 = vrot.slane %v2201_v6, 1 }
 0x709   : > { %4098 = vmatmul.msk.f32.gmra.mxu1 %vm1618_vm12, %v3440_v15  ;;  %v2416_v7 = vrot.slane %v9913_v38, 1  ;;  %v2421_v9 = vrot.slane %v9913_v38, 2  ;;  %v2423_v15 = vrot.slane %v2200_v23, 2 }
 0x70c   : > { %2782 = vrot.lane.b32.xlu0 %v9890_v57, %s4234_s21  ;;  %2948 = vrot.lane.b32.xlu1 %v8061_v21, %s4236_s23  ;;  %v9910_v21 = vld [vmem:[#allocation137_spill] sm:$0xff]  ;;  %v9911_v57 = vld [vmem:[#allocation56_spill] sm:$0xff] }
 0x70d   : > { %v2415_v29 = vrot.slane %v9911_v57, 1  ;;  %v2420_v19 = vrot.slane %v9911_v57, 2 }
 0x70e   : > { %2878 = vrot.lane.b32.xlu2 %v9891_v42, %s4235_s22  ;;  %v3061_v14 = vpop.permute.xlu0 %3060  ;;  %v3157_v30 = vpop.permute.xlu1 %3156 }
 0x70f   : > { %v3421_v51 = vsel %vm1547_vm11, %v3389_v43, %v3061_v14  ;;  %v2417_v33 = vsel %vm394_vm1, %v2415_v29, %v2416_v7  ;;  %v2422_v47 = vsel %vm475_vm3, %v2420_v19, %v2421_v9  ;;  %v2429_v43 = vrot.slane %v2202_v32, 1  ;;  %v9921_v19 = vld [vmem:[#allocation92_spill] sm:$0xff] }
 0x710   : > { %v8275_v46 = vpop.permute.xlu2 %2846  ;;  %v3453_v17 = vsel %vm1580_vm10, %v3421_v51, %v3157_v30  ;;  %v2433_v30 = vrot.slane %v2201_v6, 2  ;;  %v2434_v29 = vrot.slane %v2202_v32, 2 }
 0x711   : > { %4111 = vmatmul.msk.f32.gmra.mxu3 %vm1618_vm12, %v3453_v17 }
 0x714   : > { %3044 = vrot.lane.b32.xlu0 %v9910_v21, %s4237_s24  ;;  %2974 = vrot.lane.b32.xlu1 %v9911_v57, %s4236_s23  ;;  %v4218_v21 = vld [vmem:[#allocation2 + $0x90] sm:$0xff]  ;;  %v9920_v57 = vld [vmem:[#allocation42_spill] sm:$0xff] }
 0x716   : > { %3140 = vrot.lane.b32.xlu2 %v9912_v45, %s4238_s25  ;;  %v2775_v42 = vpop.permute.xlu0 %2774  ;;  %v2941_v24 = vpop.permute.xlu1 %2940  ;;  %v3218_v45 = vsel %vm203_vm0, %v4218_v21, %v9920_v57 }
 0x717   : > { %v3377_v50 = vsel %vm1514_vm9, %v3345_v10, %v2941_v24  ;;  %v3326_v48 = vsel %vm1448_vm8, %v3294_v0, %v2775_v42  ;;  %v2430_v42 = vsel %vm394_vm1, %v2428_v11, %v2429_v43  ;;  %v2435_v24 = vsel %vm475_vm3, %v2433_v30, %v2434_v29  ;;  %v9925_v10 = vld [vmem:[#allocation158_spill] sm:$0xff] }
 0x718   : > { %v8289_v2 = vpop.permute.xlu2 %2872  ;;  %v3358_v12 = vsel %vm1481_vm7, %v3326_v48, %v8237_v39  ;;  %v2424_v39 = vsel %vm475_vm3, %v2421_v9, %v2423_v15  ;;  %v2437_v48 = vsel %vm475_vm3, %v2434_v29, %v2436_v63  ;;  %v9928_v15 = vld [vmem:[#allocation89_spill] sm:$0xff] }
 0x719   : > { %v9937_v63 = vld [vmem:[#allocation69_spill] sm:$0xff] }
 0x71c   : > { %3070 = vrot.lane.b32.xlu0 %v2417_v33, %s4237_s24  ;;  %3166 = vrot.lane.b32.xlu1 %v2422_v47, %s4238_s25 }
 0x71e   : > { %2784 = vrot.lane.b32.xlu2 %v9901_v18, %s4234_s21  ;;  %v3037_v53 = vpop.permute.xlu0 %3036  ;;  %v2967_v35 = vpop.permute.xlu1 %2966  ;;  %v2418_v18 = vrot.slane %v2200_v23, 1  ;;  %v9926_v23 = vld [vmem:[#allocation139_spill] sm:$0xff] }
 0x71f   : > { %v3409_v22 = vsel %vm1547_vm11, %v3377_v50, %v3037_v53  ;;  %v3390_v36 = vsel %vm1514_vm9, %v3358_v12, %v2967_v35  ;;  %v2431_v35 = vrot.slane %v2203_v52, 1  ;;  %v4221_v52 = vld [vmem:[#allocation2 + $0x140] sm:$0xff] }
 0x720   : > { %v3135_v3 = vpop.permute.xlu2 %3134  ;;  %v3441_v58 = vsel %vm1580_vm10, %v3409_v22, %v3133_v56  ;;  %v2419_v27 = vsel %vm394_vm1, %v2416_v7, %v2418_v18  ;;  %v9922_v7 = vld [vmem:[#allocation59_spill] sm:$0xff] }
 0x721   : > { %4099 = vmatmul.msk.f32.gmra.mxu1 %vm1618_vm12, %v3441_v58  ;;  %v2432_v18 = vsel %vm394_vm1, %v2429_v43, %v2431_v35  ;;  %v9930_v43 = vld [vmem:[#allocation31_spill] sm:$0xff] }
 0x724   : > { %2880 = vrot.lane.b32.xlu0 %v9906_v60, %s4235_s22  ;;  %2976 = vrot.lane.b32.xlu1 %v9913_v38, %s4236_s23  ;;  %v3250_v38 = vsel %vm1382_vm5, %v3218_v45, %v9921_v19 }
 0x725   : > { %v3282_v9 = vsel %vm1415_vm6, %v3250_v38, %v9922_v7 }
 0x726   : > { %3072 = vrot.lane.b32.xlu2 %v2419_v27, %s4237_s24  ;;  %v3063_v55 = vpop.permute.xlu0 %3062  ;;  %v3159_v56 = vpop.permute.xlu1 %3158  ;;  %v3314_v34 = vsel %vm1448_vm8, %v3282_v9, %v9923_v49 }
 0x727   : > { %v3422_v4 = vsel %vm1547_vm11, %v3390_v36, %v3063_v55  ;;  %v3346_v44 = vsel %vm1481_vm7, %v3314_v34, %v8275_v46  ;;  %v9927_v36 = vld [vmem:[#allocation182_spill] sm:$0xff] }
 0x728   : > { %v8327_v54 = vpop.permute.xlu2 %2752  ;;  %v3454_v60 = vsel %vm1580_vm10, %v3422_v4, %v3159_v56  ;;  %v3219_v55 = vsel %vm203_vm0, %v7951_v41, %v9927_v36  ;;  %v9932_v41 = vld [vmem:[#allocation48_spill] sm:$0xff] }
 0x729   : > { %4112 = vmatmul.msk.f32.gmra.mxu3 %vm1618_vm12, %v3454_v60  ;;  %v3251_v60 = vsel %vm1382_vm5, %v3219_v55, %v9928_v15 }
 0x72c   : > { %3168 = vrot.lane.b32.xlu0 %v2424_v39, %s4238_s25  ;;  %2786 = vrot.lane.b32.xlu1 %v2417_v33, %s4234_s21  ;;  %v3231_v33 = vsel %vm203_vm0, %v4219_v16, %v9924_v61  ;;  %v9933_v16 = vld [vmem:[#allocation87_spill] sm:$0xff] }
 0x72d   : > { %v3263_v50 = vsel %vm1382_vm5, %v3231_v33, %v9925_v10  ;;  %v3220_v61 = vsel %vm203_vm0, %v8002_v20, %v9933_v16  ;;  %v9934_v33 = vld [vmem:[#allocation111_spill] sm:$0xff] }
 0x72e   : > { %2882 = vrot.lane.b32.xlu2 %v2422_v47, %s4235_s22  ;;  %v2777_v14 = vpop.permute.xlu0 %2776  ;;  %v2943_v51 = vpop.permute.xlu1 %2942  ;;  %v3295_v46 = vsel %vm1415_vm6, %v3263_v50, %v9926_v23  ;;  %v9935_v10 = vld [vmem:[#allocation55_spill] sm:$0xff] }
 0x72f   : > { %v3378_v26 = vsel %vm1514_vm9, %v3346_v44, %v2943_v51  ;;  %v3327_v25 = vsel %vm1448_vm8, %v3295_v46, %v2777_v14  ;;  %v3283_v14 = vsel %vm1415_vm6, %v3251_v60, %v9930_v43  ;;  %v9931_v51 = vld [vmem:[#allocation39_spill] sm:$0xff] }
 0x730   : > { %v2945_v17 = vpop.permute.xlu2 %2944  ;;  %v3359_v22 = vsel %vm1481_vm7, %v3327_v25, %v8289_v2  ;;  %v3315_v21 = vsel %vm1448_vm8, %v3283_v14, %v8327_v54  ;;  %v9941_v14 = vld [vmem:[#allocation166_spill] sm:$0xff] }
 0x734   : > { %2978 = vrot.lane.b32.xlu0 %v2201_v6, %s4236_s23  ;;  %3074 = vrot.lane.b32.xlu1 %v2430_v42, %s4237_s24 }
 0x736   : > { %v3039_v62 = vpop.permute.xlu0 %3038  ;;  %3170 = vrot.lane.b32.xlu2 %v2435_v24, %s4238_s25  ;;  %v2969_v5 = vpop.permute.xlu1 %2968 }
 0x737   : > { %v3410_v47 = vsel %vm1547_vm11, %v3378_v26, %v3039_v62  ;;  %v3391_v28 = vsel %vm1514_vm9, %v3359_v22, %v2969_v5  ;;  %v9936_v22 = vld [vmem:[#allocation164_spill] sm:$0xff] }
 0x738   : > { %v3442_v53 = vsel %vm1580_vm10, %v3410_v47, %v3135_v3  ;;  %v2971_v1 = vpop.permute.xlu2 %2970  ;;  %v3252_v47 = vsel %vm1382_vm5, %v3220_v61, %v9934_v33  ;;  %v3233_v35 = vsel %vm203_vm0, %v4221_v52, %v9936_v22  ;;  %v9945_v33 = vld [vmem:[#allocation181_spill] sm:$0xff] }
 0x739   : > { %4100 = vmatmul.msk.f32.gmra.mxu1 %vm1618_vm12, %v3442_v53  ;;  %v3284_v50 = vsel %vm1415_vm6, %v3252_v47, %v9935_v10  ;;  %v3235_v47 = vsel %vm203_vm0, %v8123_v8, %v9945_v33  ;;  %v9946_v10 = vld [vmem:[#allocation176_spill] sm:$0xff] }
 0x73c   : > { %2788 = vrot.lane.b32.xlu0 %v2419_v27, %s4234_s21  ;;  %2884 = vrot.lane.b32.xlu1 %v2424_v39, %s4235_s22  ;;  %v9929_v39 = vld [vmem:[#allocation160_spill] sm:$0xff] }
 0x73e   : > { %v3065_v3 = vpop.permute.xlu0 %3064  ;;  %2980 = vrot.lane.b32.xlu2 %v2202_v32, %s4236_s23  ;;  %v3161_v31 = vpop.permute.xlu1 %3160  ;;  %v4220_v32 = vld [vmem:[#allocation2 + $0x138] sm:$0xff]  ;;  %s8863_s23 = scalar_lea.vmem %s9021_s3, %s4122_s15 }
 0x73f   : > { %v3423_v58 = vsel %vm1547_vm11, %v3391_v28, %v3065_v3  ;;  %v3232_v11 = vsel %vm203_vm0, %v4220_v32, %v9929_v39  ;;  %v3265_v28 = vsel %vm1382_vm5, %v3233_v35, %v9937_v63  ;;  %v9940_v39 = vld [vmem:[#allocation141_spill] sm:$0xff] }
 0x740   : > { %v3455_v0 = vsel %vm1580_vm10, %v3423_v58, %v3161_v31  ;;  %v3163_v12 = vpop.permute.xlu2 %3162  ;;  %v3264_v30 = vsel %vm1382_vm5, %v3232_v11, %v9931_v51  ;;  %v9938_v31 = vld [vmem:[#allocation70_spill] sm:$0xff] }
 0x741   : > { %4113 = vmatmul.msk.f32.gmra.mxu3 %vm1618_vm12, %v3455_v0  ;;  %v3296_v57 = vsel %vm1415_vm6, %v3264_v30, %v9932_v41  ;;  %v3297_v0 = vsel %vm1415_vm6, %v3265_v28, %v9938_v31 }
 0x744   : > { %3076 = vrot.lane.b32.xlu0 %v2432_v18, %s4237_s24  ;;  %3172 = vrot.lane.b32.xlu1 %v2437_v48, %s4238_s25 }
 0x746   : > { %v2849_v2 = vpop.permute.xlu0 %2848  ;;  %v2779_v27 = vpop.permute.xlu1 %2778 }
 0x747   : > { %v3347_v45 = vsel %vm1481_vm7, %v3315_v21, %v2849_v2  ;;  %v3328_v42 = vsel %vm1448_vm8, %v3296_v57, %v2779_v27 }
 0x748   : > { %v2781_v4 = vpop.permute.xlu2 %2780  ;;  %v3379_v19 = vsel %vm1514_vm9, %v3347_v45, %v2945_v17  ;;  %v9942_v45 = vld [vmem:[#allocation174_spill] sm:$0xff] }
 0x749   : > { %v3329_v48 = vsel %vm1448_vm8, %v3297_v0, %v2781_v4  ;;  %v9949_v0 = vld [vmem:[#allocation129_spill] sm:$0xff] }
 0x74e   : > { %v2875_v56 = vpop.permute.xlu0 %2874  ;;  %v3041_v6 = vpop.permute.xlu1 %3040 }
 0x74f   : > { %v3360_v29 = vsel %vm1481_vm7, %v3328_v42, %v2875_v56  ;;  %v3411_v38 = vsel %vm1547_vm11, %v3379_v19, %v3041_v6  ;;  %v9939_v6 = vld [vmem:[#allocation85_spill] sm:$0xff]  ;;  %v3234_v42 = vsel %vm203_vm0, %v8076_v59, %v9942_v45  ;;  %v9943_v19 = vld [vmem:[#allocation68_spill] sm:$0xff] }
 0x750   : > { %v3392_v9 = vsel %vm1514_vm9, %v3360_v29, %v2971_v1  ;;  %v3043_v54 = vpop.permute.xlu2 %3042  ;;  %v3221_v4 = vsel %vm203_vm0, %v8053_v40, %v9939_v6 }
 0x751   : > { %v3253_v11 = vsel %vm1382_vm5, %v3221_v4, %v9940_v39  ;;  %v9951_v4 = vld [vmem:[#allocation126_spill] sm:$0xff]  ;;  %v9952_v39 = vld [vmem:[#allocation128_spill] sm:$0xff] }
 0x752   : > { %v3285_v51 = vsel %vm1415_vm6, %v3253_v11, %v9941_v14 }
 0x756   : > { %v3137_v7 = vpop.permute.xlu0 %3136  ;;  %v3067_v24 = vpop.permute.xlu1 %3066 }
 0x757   : > { %v3443_v49 = vsel %vm1580_vm10, %v3411_v38, %v3137_v7  ;;  %v3424_v34 = vsel %vm1547_vm11, %v3392_v9, %v3067_v24  ;;  %v3266_v38 = vsel %vm1382_vm5, %v3234_v42, %v9943_v19  ;;  %v9944_v9 = vld [vmem:[#allocation151_spill] sm:$0xff] }
 0x758   : > { %4101 = vmatmul.msk.f32.gmra.mxu1 %vm1618_vm12, %v3443_v49  ;;  %v3456_v44 = vsel %vm1580_vm10, %v3424_v34, %v3163_v12  ;;  %v3069_v17 = vpop.permute.xlu2 %3068  ;;  %v3298_v24 = vsel %vm1415_vm6, %v3266_v38, %v9944_v9  ;;  %v8446_v34 = vpop.f32.mrf.mxu1 }
 0x759   : > { %4114 = vmatmul.msk.f32.gmra.mxu3 %vm1618_vm12, %v3456_v44  ;;  %v8504_v9 = vpop.f32.mrf.mxu3 }
 0x75e   : > { %v2755_v26 = vpop.permute.xlu0 %2754  ;;  %v2851_v62 = vpop.permute.xlu1 %2850 }
 0x75f   : > { %v3316_v23 = vsel %vm1448_vm8, %v3284_v50, %v2755_v26  ;;  %v3267_v50 = vsel %vm1382_vm5, %v3235_v47, %v9946_v10  ;;  %v3679_v47 = vsel %vm203_vm0, %v8446_v34, 0.0 }
 0x760   : > { %v3348_v46 = vsel %vm1481_vm7, %v3316_v23, %v2851_v62  ;;  %v2853_v25 = vpop.permute.xlu2 %2852  ;;  %v8453_v61 = vpop.f32.mrf.mxu1 }
 0x761   : > { %v3680_v33 = vsel %vm203_vm0, %v8453_v61, 0.0 }
 0x762   : > { %v3681_v10 = vadd.f32 %v3680_v33, %v3679_v47 }
 0x766   : > { %v2947_v5 = vpop.permute.xlu0 %2946  ;;  %v2877_v53 = vpop.permute.xlu1 %2876 }
 0x767   : > { %v3380_v1 = vsel %vm1514_vm9, %v3348_v46, %v2947_v5  ;;  %v3361_v12 = vsel %vm1481_vm7, %v3329_v48, %v2877_v53  ;;  %v9947_v53 = vld [vmem:[#allocation175_spill] sm:$0xff]  ;;  %v9950_v48 = vld [vmem:[#allocation88_spill] sm:$0xff] }
 0x768   : > { %v3412_v58 = vsel %vm1547_vm11, %v3380_v1, %v3043_v54  ;;  %v2879_v27 = vpop.permute.xlu2 %2878  ;;  %v3299_v23 = vsel %vm1415_vm6, %v3267_v50, %v9947_v53  ;;  %v8465_v35 = vpop.f32.mrf.mxu1 }
 0x76e   : > { %v2973_v20 = vpop.permute.xlu0 %2972  ;;  %v3139_v3 = vpop.permute.xlu1 %3138 }
 0x76f   : > { %v3444_v18 = vsel %vm1580_vm10, %v3412_v58, %v3139_v3  ;;  %v3393_v2 = vsel %vm1514_vm9, %v3361_v12, %v2973_v20  ;;  %v9948_v58 = vld [vmem:[#allocation83_spill] sm:$0xff] }
 0x770   : > { %4102 = vmatmul.msk.f32.gmra.mxu1 %vm1618_vm12, %v3444_v18  ;;  %v3425_v55 = vsel %vm1547_vm11, %v3393_v2, %v3069_v17  ;;  %v3141_v43 = vpop.permute.xlu2 %3140  ;;  %v3236_v31 = vsel %vm203_vm0, %v8176_v37, %v9948_v58 }
 0x771   : > { %v3268_v18 = vsel %vm1382_vm5, %v3236_v31, %v9949_v0 }
 0x772   : > { %v3300_v12 = vsel %vm1415_vm6, %v3268_v18, %v9950_v48 }
 0x776   : > { %v3165_v36 = vpop.permute.xlu0 %3164  ;;  %v2757_v56 = vpop.permute.xlu1 %2756 }
 0x777   : > { %v3457_v15 = vsel %vm1580_vm10, %v3425_v55, %v3165_v36  ;;  %v3317_v30 = vsel %vm1448_vm8, %v3285_v51, %v2757_v56  ;;  %v9953_v51 = vld [vmem:[#allocation192_spill] sm:$0xff] }
 0x778   : > { %4115 = vmatmul.msk.f32.gmra.mxu3 %vm1618_vm12, %v3457_v15  ;;  %v3349_v21 = vsel %vm1481_vm7, %v3317_v30, %v2853_v25  ;;  %v2785_v49 = vpop.permute.xlu2 %2784 }
 0x779   : > { %v3331_v25 = vsel %vm1448_vm8, %v3299_v23, %v2785_v49  ;;  %v8508_v49 = vpop.f32.mrf.mxu3 }
 0x77e   : > { %v2783_v60 = vpop.permute.xlu0 %2782  ;;  %v2949_v32 = vpop.permute.xlu1 %2948 }
 0x77f   : > { %v3381_v41 = vsel %vm1514_vm9, %v3349_v21, %v2949_v32  ;;  %v3330_v54 = vsel %vm1448_vm8, %v3298_v24, %v2783_v60  ;;  %v3237_v32 = vsel %vm203_vm0, %v8229_v13, %v9951_v4 }
 0x780   : > { %v3362_v59 = vsel %vm1481_vm7, %v3330_v54, %v2879_v27  ;;  %v3073_v5 = vpop.permute.xlu2 %3072  ;;  %v8478_v27 = vpop.f32.mrf.mxu1  ;;  %v3269_v11 = vsel %vm1382_vm5, %v3237_v32, %v9952_v39 }
 0x781   : > { %v3301_v30 = vsel %vm1415_vm6, %v3269_v11, %v9953_v51  ;;  %v3684_v53 = vsel %vm203_vm0, %v8478_v27, 0.0 }
 0x786   : > { %v3045_v57 = vpop.permute.xlu0 %3044  ;;  %v2975_v29 = vpop.permute.xlu1 %2974 }
 0x787   : > { %v3413_v40 = vsel %vm1547_vm11, %v3381_v41, %v3045_v57  ;;  %v3394_v44 = vsel %vm1514_vm9, %v3362_v59, %v2975_v29  ;;  %v8512_v59 = vpop.f32.mrf.mxu3 }
 0x788   : > { %v3445_v7 = vsel %vm1580_vm10, %v3413_v40, %v3141_v43  ;;  %v2883_v20 = vpop.permute.xlu2 %2882  ;;  %v8490_v43 = vpop.f32.mrf.mxu1 }
 0x789   : > { %4103 = vmatmul.msk.f32.gmra.mxu1 %vm1618_vm12, %v3445_v7 }
 0x78e   : > { %v3071_v26 = vpop.permute.xlu0 %3070  ;;  %v3167_v17 = vpop.permute.xlu1 %3166 }
 0x78f   : > { %v3426_v62 = vsel %vm1547_vm11, %v3394_v44, %v3071_v26  ;;  %v8516_v26 = vpop.f32.mrf.mxu3 }
 0x790   : > { %v3458_v16 = vsel %vm1580_vm10, %v3426_v62, %v3167_v17  ;;  %v3171_v56 = vpop.permute.xlu2 %3170  ;;  %v8496_v42 = vpop.f32.mrf.mxu1 }
 0x791   : > { %4116 = vmatmul.msk.f32.gmra.mxu3 %vm1618_vm12, %v3458_v16 }
 0x796   : > { %v2881_v46 = vpop.permute.xlu0 %2880  ;;  %v2977_v1 = vpop.permute.xlu1 %2976 }
 0x797   : > { %v3363_v52 = vsel %vm1481_vm7, %v3331_v25, %v2881_v46  ;;  %v8520_v17 = vpop.f32.mrf.mxu3  ;;  %v3686_v25 = vsel %vm203_vm0, %v8490_v43, 0.0 }
 0x798   : > { %v3395_v22 = vsel %vm1514_vm9, %v3363_v52, %v2977_v1  ;;  %v2981_v45 = vpop.permute.xlu2 %2980  ;;  %v8502_v7 = vpop.f32.mrf.mxu1  ;;  %v3688_v52 = vsel %vm203_vm0, %v8496_v42, 0.0 }
 0x799   : > { %v3427_v8 = vsel %vm1547_vm11, %v3395_v22, %v3073_v5  ;;  %v3682_v5 = vsel %vm203_vm0, %v8465_v35, 0.0 }
 0x79a   : > { %v3683_v23 = vadd.f32 %v3682_v5, %v3681_v10  ;;  %v3718_v5 = vsel %vm203_vm0, %v8520_v17, 0.0 }
 0x79c   : > { %v3685_v1 = vadd.f32 %v3684_v53, %v3683_v23 }
 0x79e   : > { %v3169_v63 = vpop.permute.xlu0 %3168  ;;  %v2787_v28 = vpop.permute.xlu1 %2786  ;;  %v3687_v22 = vadd.f32 %v3686_v25, %v3685_v1 }
 0x79f   : > { %v3459_v3 = vsel %vm1580_vm10, %v3427_v8, %v3169_v63  ;;  %v3332_v2 = vsel %vm1448_vm8, %v3300_v12, %v2787_v28  ;;  %v8530_v50 = vpop.f32.mrf.mxu3 }
 0x7a0   : > { %4117 = vmatmul.msk.f32.gmra.mxu3 %vm1618_vm12, %v3459_v3  ;;  %v3364_v55 = vsel %vm1481_vm7, %v3332_v2, %v2883_v20  ;;  %v8506_v24 = vpop.f32.mrf.mxu1  ;;  %v3690_v20 = vsel %vm203_vm0, %v8502_v7, 0.0  ;;  %v3689_v63 = vadd.f32 %v3688_v52, %v3687_v22  ;;  %v3720_v53 = vsel %vm203_vm0, %v8530_v50, 0.0 }
 0x7a1   : > { %v3692_v28 = vsel %vm203_vm0, %v8506_v24, 0.0 }
 0x7a2   : > { %v3691_v3 = vadd.f32 %v3690_v20, %v3689_v63 }
 0x7a4   : > { %v3693_v0 = vadd.f32 %v3692_v28, %v3691_v3 }
 0x7a6   : > { %v2979_v36 = vpop.permute.xlu0 %2978  ;;  %v3075_v60 = vpop.permute.xlu1 %3074 }
 0x7a7   : > { %v3396_v15 = vsel %vm1514_vm9, %v3364_v55, %v2979_v36  ;;  %v8542_v8 = vpop.f32.mrf.mxu3 }
 0x7a8   : > { %v3428_v37 = vsel %vm1547_vm11, %v3396_v15, %v3075_v60  ;;  %v8510_v54 = vpop.f32.mrf.mxu1  ;;  %v3722_v1 = vsel %vm203_vm0, %v8542_v8, 0.0 }
 0x7a9   : > { %v3460_v6 = vsel %vm1580_vm10, %v3428_v37, %v3171_v56  ;;  %v3694_v31 = vsel %vm203_vm0, %v8510_v54, 0.0 }
 0x7aa   : > { %4118 = vmatmul.msk.f32.gmra.mxu3 %vm1618_vm12, %v3460_v6  ;;  %v3695_v48 = vadd.f32 %v3694_v31, %v3693_v0 }
 0x7ae   : > { %v2789_v14 = vpop.permute.xlu0 %2788  ;;  %v2885_v21 = vpop.permute.xlu1 %2884 }
 0x7af   : > { %v3333_v41 = vsel %vm1448_vm8, %v3301_v30, %v2789_v14  ;;  %v8554_v36 = vpop.f32.mrf.mxu3 }
 0x7b0   : > { %v3365_v57 = vsel %vm1481_vm7, %v3333_v41, %v2885_v21  ;;  %v8514_v44 = vpop.f32.mrf.mxu1  ;;  %v3710_v41 = vsel %vm203_vm0, %v8504_v9, 0.0  ;;  %v3724_v22 = vsel %vm203_vm0, %v8554_v36, 0.0 }
 0x7b1   : > { %v3397_v40 = vsel %vm1514_vm9, %v3365_v57, %v2981_v45  ;;  %v3696_v18 = vsel %vm203_vm0, %v8514_v44, 0.0  ;;  %v3712_v45 = vsel %vm203_vm0, %v8508_v49, 0.0 }
 0x7b2   : > { %v3697_v2 = vadd.f32 %v3696_v18, %v3695_v48 }
 0x7b6   : > { %v3077_v13 = vpop.permute.xlu0 %3076  ;;  %v3173_v19 = vpop.permute.xlu1 %3172 }
 0x7b7   : > { %v3429_v29 = vsel %vm1547_vm11, %v3397_v40, %v3077_v13  ;;  %v8566_v39 = vpop.f32.mrf.mxu3 }
 0x7b8   : > { %v3461_v38 = vsel %vm1580_vm10, %v3429_v29, %v3173_v19  ;;  %v8518_v62 = vpop.f32.mrf.mxu1  ;;  %v3714_v29 = vsel %vm203_vm0, %v8512_v59, 0.0  ;;  %v3726_v28 = vsel %vm203_vm0, %v8566_v39, 0.0 }
 0x7b9   : > { %4119 = vmatmul.msk.f32.gmra.mxu3 %vm1618_vm12, %v3461_v38  ;;  %v3698_v12 = vsel %vm203_vm0, %v8518_v62, 0.0  ;;  %v3716_v38 = vsel %vm203_vm0, %v8516_v26, 0.0 }
 0x7ba   : > { %v3699_v56 = vadd.f32 %v3698_v12, %v3697_v2 }
 0x7c0   : > { %v8522_v16 = vpop.f32.mrf.mxu1 }
 0x7c1   : > { %v3700_v55 = vsel %vm203_vm0, %v8522_v16, 0.0 }
 0x7c2   : > { %v3701_v37 = vadd.f32 %v3700_v55, %v3699_v56 }
 0x7c4   : > { %v8576_v40 = vpop.f32.mrf.mxu3 }
 0x7c5   : > { %v3728_v31 = vsel %vm203_vm0, %v8576_v40, 0.0 }
 0x7c8   : > { %v8534_v46 = vpop.f32.mrf.mxu1 }
 0x7c9   : > { %v3702_v60 = vsel %vm203_vm0, %v8534_v46, 0.0 }
 0x7ca   : > { %v3703_v4 = vadd.f32 %v3702_v60, %v3701_v37 }
 0x7d5   : > { %v8546_v58 = vpop.f32.mrf.mxu1 }
 0x7d6   : > { %v3704_v6 = vsel %vm203_vm0, %v8546_v58, 0.0 }
 0x7d7   : > { %v3705_v11 = vadd.f32 %v3704_v6, %v3703_v4 }
 0x7dc   : > { %v8582_v47 = vpop.f32.mrf.mxu3 }
 0x7dd   : > { %v3730_v48 = vsel %vm203_vm0, %v8582_v47, 0.0 }
 0x7ed   : > { %v8558_v15 = vpop.f32.mrf.mxu1 }
 0x7ee   : > { %v3706_v32 = vsel %vm203_vm0, %v8558_v15, 0.0 }
 0x7ef   : > { %v3707_v14 = vadd.f32 %v3706_v32, %v3705_v11 }
 0x7fb   : > { %v8588_v25 = vpop.f32.mrf.mxu3 }
 0x7fc   : > { %v3732_v2 = vsel %vm203_vm0, %v8588_v25, 0.0 }
 0x806   : > { %v8568_v51 = vpop.f32.mrf.mxu1 }
 0x807   : > { %v3708_v30 = vsel %vm203_vm0, %v8568_v51, 0.0 }
 0x808   : > { %v3709_v21 = vadd.f32 %v3708_v30, %v3707_v14 }
 0x80a   : > { %v3711_v57 = vadd.f32 %v3710_v41, %v3709_v21 }
 0x80c   : > { %v3713_v13 = vadd.f32 %v3712_v45, %v3711_v57 }
 0x80e   : > { %v3715_v19 = vadd.f32 %v3714_v29, %v3713_v13 }
 0x810   : > { %v3717_v33 = vadd.f32 %v3716_v38, %v3715_v19  ;;  %v9954_v38 = vld [vmem:[#allocation74_spill] sm:$0xff] }
 0x812   : > { %v3719_v10 = vadd.f32 %v3718_v5, %v3717_v33 }
 0x814   : > { %v3721_v23 = vadd.f32 %v3720_v53, %v3719_v10  ;;  %v8594_v63 = vpop.f32.mrf.mxu3 }
 0x815   : > { %v3734_v60 = vsel %vm203_vm0, %v8594_v63, 0.0 }
 0x816   : > { %v3723_v52 = vadd.f32 %v3722_v1, %v3721_v23 }
 0x818   : > { %v3725_v20 = vadd.f32 %v3724_v22, %v3723_v52 }
 0x81a   : > { %v3727_v3 = vadd.f32 %v3726_v28, %v3725_v20 }
 0x81c   : > { %v3729_v0 = vadd.f32 %v3728_v31, %v3727_v3 }
 0x81e   : > { %v3731_v12 = vadd.f32 %v3730_v48, %v3729_v0 }
 0x820   : > { %v3733_v55 = vadd.f32 %v3732_v2, %v3731_v12 }
 0x822   : > { %v3735_v37 = vadd.f32 %v3734_v60, %v3733_v55 }
 0x823   : > { %v8600_v18 = vpop.f32.mrf.mxu3 }
 0x824   : > { %v3736_v6 = vsel %vm203_vm0, %v8600_v18, 0.0 }
 0x825   : > { %v3737_v32 = vadd.f32 %v3736_v6, %v3735_v37 }
 0x82d   : > { %v8606_v56 = vpop.f32.mrf.mxu3 }
 0x82e   : > { %v3738_v4 = vsel %vm203_vm0, %v8606_v56, 0.0 }
 0x82f   : > { %v3739_v11 = vadd.f32 %v3738_v4, %v3737_v32 }
 0x83c   : > { %v8614_v14 = vpop.f32.mrf.mxu3 }
 0x83d   : > { %v3740_v30 = vsel %vm203_vm0, %v8614_v14, 0.0 }
 0x83e   : > { %v3741_v21 = vadd.f32 %v3740_v30, %v3739_v11 }
 0x840   : > { %v3742_v41 = vrot.slane %v3741_v21, 4 }
 0x842   : > { %v3743_v57 = vadd.f32 %v3742_v41, %v3741_v21 }
 0x844   : > { %v3744_v45 = vrot.slane %v3743_v57, 2 }
 0x846   : > { %v3745_v13 = vadd.f32 %v3744_v45, %v3743_v57 }
 0x848   : > { %v3746_v29 = vrot.slane %v3745_v13, 1 }
 0x84a   : > { %v3747_v19 = vadd.f32 %v3746_v29, %v3745_v13 }
 0x84c   : > { %v8619_v33 = vmul.f32 %v3747_v19, %v9954_v38 }
 0x84e   : > { %v8623_v5 = vsub.f32 %v8446_v34, %v8619_v33  ;;  %v8627_v10 = vsub.f32 %v8453_v61, %v8619_v33  ;;  %v8631_v53 = vsub.f32 %v8465_v35, %v8619_v33  ;;  %v8635_v23 = vsub.f32 %v8478_v27, %v8619_v33 }
 0x84f   : > { %v8643_v34 = vsub.f32 %v8490_v43, %v8619_v33  ;;  %v8649_v35 = vsub.f32 %v8496_v42, %v8619_v33  ;;  %v8657_v3 = vsub.f32 %v8502_v7, %v8619_v33  ;;  %v8664_v42 = vsub.f32 %v8506_v24, %v8619_v33 }
 0x850   : > { %v3781_v1 = vmul.f32 %v8623_v5, %v8623_v5  ;;  %v3782_v52 = vmul.f32 %v8627_v10, %v8627_v10  ;;  %v3783_v61 = vmul.f32 %v8631_v53, %v8631_v53  ;;  %v3784_v27 = vmul.f32 %v8635_v23, %v8635_v23 }
 0x851   : > { %v3785_v43 = vmul.f32 %v8643_v34, %v8643_v34  ;;  %v3786_v48 = vmul.f32 %v8649_v35, %v8649_v35  ;;  %v8671_v7 = vsub.f32 %v8510_v54, %v8619_v33  ;;  %v3787_v55 = vmul.f32 %v8657_v3, %v8657_v3 }
 0x852   : > { %v3813_v22 = vsel %vm203_vm0, %v3781_v1, 0.0  ;;  %v3814_v20 = vsel %vm203_vm0, %v3782_v52, 0.0  ;;  %v3816_v31 = vsel %vm203_vm0, %v3783_v61, 0.0  ;;  %v3818_v12 = vsel %vm203_vm0, %v3784_v27, 0.0 }
 0x853   : > { %v3815_v28 = vadd.f32 %v3814_v20, %v3813_v22  ;;  %v3820_v60 = vsel %vm203_vm0, %v3785_v43, 0.0  ;;  %v8678_v24 = vsub.f32 %v8514_v44, %v8619_v33  ;;  %v3788_v6 = vmul.f32 %v8664_v42, %v8664_v42 }
 0x854   : > { %v3822_v4 = vsel %vm203_vm0, %v3786_v48, 0.0  ;;  %v8685_v54 = vsub.f32 %v8518_v62, %v8619_v33  ;;  %v3789_v11 = vmul.f32 %v8671_v7, %v8671_v7  ;;  %v3824_v30 = vsel %vm203_vm0, %v3787_v55, 0.0 }
 0x855   : > { %v3817_v0 = vadd.f32 %v3816_v31, %v3815_v28  ;;  %v8692_v44 = vsub.f32 %v8522_v16, %v8619_v33  ;;  %v3790_v41 = vmul.f32 %v8678_v24, %v8678_v24  ;;  %v3826_v57 = vsel %vm203_vm0, %v3788_v6, 0.0 }
 0x856   : > { %v8699_v62 = vsub.f32 %v8534_v46, %v8619_v33  ;;  %v3791_v13 = vmul.f32 %v8685_v54, %v8685_v54  ;;  %v3828_v29 = vsel %vm203_vm0, %v3789_v11, 0.0  ;;  %v8706_v16 = vsub.f32 %v8546_v58, %v8619_v33 }
 0x857   : > { %v3819_v2 = vadd.f32 %v3818_v12, %v3817_v0  ;;  %v3792_v1 = vmul.f32 %v8692_v44, %v8692_v44  ;;  %v3830_v52 = vsel %vm203_vm0, %v3790_v41, 0.0  ;;  %v8713_v46 = vsub.f32 %v8558_v15, %v8619_v33 }
 0x858   : > { %v3793_v27 = vmul.f32 %v8699_v62, %v8699_v62  ;;  %v3832_v22 = vsel %vm203_vm0, %v3791_v13, 0.0  ;;  %v8720_v58 = vsub.f32 %v8568_v51, %v8619_v33  ;;  %v3794_v28 = vmul.f32 %v8706_v16, %v8706_v16 }
 0x859   : > { %v3821_v37 = vadd.f32 %v3820_v60, %v3819_v2  ;;  %v3834_v43 = vsel %vm203_vm0, %v3792_v1, 0.0  ;;  %v8727_v15 = vsub.f32 %v8504_v9, %v8619_v33  ;;  %v3795_v0 = vmul.f32 %v8713_v46, %v8713_v46 }
 0x85a   : > { %v3836_v48 = vsel %vm203_vm0, %v3793_v27, 0.0  ;;  %v8734_v51 = vsub.f32 %v8508_v49, %v8619_v33  ;;  %v3796_v2 = vmul.f32 %v8720_v58, %v8720_v58  ;;  %v3838_v55 = vsel %vm203_vm0, %v3794_v28, 0.0 }
 0x85b   : > { %v3823_v32 = vadd.f32 %v3822_v4, %v3821_v37  ;;  %v8741_v9 = vsub.f32 %v8512_v59, %v8619_v33  ;;  %v3797_v37 = vmul.f32 %v8727_v15, %v8727_v15  ;;  %v3840_v6 = vsel %vm203_vm0, %v3795_v0, 0.0 }
 0x85c   : > { %v8748_v49 = vsub.f32 %v8516_v26, %v8619_v33  ;;  %v3842_v11 = vsel %vm203_vm0, %v3796_v2, 0.0  ;;  %v8755_v59 = vsub.f32 %v8520_v17, %v8619_v33  ;;  %v8762_v26 = vsub.f32 %v8530_v50, %v8619_v33 }
 0x85d   : > { %v3825_v21 = vadd.f32 %v3824_v30, %v3823_v32  ;;  %v3798_v32 = vmul.f32 %v8734_v51, %v8734_v51  ;;  %v3844_v41 = vsel %vm203_vm0, %v3797_v37, 0.0  ;;  %v8769_v17 = vsub.f32 %v8542_v8, %v8619_v33 }
 0x85e   : > { %v8776_v50 = vsub.f32 %v8554_v36, %v8619_v33  ;;  %v8783_v8 = vsub.f32 %v8566_v39, %v8619_v33  ;;  %v8790_v36 = vsub.f32 %v8576_v40, %v8619_v33  ;;  %v8797_v39 = vsub.f32 %v8582_v47, %v8619_v33 }
 0x85f   : > { %v3827_v45 = vadd.f32 %v3826_v57, %v3825_v21  ;;  %v3799_v21 = vmul.f32 %v8741_v9, %v8741_v9  ;;  %v3846_v13 = vsel %vm203_vm0, %v3798_v32, 0.0  ;;  %v8804_v40 = vsub.f32 %v8588_v25, %v8619_v33 }
 0x860   : > { %v8811_v47 = vsub.f32 %v8594_v63, %v8619_v33  ;;  %v8818_v25 = vsub.f32 %v8600_v18, %v8619_v33  ;;  %v8825_v63 = vsub.f32 %v8606_v56, %v8619_v33  ;;  %v8832_v18 = vsub.f32 %v8614_v14, %v8619_v33 }
 0x861   : > { %v3829_v19 = vadd.f32 %v3828_v29, %v3827_v45  ;;  %v3800_v45 = vmul.f32 %v8748_v49, %v8748_v49  ;;  %v3848_v1 = vsel %vm203_vm0, %v3799_v21, 0.0 }
 0x862   : > { %v3811_v56 = vmul.f32 %v8825_v63, %v8825_v63 }
 0x863   : > { %v3831_v61 = vadd.f32 %v3830_v52, %v3829_v19  ;;  %v3801_v19 = vmul.f32 %v8755_v59, %v8755_v59  ;;  %v3850_v27 = vsel %vm203_vm0, %v3800_v45, 0.0 }
 0x864   : > { %v3872_v14 = vsel %vm203_vm0, %v3811_v56, 0.0 }
 0x865   : > { %v3833_v20 = vadd.f32 %v3832_v22, %v3831_v61  ;;  %v3802_v61 = vmul.f32 %v8762_v26, %v8762_v26  ;;  %v3852_v28 = vsel %vm203_vm0, %v3801_v19, 0.0 }
 0x867   : > { %v3835_v31 = vadd.f32 %v3834_v43, %v3833_v20  ;;  %v3803_v20 = vmul.f32 %v8769_v17, %v8769_v17  ;;  %v3854_v0 = vsel %vm203_vm0, %v3802_v61, 0.0 }
 0x869   : > { %v3837_v12 = vadd.f32 %v3836_v48, %v3835_v31  ;;  %v3804_v31 = vmul.f32 %v8776_v50, %v8776_v50  ;;  %v3856_v2 = vsel %vm203_vm0, %v3803_v20, 0.0 }
 0x86b   : > { %v3839_v60 = vadd.f32 %v3838_v55, %v3837_v12  ;;  %v3805_v12 = vmul.f32 %v8783_v8, %v8783_v8  ;;  %v3858_v37 = vsel %vm203_vm0, %v3804_v31, 0.0 }
 0x86d   : > { %v3841_v4 = vadd.f32 %v3840_v6, %v3839_v60  ;;  %v3806_v60 = vmul.f32 %v8790_v36, %v8790_v36  ;;  %v3860_v32 = vsel %vm203_vm0, %v3805_v12, 0.0 }
 0x86f   : > { %v3843_v30 = vadd.f32 %v3842_v11, %v3841_v4  ;;  %v3807_v4 = vmul.f32 %v8797_v39, %v8797_v39  ;;  %v3862_v21 = vsel %vm203_vm0, %v3806_v60, 0.0 }
 0x871   : > { %v3845_v57 = vadd.f32 %v3844_v41, %v3843_v30  ;;  %v3808_v30 = vmul.f32 %v8804_v40, %v8804_v40  ;;  %v3864_v45 = vsel %vm203_vm0, %v3807_v4, 0.0 }
 0x873   : > { %v3847_v29 = vadd.f32 %v3846_v13, %v3845_v57  ;;  %v3809_v57 = vmul.f32 %v8811_v47, %v8811_v47  ;;  %v3866_v19 = vsel %vm203_vm0, %v3808_v30, 0.0 }
 0x875   : > { %v3849_v52 = vadd.f32 %v3848_v1, %v3847_v29  ;;  %v3810_v29 = vmul.f32 %v8818_v25, %v8818_v25 }
 0x877   : > { %v3851_v22 = vadd.f32 %v3850_v27, %v3849_v52  ;;  %v3868_v52 = vsel %vm203_vm0, %v3809_v57, 0.0  ;;  %v3812_v27 = vmul.f32 %v8832_v18, %v8832_v18 }
 0x879   : > { %v3853_v43 = vadd.f32 %v3852_v28, %v3851_v22  ;;  %v3870_v22 = vsel %vm203_vm0, %v3810_v29, 0.0  ;;  %v3874_v28 = vsel %vm203_vm0, %v3812_v27, 0.0 }
 0x87b   : > { %v3855_v48 = vadd.f32 %v3854_v0, %v3853_v43 }
 0x87d   : > { %v3857_v55 = vadd.f32 %v3856_v2, %v3855_v48 }
 0x87f   : > { %v3859_v6 = vadd.f32 %v3858_v37, %v3857_v55 }
 0x881   : > { %v3861_v11 = vadd.f32 %v3860_v32, %v3859_v6 }
 0x883   : > { %v3863_v41 = vadd.f32 %v3862_v21, %v3861_v11 }
 0x885   : > { %v3865_v13 = vadd.f32 %v3864_v45, %v3863_v41 }
 0x887   : > { %v3867_v1 = vadd.f32 %v3866_v19, %v3865_v13  ;;  %v9956_v19 = vld [vmem:[#allocation6_spill] sm:$0xff] }
 0x889   : > { %v3869_v61 = vadd.f32 %v3868_v52, %v3867_v1  ;;  %v9957_v1 = vld [vmem:[#allocation3_spill] sm:$0xff] }
 0x88b   : > { %v3871_v20 = vadd.f32 %v3870_v22, %v3869_v61  ;;  %v9958_v61 = vld [vmem:[#allocation4_spill] sm:$0xff] }
 0x88d   : > { %v3873_v33 = vadd.f32 %v3872_v14, %v3871_v20  ;;  %v9960_v14 = vld [vmem:[#allocation8_spill] sm:$0xff] }
 0x88f   : > { %v3875_v43 = vadd.f32 %v3874_v28, %v3873_v33  ;;  %v9961_v28 = vld [vmem:[#allocation9_spill] sm:$0xff] }
 0x891   : > { %v3876_v31 = vrot.slane %v3875_v43, 4 }
 0x893   : > { %v3877_v0 = vadd.f32 %v3876_v31, %v3875_v43  ;;  %v9962_v31 = vld [vmem:[#allocation10_spill] sm:$0xff] }
 0x895   : > { %v3878_v48 = vrot.slane %v3877_v0, 2 }
 0x897   : > { %v3879_v12 = vadd.f32 %v3878_v48, %v3877_v0  ;;  %v9963_v48 = vld [vmem:[#allocation11_spill] sm:$0xff] }
 0x899   : > { %v3880_v2 = vrot.slane %v3879_v12, 1 }
 0x89b   : > { %v3881_v55 = vadd.f32 %v3880_v2, %v3879_v12  ;;  %v9964_v2 = vld [vmem:[#allocation12_spill] sm:$0xff] }
 0x89d   : > { %v3882_v60 = vmul.f32 %v3881_v55, %v9954_v38 }
 0x89f   : > { %v3883_v37 = vadd.f32 1e-05, %v3882_v60  ;;  %v9965_v60 = vld [vmem:[#allocation13_spill] sm:$0xff] }
 0x8a1   : > { %4156 = vrsqrt.f32 %v3883_v37  ;;  %vm3890_vm3 = vweird.f32 %v3883_v37 }
 0x8a7   : > { %v4157_v6 = vpop.eup %4156 }
 0x8a8   : > { %v3885_v4 = vmul.f32 %v4157_v6, %v3883_v37  ;;  %vm3891_vm1 = vweird.f32 %v4157_v6 }
 0x8a9   : > { %vm3892_vm4 = vmor %vm3890_vm3, %vm3891_vm1 }
 0x8aa   : > { %v3886_v32 = vmul.f32 %v4157_v6, %v3885_v4 }
 0x8ac   : > { %v3887_v11 = vmul.f32 0.5, %v3886_v32  ;;  %v9967_v32 = vld [vmem:[#allocation15_spill] sm:$0xff] }
 0x8ae   : > { %v3888_v30 = vsub.f32 1.5, %v3887_v11 }
 0x8b0   : > { %v3889_v21 = vmul.f32 %v4157_v6, %v3888_v30  ;;  %v9968_v30 = vld [vmem:[#allocation16_spill] sm:$0xff] }
 0x8b2   : > { %v8846_v41 = vsel %vm3892_vm4, %v4157_v6, %v3889_v21  ;;  %v9966_v6 = vld [vmem:[#allocation14_spill] sm:$0xff] }
 0x8b3   : > { %v3894_v57 = vmul.f32 %v8846_v41, %v8623_v5  ;;  %v3895_v38 = vmul.f32 %v8846_v41, %v8627_v10  ;;  %v3896_v45 = vmul.f32 %v8846_v41, %v8631_v53  ;;  %v3897_v13 = vmul.f32 %v8846_v41, %v8635_v23  ;;  %v9955_v53 = vld [vmem:[#allocation5_spill] sm:$0xff] }
 0x8b4   : > { %v3898_v29 = vmul.f32 %v8846_v41, %v8643_v34  ;;  %v3899_v5 = vmul.f32 %v8846_v41, %v8649_v35  ;;  %v3900_v10 = vmul.f32 %v8846_v41, %v8657_v3  ;;  %v3901_v52 = vmul.f32 %v8846_v41, %v8664_v42  ;;  %v9959_v35 = vld [vmem:[#allocation7_spill] sm:$0xff] }
 0x8b5   : > { %v3926_v23 = vadd.f32 %v3894_v57, %v9955_v53  ;;  %v3927_v34 = vadd.f32 %v3895_v38, %v9956_v19  ;;  %v3928_v56 = vadd.f32 %v3896_v45, %v9957_v1  ;;  %v3929_v27 = vadd.f32 %v3897_v13, %v9958_v61  ;;  %v9969_v57 = vld [vmem:[#allocation17_spill] sm:$0xff]  ;;  %v9970_v45 = vld [vmem:[#allocation18_spill] sm:$0xff]  ;;  %v9976_v61 = vld [vmem:[#allocation27_spill] sm:$0xff] }
 0x8b6   : > { %v3902_v22 = vmul.f32 %v8846_v41, %v8671_v7  ;;  %v3930_v20 = vadd.f32 %v3898_v29, %v9959_v35  ;;  %v3903_v3 = vmul.f32 %v8846_v41, %v8678_v24  ;;  %v3931_v33 = vadd.f32 %v3899_v5, %v9960_v14  ;;  %v9971_v29 = vld [vmem:[#allocation19_spill] sm:$0xff]  ;;  %v9979_v14 = vld [vmem:[#allocation32_spill] sm:$0xff] }
 0x8b7   : > { %3958 = vst.msk [vmem:[%s8863_s23] sm:$0xff] %vm203_vm0, %v3926_v23  ;;  %v3904_v42 = vmul.f32 %v8846_v41, %v8685_v54  ;;  %v3932_v43 = vadd.f32 %v3900_v10, %v9961_v28  ;;  %v3905_v7 = vmul.f32 %v8846_v41, %v8692_v44  ;;  %v3933_v0 = vadd.f32 %v3901_v52, %v9962_v31  ;;  %v9972_v10 = vld [vmem:[#allocation20_spill] sm:$0xff]  ;;  %v9973_v23 = vld [vmem:[#allocation22_spill] sm:$0xff] }
 0x8b8   : > { %3959 = vst.msk [vmem:[%s8863_s23 + $0x8] sm:$0xff] %vm203_vm0, %v3927_v34  ;;  %v3906_v24 = vmul.f32 %v8846_v41, %v8699_v62  ;;  %v3934_v12 = vadd.f32 %v3902_v22, %v9963_v48  ;;  %v3907_v54 = vmul.f32 %v8846_v41, %v8706_v16  ;;  %v3935_v55 = vadd.f32 %v3903_v3, %v9964_v2  ;;  %v9974_v34 = vld [vmem:[#allocation23_spill] sm:$0xff]  ;;  %v9977_v22 = vld [vmem:[#allocation28_spill] sm:$0xff]  ;;  %v9984_v48 = vld [vmem:[#allocation41_spill] sm:$0xff] }
 0x8b9   : > { %3960 = vst.msk [vmem:[%s8863_s23 + $0x10] sm:$0xff] %vm203_vm0, %v3928_v56  ;;  %v3908_v44 = vmul.f32 %v8846_v41, %v8713_v46  ;;  %v3936_v37 = vadd.f32 %v3904_v42, %v9965_v60  ;;  %v3909_v62 = vmul.f32 %v8846_v41, %v8720_v58  ;;  %v3937_v4 = vadd.f32 %v3905_v7, %v9966_v6  ;;  %v9975_v56 = vld [vmem:[#allocation26_spill] sm:$0xff]  ;;  %v9980_v42 = vld [vmem:[#allocation33_spill] sm:$0xff] }
 0x8ba   : > { %3961 = vst.msk [vmem:[%s8863_s23 + $0x18] sm:$0xff] %vm203_vm0, %v3929_v27  ;;  %v3910_v16 = vmul.f32 %v8846_v41, %v8727_v15  ;;  %v3938_v11 = vadd.f32 %v3906_v24, %v9967_v32  ;;  %v3911_v46 = vmul.f32 %v8846_v41, %v8734_v51  ;;  %v3939_v21 = vadd.f32 %v3907_v54, %v9968_v30  ;;  %v9986_v2 = vld [vmem:[#allocation122_spill] sm:$0xff] }
 0x8bb   : > { %3962 = vst.msk [vmem:[%s8863_s23 + $0x20] sm:$0xff] %vm203_vm0, %v3930_v20  ;;  %v3912_v58 = vmul.f32 %v8846_v41, %v8741_v9  ;;  %v3940_v38 = vadd.f32 %v3908_v44, %v9969_v57  ;;  %v3913_v15 = vmul.f32 %v8846_v41, %v8748_v49  ;;  %v3941_v13 = vadd.f32 %v3909_v62, %v9970_v45  ;;  %v9978_v20 = vld [vmem:[#allocation29_spill] sm:$0xff] }
 0x8bc   : > { %3963 = vst.msk [vmem:[%s8863_s23 + $0x28] sm:$0xff] %vm203_vm0, %v3931_v33  ;;  %v3914_v51 = vmul.f32 %v8846_v41, %v8755_v59  ;;  %v3942_v5 = vadd.f32 %v3910_v16, %v9971_v29  ;;  %v3915_v9 = vmul.f32 %v8846_v41, %v8762_v26  ;;  %v3943_v53 = vadd.f32 %v3911_v46, %v9972_v10 }
 0x8bd   : > { %3964 = vst.msk [vmem:[%s8863_s23 + $0x30] sm:$0xff] %vm203_vm0, %v3932_v43  ;;  %v3916_v49 = vmul.f32 %v8846_v41, %v8769_v17  ;;  %v3944_v19 = vadd.f32 %v3912_v58, %v9973_v23  ;;  %v3917_v59 = vmul.f32 %v8846_v41, %v8776_v50  ;;  %v3945_v1 = vadd.f32 %v3913_v15, %v9974_v34  ;;  %v9981_v43 = vld [vmem:[#allocation37_spill] sm:$0xff] }
 0x8be   : > { %3965 = vst.msk [vmem:[%s8863_s23 + $0x38] sm:$0xff] %vm203_vm0, %v3933_v0  ;;  %v3918_v26 = vmul.f32 %v8846_v41, %v8783_v8  ;;  %v3946_v52 = vadd.f32 %v3914_v51, %v9975_v56  ;;  %v3919_v17 = vmul.f32 %v8846_v41, %v8790_v36  ;;  %v3947_v27 = vadd.f32 %v3915_v9, %v9976_v61  ;;  %v9983_v0 = vld [vmem:[#allocation40_spill] sm:$0xff] }
 0x8bf   : > { %3966 = vst.msk [vmem:[%s8863_s23 + $0x40] sm:$0xff] %vm203_vm0, %v3934_v12  ;;  %v3920_v50 = vmul.f32 %v8846_v41, %v8797_v39  ;;  %v3948_v35 = vadd.f32 %v3916_v49, %v9977_v22  ;;  %v3921_v8 = vmul.f32 %v8846_v41, %v8804_v40  ;;  %v3949_v3 = vadd.f32 %v3917_v59, %v9978_v20 }
 0x8c0   : > { %3967 = vst.msk [vmem:[%s8863_s23 + $0x48] sm:$0xff] %vm203_vm0, %v3935_v55  ;;  %v3922_v36 = vmul.f32 %v8846_v41, %v8811_v47  ;;  %v3950_v33 = vadd.f32 %v3918_v26, %v9979_v14  ;;  %v3923_v39 = vmul.f32 %v8846_v41, %v8818_v25  ;;  %v3951_v40 = vadd.f32 %v3919_v17, %v9980_v42  ;;  %v9982_v25 = vld [vmem:[#allocation38_spill] sm:$0xff] }
 0x8c1   : > { %3968 = vst.msk [vmem:[%s8863_s23 + $0x50] sm:$0xff] %vm203_vm0, %v3936_v37  ;;  %v3924_v28 = vmul.f32 %v8846_v41, %v8825_v63  ;;  %v3952_v47 = vadd.f32 %v3920_v50, %v9981_v43  ;;  %v3925_v7 = vmul.f32 %v8846_v41, %v8832_v18  ;;  %v3953_v31 = vadd.f32 %v3921_v8, %v9982_v25  ;;  %v9985_v63 = vld [vmem:[#allocation121_spill] sm:$0xff] }
 0x8c2   : > { %3969 = vst.msk [vmem:[%s8863_s23 + $0x58] sm:$0xff] %vm203_vm0, %v3937_v4  ;;  %v3954_v24 = vadd.f32 %v3922_v36, %v9983_v0  ;;  %v3955_v12 = vadd.f32 %v3923_v39, %v9984_v48 }
 0x8c3   : > { %3970 = vst.msk [vmem:[%s8863_s23 + $0x60] sm:$0xff] %vm203_vm0, %v3938_v11  ;;  %v3956_v54 = vadd.f32 %v3924_v28, %v9985_v63  ;;  %v3957_v55 = vadd.f32 %v3925_v7, %v9986_v2 }
 0x8c4   : > { %3971 = vst.msk [vmem:[%s8863_s23 + $0x68] sm:$0xff] %vm203_vm0, %v3939_v21 }
 0x8c5   : > { %3972 = vst.msk [vmem:[%s8863_s23 + $0x70] sm:$0xff] %vm203_vm0, %v3940_v38 }
 0x8c6   : > { %3973 = vst.msk [vmem:[%s8863_s23 + $0x78] sm:$0xff] %vm203_vm0, %v3941_v13 }
 0x8c7   : > { %3974 = vst.msk [vmem:[%s8863_s23 + $0x80] sm:$0xff] %vm203_vm0, %v3942_v5 }
 0x8c8   : > { %3975 = vst.msk [vmem:[%s8863_s23 + $0x88] sm:$0xff] %vm203_vm0, %v3943_v53 }
 0x8c9   : > { %3976 = vst.msk [vmem:[%s8863_s23 + $0x90] sm:$0xff] %vm203_vm0, %v3944_v19 }
 0x8ca   : > { %3977 = vst.msk [vmem:[%s8863_s23 + $0x98] sm:$0xff] %vm203_vm0, %v3945_v1 }
 0x8cb   : > { %3978 = vst.msk [vmem:[%s8863_s23 + $0xa0] sm:$0xff] %vm203_vm0, %v3946_v52 }
 0x8cc   : > { %3979 = vst.msk [vmem:[%s8863_s23 + $0xa8] sm:$0xff] %vm203_vm0, %v3947_v27 }
 0x8cd   : > { %3980 = vst.msk [vmem:[%s8863_s23 + $0xb0] sm:$0xff] %vm203_vm0, %v3948_v35 }
 0x8ce   : > { %3981 = vst.msk [vmem:[%s8863_s23 + $0xb8] sm:$0xff] %vm203_vm0, %v3949_v3 }
 0x8cf   : > { %3982 = vst.msk [vmem:[%s8863_s23 + $0xc0] sm:$0xff] %vm203_vm0, %v3950_v33 }
 0x8d0   : > { %3983 = vst.msk [vmem:[%s8863_s23 + $0xc8] sm:$0xff] %vm203_vm0, %v3951_v40 }
 0x8d1   : > { %3984 = vst.msk [vmem:[%s8863_s23 + $0xd0] sm:$0xff] %vm203_vm0, %v3952_v47 }
 0x8d2   : > { %3985 = vst.msk [vmem:[%s8863_s23 + $0xd8] sm:$0xff] %vm203_vm0, %v3953_v31 }
 0x8d3   : > { %3986 = vst.msk [vmem:[%s8863_s23 + $0xe0] sm:$0xff] %vm203_vm0, %v3954_v24 }
 0x8d4   : > { %3987 = vst.msk [vmem:[%s8863_s23 + $0xe8] sm:$0xff] %vm203_vm0, %v3955_v12 }
 0x8d5   : > { %3988 = vst.msk [vmem:[%s8863_s23 + $0xf0] sm:$0xff] %vm203_vm0, %v3956_v54 }
 0x8d6   : > { %3989 = vst.msk [vmem:[%s8863_s23 + $0xf8] sm:$0xff] %vm203_vm0, %v3957_v55 }
 0x8d7 PF: > { %s13_s12 = sadd.s32 1, %s4228_s12  }
 0x8d8   : > { %p10_p4 = scmp.ge.s32.totalorder %s13_s12, 4  }
 0x8da   :  { %12 = sbr.rel (!%p10_p4) target bundleno = 1 (0x1), region = 63 }

</bundles_post_ra>
